<compile_context>
chip_gen: v5e
topology: v5e:2x2
jax: 0.10.0
libtpu: 0.0.40
codegen_flags: <defaults>
</compile_context>

<pallas_src>
import functools
import math

import jax
import jax.numpy as jnp
from jax.experimental import pallas as pl
from jax.experimental.pallas import tpu as pltpu


# ----------------------------- in-kernel math helpers -------------------------

def _layernorm(v, g, b, eps=1e-5):
    mu = jnp.mean(v, axis=-1, keepdims=True)
    var = jnp.mean((v - mu) ** 2, axis=-1, keepdims=True)
    return (v - mu) * jax.lax.rsqrt(var + eps) * g + b


def _attention_heads(q, k, v, wo_ref, bo, nhead, need_weights):
    """Multi-head attention core (torch.nn.MultiheadAttention semantics: eval
    mode, no masks, average_attn_weights=True).

    q: (Tq, D) f32; k, v: (Tk, D) f32; wo_ref: (D, D) bf16 Ref; bo: (1, D) f32.
    Returns (out (Tq, D) f32, head-averaged attn (Tq, Tk) f32 or None).
    """
    Tq, D = q.shape
    Tk = k.shape[0]
    Dh = D // nhead
    scale = 1.0 / float(Dh) ** 0.5
    bf16 = jnp.bfloat16

    out = jnp.zeros((Tq, D), jnp.float32)
    attn = jnp.zeros((Tq, Tk), jnp.float32) if need_weights else None
    for h in range(nhead):                       # static unroll over heads
        lo = h * Dh
        q_h = q[:, lo:lo + Dh].astype(bf16)
        k_h = k[:, lo:lo + Dh].astype(bf16)
        v_h = v[:, lo:lo + Dh].astype(bf16)
        # scores: contract the last dim of both operands -> no transpose.
        s = jax.lax.dot_general(
            q_h, k_h, (((1,), (1,)), ((), ())),
            preferred_element_type=jnp.float32) * scale          # (Tq, Tk) f32
        s = s - jnp.max(s, axis=-1, keepdims=True)
        p = jnp.exp(s)
        denom = jnp.sum(p, axis=-1, keepdims=True)
        p = p * pl.reciprocal(denom, approx=True)    # EUP slot, not VALU divide
        if need_weights:
            attn = attn + p
        ctx = jnp.dot(p.astype(bf16), v_h,
                      preferred_element_type=jnp.float32)        # (Tq, Dh)
        # output projection folded into the head loop (no lane-concat of ctx).
        out = out + jnp.dot(ctx.astype(bf16), wo_ref[lo:lo + Dh, :],
                            preferred_element_type=jnp.float32)
    out = out + bo
    if need_weights:
        attn = attn * (1.0 / nhead)
    return out, attn


# ----------------------------- Pallas kernel ---------------------------------

def decoder_layer_kernel(
        nhead, with_attn,
        # inputs
        tgt_tile_ref, tgt_full_ref, mem_ref,
        ln1_g_ref, ln1_b_ref,
        sa_wq_ref, sa_bq_ref, sa_wkv_ref, sa_bkv_ref, sa_wo_ref, sa_bo_ref,
        ln2_g_ref, ln2_b_ref,
        ca_wq_ref, ca_bq_ref, ca_wkv_ref, ca_bkv_ref, ca_wo_ref, ca_bo_ref,
        ln3_g_ref, ln3_b_ref,
        w1_ref, b1_ref, w2_ref, b2_ref,
        # outputs: (out,) or (out, self_attn, cross_attn)
        *out_refs):
    out_ref = out_refs[0]
    D = tgt_tile_ref.shape[-1]
    bf16 = jnp.bfloat16

    x = tgt_tile_ref[0]       # (TQ, D)  this grid step's query rows of tgt
    x_full = tgt_full_ref[0]  # (T, D)   full tgt (source of self-attn K/V)
    mem = mem_ref[0]          # (S, D)

    # --- self-attention block (pre-norm) ---
    t2_q = _layernorm(x, ln1_g_ref[...], ln1_b_ref[...])
    t2_kv = _layernorm(x_full, ln1_g_ref[...], ln1_b_ref[...])
    q = jnp.dot(t2_q.astype(bf16), sa_wq_ref[...],
                preferred_element_type=jnp.float32) + sa_bq_ref[...]
    kv = jnp.dot(t2_kv.astype(bf16), sa_wkv_ref[...],          # fused K|V proj
                 preferred_element_type=jnp.float32) + sa_bkv_ref[...]
    sa_out, sa_w = _attention_heads(q, kv[:, :D], kv[:, D:],
                                    sa_wo_ref, sa_bo_ref[...], nhead, with_attn)
    x = x + sa_out            # dropout1 == identity (eval)

    # --- cross-attention block ---
    t2 = _layernorm(x, ln2_g_ref[...], ln2_b_ref[...])
    q = jnp.dot(t2.astype(bf16), ca_wq_ref[...],
                preferred_element_type=jnp.float32) + ca_bq_ref[...]
    kv = jnp.dot(mem.astype(bf16), ca_wkv_ref[...],            # fused K|V proj
                 preferred_element_type=jnp.float32) + ca_bkv_ref[...]
    ca_out, ca_w = _attention_heads(q, kv[:, :D], kv[:, D:],
                                    ca_wo_ref, ca_bo_ref[...], nhead, with_attn)
    x = x + ca_out            # dropout2 == identity

    # --- feed-forward block (relu) ---
    t2 = _layernorm(x, ln3_g_ref[...], ln3_b_ref[...])
    h = jnp.maximum(
        jnp.dot(t2.astype(bf16), w1_ref[...],
                preferred_element_type=jnp.float32) + b1_ref[...], 0.0)
    ff = jnp.dot(h.astype(bf16), w2_ref[...],
                 preferred_element_type=jnp.float32) + b2_ref[...]
    x = x + ff                # dropout3 == identity

    out_ref[0] = x
    if with_attn:
        out_refs[1][0] = sa_w
        out_refs[2][0] = ca_w


# ----------------------------- wrapper ----------------------------------------

_PARAM_ORDER = [
    'ln1_g', 'ln1_b',
    'sa_wq', 'sa_bq', 'sa_wkv', 'sa_bkv', 'sa_wo', 'sa_bo',
    'ln2_g', 'ln2_b',
    'ca_wq', 'ca_bq', 'ca_wkv', 'ca_bkv', 'ca_wo', 'ca_bo',
    'ln3_g', 'ln3_b',
    'w1', 'b1', 'w2', 'b2',
]


def transformer_decoder_layer(tgt, memory, params, nhead,
                              return_attn_weights=True):
    B, T, D = tgt.shape
    S = memory.shape[1]
    assert D % nhead == 0
    bf16, f32 = jnp.bfloat16, jnp.float32

    # --- pack parameters: fused K|V weights, bf16 matmul weights, f32 biases --
    packed = {
        'ln1_g': params['ln1_g'], 'ln1_b': params['ln1_b'],
        'sa_wq': params['sa_wq'].astype(bf16), 'sa_bq': params['sa_bq'],
        'sa_wkv': jnp.concatenate([params['sa_wk'], params['sa_wv']],
                                  axis=1).astype(bf16),
        'sa_bkv': jnp.concatenate([params['sa_bk'], params['sa_bv']], axis=1),
        'sa_wo': params['sa_wo'].astype(bf16), 'sa_bo': params['sa_bo'],
        'ln2_g': params['ln2_g'], 'ln2_b': params['ln2_b'],
        'ca_wq': params['ca_wq'].astype(bf16), 'ca_bq': params['ca_bq'],
        'ca_wkv': jnp.concatenate([params['ca_wk'], params['ca_wv']],
                                  axis=1).astype(bf16),
        'ca_bkv': jnp.concatenate([params['ca_bk'], params['ca_bv']], axis=1),
        'ca_wo': params['ca_wo'].astype(bf16), 'ca_bo': params['ca_bo'],
        'ln3_g': params['ln3_g'], 'ln3_b': params['ln3_b'],
        'w1': params['w1'].astype(bf16), 'b1': params['b1'],
        'w2': params['w2'].astype(bf16), 'b2': params['b2'],
    }
    param_arrays = [packed[k] for k in _PARAM_ORDER]

    # --- query-sequence tiling (lane-dense; feeds both v7x TCs when T large) --
    TQ = 128 if (T % 128 == 0) else T
    n_qt = T // TQ

    act_specs = [
        pl.BlockSpec((1, TQ, D), lambda b, q: (b, q, 0)),   # tgt query tile
        pl.BlockSpec((1, T, D), lambda b, q: (b, 0, 0)),    # full tgt (K/V)
        pl.BlockSpec((1, S, D), lambda b, q: (b, 0, 0)),    # memory
    ]

    if return_attn_weights:
        out_shape = (jax.ShapeDtypeStruct((B, T, D), f32),
                     jax.ShapeDtypeStruct((B, T, T), f32),
                     jax.ShapeDtypeStruct((B, T, S), f32))
        out_specs = (pl.BlockSpec((1, TQ, D), lambda b, q: (b, q, 0)),
                     pl.BlockSpec((1, TQ, T), lambda b, q: (b, q, 0)),
                     pl.BlockSpec((1, TQ, S), lambda b, q: (b, q, 0)))
    else:
        out_shape = jax.ShapeDtypeStruct((B, T, D), f32)
        out_specs = pl.BlockSpec((1, TQ, D), lambda b, q: (b, q, 0))

    # --- VMEM budget from the resident block set (+ headroom) ----------------
    def nbytes(shape, itemsize):
        return math.prod(shape) * itemsize

    weight_bytes = sum(a.size * a.dtype.itemsize for a in param_arrays)
    act_bytes = (nbytes((1, TQ, D), 4) + nbytes((1, T, D), 4)
                 + nbytes((1, S, D), 4))
    out_bytes = nbytes((1, TQ, D), 4)
    if return_attn_weights:
        out_bytes += nbytes((1, TQ, T), 4) + nbytes((1, TQ, S), 4)

    def build(single_buffer_weights):
        def weight_spec(a):
            nd = a.ndim
            idx = lambda b, q, _nd=nd: (0,) * _nd
            if single_buffer_weights:
                # Constant index map over the whole grid -> no double buffer;
                # halves the weight VMEM footprint.
                return pl.BlockSpec(a.shape, idx, pipeline_mode=pl.Buffered(1))
            return pl.BlockSpec(a.shape, idx)

        wf = 1 if single_buffer_weights else 2
        resident = 2 * (act_bytes + out_bytes) + wf * weight_bytes
        vmem_limit = int(min(max(2 * resident + (8 << 20), 32 << 20), 48 << 20))

        return pl.pallas_call(
            functools.partial(decoder_layer_kernel, nhead, return_attn_weights),
            out_shape=out_shape,
            grid_spec=pltpu.PrefetchScalarGridSpec(
                num_scalar_prefetch=0,
                grid=(B, n_qt),
                in_specs=act_specs + [weight_spec(a) for a in param_arrays],
                out_specs=out_specs,
            ),
            compiler_params=pltpu.CompilerParams(
                dimension_semantics=("parallel", "parallel"),
                vmem_limit_bytes=vmem_limit),
        )(tgt, tgt, memory, *param_arrays)

    try:
        return build(single_buffer_weights=True)
    except Exception:
        # pl.Buffered(1) not accepted by this lowering path -> default buffering.
        return build(single_buffer_weights=False)


# ----------------------------- pure-JAX f32 reference -------------------------

def _mha_ref(q_in, kv_in, wq, bq, wk, bk, wv, bv, wo, bo, nhead):
    Tq, D = q_in.shape
    Tk = kv_in.shape[0]
    Dh = D // nhead
    q = (q_in @ wq + bq).reshape(Tq, nhead, Dh).transpose(1, 0, 2)
    k = (kv_in @ wk + bk).reshape(Tk, nhead, Dh).transpose(1, 0, 2)
    v = (kv_in @ wv + bv).reshape(Tk, nhead, Dh).transpose(1, 0, 2)
    scores = jnp.einsum('htd,hsd->hts', q, k) / (Dh ** 0.5)
    scores = scores - jnp.max(scores, axis=-1, keepdims=True)
    p = jnp.exp(scores)
    p = p / jnp.sum(p, axis=-1, keepdims=True)
    ctx = jnp.einsum('hts,hsd->htd', p, v).transpose(1, 0, 2).reshape(Tq, D)
    return ctx @ wo + bo, jnp.mean(p, axis=0)


def reference(tgt, memory, params, nhead):
    def one(x, mem):
        t2 = _layernorm(x, params['ln1_g'], params['ln1_b'])
        sa_out, sa_w = _mha_ref(t2, t2,
                                params['sa_wq'], params['sa_bq'],
                                params['sa_wk'], params['sa_bk'],
                                params['sa_wv'], params['sa_bv'],
                                params['sa_wo'], params['sa_bo'], nhead)
        x = x + sa_out
        t2 = _layernorm(x, params['ln2_g'], params['ln2_b'])
        ca_out, ca_w = _mha_ref(t2, mem,
                                params['ca_wq'], params['ca_bq'],
                                params['ca_wk'], params['ca_bk'],
                                params['ca_wv'], params['ca_bv'],
                                params['ca_wo'], params['ca_bo'], nhead)
        x = x + ca_out
        t2 = _layernorm(x, params['ln3_g'], params['ln3_b'])
        h = jnp.maximum(t2 @ params['w1'] + params['b1'], 0.0)
        x = x + (h @ params['w2'] + params['b2'])
        return x, sa_w, ca_w
    return jax.vmap(one)(tgt, memory)


# ----------------------------- parameter init ---------------------------------

def init_params(key, d_model, nhead, dim_feedforward):
    ks = jax.random.split(key, 12)
    s = 0.05

    def w(k, shape):
        return jax.random.normal(k, shape, jnp.float32) * s

    return {
        'ln1_g': jnp.ones((1, d_model), jnp.float32),
        'ln1_b': jnp.zeros((1, d_model), jnp.float32),
        'ln2_g': jnp.ones((1, d_model), jnp.float32),
        'ln2_b': jnp.zeros((1, d_model), jnp.float32),
        'ln3_g': jnp.ones((1, d_model), jnp.float32),
        'ln3_b': jnp.zeros((1, d_model), jnp.float32),
        'sa_wq': w(ks[0], (d_model, d_model)), 'sa_bq': jnp.zeros((1, d_model), jnp.float32),
        'sa_wk': w(ks[1], (d_model, d_model)), 'sa_bk': jnp.zeros((1, d_model), jnp.float32),
        'sa_wv': w(ks[2], (d_model, d_model)), 'sa_bv': jnp.zeros((1, d_model), jnp.float32),
        'sa_wo': w(ks[3], (d_model, d_model)), 'sa_bo': jnp.zeros((1, d_model), jnp.float32),
        'ca_wq': w(ks[4], (d_model, d_model)), 'ca_bq': jnp.zeros((1, d_model), jnp.float32),
        'ca_wk': w(ks[5], (d_model, d_model)), 'ca_bk': jnp.zeros((1, d_model), jnp.float32),
        'ca_wv': w(ks[6], (d_model, d_model)), 'ca_bv': jnp.zeros((1, d_model), jnp.float32),
        'ca_wo': w(ks[7], (d_model, d_model)), 'ca_bo': jnp.zeros((1, d_model), jnp.float32),
        'w1': w(ks[8], (d_model, dim_feedforward)),
        'b1': w(ks[9], (1, dim_feedforward)),
        'w2': w(ks[10], (dim_feedforward, d_model)),
        'b2': w(ks[11], (1, d_model)),
    }


# ----------------------------- main --------------------------------------------

if __name__ == "__main__":
    # Small but lane-dense feature dims (D, F multiples of 128).
    B, T, S, D, H, F = 2, 8, 16, 128, 4, 256

    key = jax.random.PRNGKey(0)
    k_tgt, k_mem, k_par = jax.random.split(key, 3)
    tgt = jax.random.normal(k_tgt, (B, T, D), jnp.float32)
    memory = jax.random.normal(k_mem, (B, S, D), jnp.float32)
    params = init_params(k_par, D, H, F)

    out, self_attn, cross_attn = transformer_decoder_layer(tgt, memory, params, H)
    out = jax.block_until_ready(out)
    self_attn = jax.block_until_ready(self_attn)
    cross_attn = jax.block_until_ready(cross_attn)

    # Optional fast path: skip the attention-weight HBM writeback entirely.
    out_only = transformer_decoder_layer(tgt, memory, params, H,
                                         return_attn_weights=False)
    out_only = jax.block_until_ready(out_only)

    ref_out, ref_sa, ref_ca = reference(tgt, memory, params, H)

    assert out.shape == (B, T, D)
    assert self_attn.shape == (B, T, T)
    assert cross_attn.shape == (B, T, S)
    # bf16 MXU operands + approx softmax reciprocal vs. an f32 reference.
    assert jnp.allclose(out, ref_out, atol=3e-2, rtol=3e-2)
    assert jnp.allclose(self_attn, ref_sa, atol=2e-2, rtol=2e-2)
    assert jnp.allclose(cross_attn, ref_ca, atol=2e-2, rtol=2e-2)
    assert jnp.allclose(out_only, out, atol=1e-3, rtol=1e-3)

    print("KERNEL_OK")
</pallas_src>

<mosaic_0001>
module attributes {stable_mosaic.version = 11 : i64} {
  func.func @decoder_layer_kernel(%arg0: i32, %arg1: i32, %arg2: memref<1x8x128xf32, #tpu.memory_space<vmem>>, %arg3: memref<1x8x128xf32, #tpu.memory_space<vmem>>, %arg4: memref<1x16x128xf32, #tpu.memory_space<vmem>>, %arg5: memref<1x128xf32, #tpu.memory_space<vmem>>, %arg6: memref<1x128xf32, #tpu.memory_space<vmem>>, %arg7: memref<128x128xbf16, #tpu.memory_space<vmem>>, %arg8: memref<1x128xf32, #tpu.memory_space<vmem>>, %arg9: memref<128x256xbf16, #tpu.memory_space<vmem>>, %arg10: memref<1x256xf32, #tpu.memory_space<vmem>>, %arg11: memref<128x128xbf16, #tpu.memory_space<vmem>>, %arg12: memref<1x128xf32, #tpu.memory_space<vmem>>, %arg13: memref<1x128xf32, #tpu.memory_space<vmem>>, %arg14: memref<1x128xf32, #tpu.memory_space<vmem>>, %arg15: memref<128x128xbf16, #tpu.memory_space<vmem>>, %arg16: memref<1x128xf32, #tpu.memory_space<vmem>>, %arg17: memref<128x256xbf16, #tpu.memory_space<vmem>>, %arg18: memref<1x256xf32, #tpu.memory_space<vmem>>, %arg19: memref<128x128xbf16, #tpu.memory_space<vmem>>, %arg20: memref<1x128xf32, #tpu.memory_space<vmem>>, %arg21: memref<1x128xf32, #tpu.memory_space<vmem>>, %arg22: memref<1x128xf32, #tpu.memory_space<vmem>>, %arg23: memref<128x256xbf16, #tpu.memory_space<vmem>>, %arg24: memref<1x256xf32, #tpu.memory_space<vmem>>, %arg25: memref<256x128xbf16, #tpu.memory_space<vmem>>, %arg26: memref<1x128xf32, #tpu.memory_space<vmem>>, %arg27: memref<1x8x128xf32, #tpu.memory_space<vmem>>, %arg28: memref<1x8x8xf32, #tpu.memory_space<vmem>>, %arg29: memref<1x8x16xf32, #tpu.memory_space<vmem>>) attributes {dimension_semantics = [#tpu.dimension_semantics<parallel>, #tpu.dimension_semantics<parallel>], iteration_bounds = array<i64: 2, 1>, scalar_prefetch = 0 : i64, scratch_operands = 0 : i64, tpu.core_type = #tpu.core_type<tc>, window_params = [{transform_indices = @transform_0, window_bounds = array<i64: 1, 8, 128>}, {transform_indices = @transform_1, window_bounds = array<i64: 1, 8, 128>}, {transform_indices = @transform_2, window_bounds = array<i64: 1, 16, 128>}, {pipeline_mode = #tpu.pipeline_mode<synchronous>, transform_indices = @transform_3, window_bounds = array<i64: 1, 128>}, {pipeline_mode = #tpu.pipeline_mode<synchronous>, transform_indices = @transform_4, window_bounds = array<i64: 1, 128>}, {pipeline_mode = #tpu.pipeline_mode<synchronous>, transform_indices = @transform_5, window_bounds = array<i64: 128, 128>}, {pipeline_mode = #tpu.pipeline_mode<synchronous>, transform_indices = @transform_6, window_bounds = array<i64: 1, 128>}, {pipeline_mode = #tpu.pipeline_mode<synchronous>, transform_indices = @transform_7, window_bounds = array<i64: 128, 256>}, {pipeline_mode = #tpu.pipeline_mode<synchronous>, transform_indices = @transform_8, window_bounds = array<i64: 1, 256>}, {pipeline_mode = #tpu.pipeline_mode<synchronous>, transform_indices = @transform_9, window_bounds = array<i64: 128, 128>}, {pipeline_mode = #tpu.pipeline_mode<synchronous>, transform_indices = @transform_10, window_bounds = array<i64: 1, 128>}, {pipeline_mode = #tpu.pipeline_mode<synchronous>, transform_indices = @transform_11, window_bounds = array<i64: 1, 128>}, {pipeline_mode = #tpu.pipeline_mode<synchronous>, transform_indices = @transform_12, window_bounds = array<i64: 1, 128>}, {pipeline_mode = #tpu.pipeline_mode<synchronous>, transform_indices = @transform_13, window_bounds = array<i64: 128, 128>}, {pipeline_mode = #tpu.pipeline_mode<synchronous>, transform_indices = @transform_14, window_bounds = array<i64: 1, 128>}, {pipeline_mode = #tpu.pipeline_mode<synchronous>, transform_indices = @transform_15, window_bounds = array<i64: 128, 256>}, {pipeline_mode = #tpu.pipeline_mode<synchronous>, transform_indices = @transform_16, window_bounds = array<i64: 1, 256>}, {pipeline_mode = #tpu.pipeline_mode<synchronous>, transform_indices = @transform_17, window_bounds = array<i64: 128, 128>}, {pipeline_mode = #tpu.pipeline_mode<synchronous>, transform_indices = @transform_18, window_bounds = array<i64: 1, 128>}, {pipeline_mode = #tpu.pipeline_mode<synchronous>, transform_indices = @transform_19, window_bounds = array<i64: 1, 128>}, {pipeline_mode = #tpu.pipeline_mode<synchronous>, transform_indices = @transform_20, window_bounds = array<i64: 1, 128>}, {pipeline_mode = #tpu.pipeline_mode<synchronous>, transform_indices = @transform_21, window_bounds = array<i64: 128, 256>}, {pipeline_mode = #tpu.pipeline_mode<synchronous>, transform_indices = @transform_22, window_bounds = array<i64: 1, 256>}, {pipeline_mode = #tpu.pipeline_mode<synchronous>, transform_indices = @transform_23, window_bounds = array<i64: 256, 128>}, {pipeline_mode = #tpu.pipeline_mode<synchronous>, transform_indices = @transform_24, window_bounds = array<i64: 1, 128>}, {transform_indices = @transform_25, window_bounds = array<i64: 1, 8, 128>}, {transform_indices = @transform_26, window_bounds = array<i64: 1, 8, 8>}, {transform_indices = @transform_27, window_bounds = array<i64: 1, 8, 16>}]} {
    %c0 = arith.constant 0 : index
    %c0_0 = arith.constant 0 : index
    %c0_1 = arith.constant 0 : index
    %0 = vector.load %arg2[%c0, %c0_0, %c0_1] : memref<1x8x128xf32, #tpu.memory_space<vmem>>, vector<1x8x128xf32>
    %1 = vector.shape_cast %0 : vector<1x8x128xf32> to vector<8x128xf32>
    %c0_2 = arith.constant 0 : index
    %c0_3 = arith.constant 0 : index
    %c0_4 = arith.constant 0 : index
    %2 = vector.load %arg3[%c0_2, %c0_3, %c0_4] : memref<1x8x128xf32, #tpu.memory_space<vmem>>, vector<1x8x128xf32>
    %3 = vector.shape_cast %2 : vector<1x8x128xf32> to vector<8x128xf32>
    %c0_5 = arith.constant 0 : index
    %c0_6 = arith.constant 0 : index
    %c0_7 = arith.constant 0 : index
    %4 = vector.load %arg4[%c0_5, %c0_6, %c0_7] : memref<1x16x128xf32, #tpu.memory_space<vmem>>, vector<1x16x128xf32>
    %5 = vector.shape_cast %4 : vector<1x16x128xf32> to vector<16x128xf32>
    %c0_8 = arith.constant 0 : index
    %c0_9 = arith.constant 0 : index
    %6 = vector.load %arg5[%c0_8, %c0_9] : memref<1x128xf32, #tpu.memory_space<vmem>>, vector<1x128xf32>
    %c0_10 = arith.constant 0 : index
    %c0_11 = arith.constant 0 : index
    %7 = vector.load %arg6[%c0_10, %c0_11] : memref<1x128xf32, #tpu.memory_space<vmem>>, vector<1x128xf32>
    %cst = arith.constant dense<0.000000e+00> : vector<8xf32>
    %8 = vector.multi_reduction <add>, %1, %cst [1] : vector<8x128xf32> to vector<8xf32>
    %9 = vector.shape_cast %8 : vector<8xf32> to vector<8x1xf32>
    %cst_12 = arith.constant 1.280000e+02 : f32
    %10 = vector.broadcast %cst_12 : f32 to vector<8x1xf32>
    %11 = arith.divf %9, %10 : vector<8x1xf32>
    %12 = vector.broadcast %11 : vector<8x1xf32> to vector<8x128xf32>
    %13 = arith.subf %1, %12 : vector<8x128xf32>
    %14 = arith.mulf %13, %13 : vector<8x128xf32>
    %cst_13 = arith.constant dense<0.000000e+00> : vector<8xf32>
    %15 = vector.multi_reduction <add>, %14, %cst_13 [1] : vector<8x128xf32> to vector<8xf32>
    %16 = vector.shape_cast %15 : vector<8xf32> to vector<8x1xf32>
    %cst_14 = arith.constant 1.280000e+02 : f32
    %17 = vector.broadcast %cst_14 : f32 to vector<8x1xf32>
    %18 = arith.divf %16, %17 : vector<8x1xf32>
    %19 = vector.broadcast %11 : vector<8x1xf32> to vector<8x128xf32>
    %20 = arith.subf %1, %19 : vector<8x128xf32>
    %cst_15 = arith.constant 9.99999974E-6 : f32
    %21 = vector.broadcast %cst_15 : f32 to vector<8x1xf32>
    %22 = arith.addf %18, %21 : vector<8x1xf32>
    %23 = math.rsqrt %22 : vector<8x1xf32>
    %24 = vector.broadcast %23 : vector<8x1xf32> to vector<8x128xf32>
    %25 = arith.mulf %20, %24 : vector<8x128xf32>
    %26 = vector.broadcast %6 : vector<1x128xf32> to vector<8x128xf32>
    %27 = arith.mulf %25, %26 : vector<8x128xf32>
    %28 = vector.broadcast %7 : vector<1x128xf32> to vector<8x128xf32>
    %29 = arith.addf %27, %28 : vector<8x128xf32>
    %c0_16 = arith.constant 0 : index
    %c0_17 = arith.constant 0 : index
    %30 = vector.load %arg5[%c0_16, %c0_17] : memref<1x128xf32, #tpu.memory_space<vmem>>, vector<1x128xf32>
    %c0_18 = arith.constant 0 : index
    %c0_19 = arith.constant 0 : index
    %31 = vector.load %arg6[%c0_18, %c0_19] : memref<1x128xf32, #tpu.memory_space<vmem>>, vector<1x128xf32>
    %cst_20 = arith.constant dense<0.000000e+00> : vector<8xf32>
    %32 = vector.multi_reduction <add>, %3, %cst_20 [1] : vector<8x128xf32> to vector<8xf32>
    %33 = vector.shape_cast %32 : vector<8xf32> to vector<8x1xf32>
    %cst_21 = arith.constant 1.280000e+02 : f32
    %34 = vector.broadcast %cst_21 : f32 to vector<8x1xf32>
    %35 = arith.divf %33, %34 : vector<8x1xf32>
    %36 = vector.broadcast %35 : vector<8x1xf32> to vector<8x128xf32>
    %37 = arith.subf %3, %36 : vector<8x128xf32>
    %38 = arith.mulf %37, %37 : vector<8x128xf32>
    %cst_22 = arith.constant dense<0.000000e+00> : vector<8xf32>
    %39 = vector.multi_reduction <add>, %38, %cst_22 [1] : vector<8x128xf32> to vector<8xf32>
    %40 = vector.shape_cast %39 : vector<8xf32> to vector<8x1xf32>
    %cst_23 = arith.constant 1.280000e+02 : f32
    %41 = vector.broadcast %cst_23 : f32 to vector<8x1xf32>
    %42 = arith.divf %40, %41 : vector<8x1xf32>
    %43 = vector.broadcast %35 : vector<8x1xf32> to vector<8x128xf32>
    %44 = arith.subf %3, %43 : vector<8x128xf32>
    %cst_24 = arith.constant 9.99999974E-6 : f32
    %45 = vector.broadcast %cst_24 : f32 to vector<8x1xf32>
    %46 = arith.addf %42, %45 : vector<8x1xf32>
    %47 = math.rsqrt %46 : vector<8x1xf32>
    %48 = vector.broadcast %47 : vector<8x1xf32> to vector<8x128xf32>
    %49 = arith.mulf %44, %48 : vector<8x128xf32>
    %50 = vector.broadcast %30 : vector<1x128xf32> to vector<8x128xf32>
    %51 = arith.mulf %49, %50 : vector<8x128xf32>
    %52 = vector.broadcast %31 : vector<1x128xf32> to vector<8x128xf32>
    %53 = arith.addf %51, %52 : vector<8x128xf32>
    %54 = arith.truncf %29 : vector<8x128xf32> to vector<8x128xbf16>
    %c0_25 = arith.constant 0 : index
    %c0_26 = arith.constant 0 : index
    %55 = vector.load %arg7[%c0_25, %c0_26] : memref<128x128xbf16, #tpu.memory_space<vmem>>, vector<128x128xbf16>
    %cst_27 = arith.constant dense<0.000000e+00> : vector<8x128xf32>
    %56 = tpu.matmul %54, %55, %cst_27 {dimension_numbers = #tpu.dot_dimension_numbers<[1], [0], [0], [1], [0, 0, 1, 1], [], []>} : vector<8x128xbf16>, vector<128x128xbf16>, vector<8x128xf32> -> vector<8x128xf32>
    %c0_28 = arith.constant 0 : index
    %c0_29 = arith.constant 0 : index
    %57 = vector.load %arg8[%c0_28, %c0_29] : memref<1x128xf32, #tpu.memory_space<vmem>>, vector<1x128xf32>
    %58 = vector.broadcast %57 : vector<1x128xf32> to vector<8x128xf32>
    %59 = arith.addf %56, %58 : vector<8x128xf32>
    %60 = arith.truncf %53 : vector<8x128xf32> to vector<8x128xbf16>
    %c0_30 = arith.constant 0 : index
    %c0_31 = arith.constant 0 : index
    %61 = vector.load %arg9[%c0_30, %c0_31] : memref<128x256xbf16, #tpu.memory_space<vmem>>, vector<128x256xbf16>
    %cst_32 = arith.constant dense<0.000000e+00> : vector<8x256xf32>
    %62 = tpu.matmul %60, %61, %cst_32 {dimension_numbers = #tpu.dot_dimension_numbers<[1], [0], [0], [1], [0, 0, 1, 1], [], []>} : vector<8x128xbf16>, vector<128x256xbf16>, vector<8x256xf32> -> vector<8x256xf32>
    %c0_33 = arith.constant 0 : index
    %c0_34 = arith.constant 0 : index
    %63 = vector.load %arg10[%c0_33, %c0_34] : memref<1x256xf32, #tpu.memory_space<vmem>>, vector<1x256xf32>
    %64 = vector.broadcast %63 : vector<1x256xf32> to vector<8x256xf32>
    %65 = arith.addf %62, %64 : vector<8x256xf32>
    %66 = vector.extract_strided_slice %65 {offsets = [0, 0], sizes = [8, 128], strides = [1, 1]} : vector<8x256xf32> to vector<8x128xf32>
    %67 = vector.extract_strided_slice %65 {offsets = [0, 128], sizes = [8, 128], strides = [1, 1]} : vector<8x256xf32> to vector<8x128xf32>
    %c0_35 = arith.constant 0 : index
    %c0_36 = arith.constant 0 : index
    %68 = vector.load %arg12[%c0_35, %c0_36] : memref<1x128xf32, #tpu.memory_space<vmem>>, vector<1x128xf32>
    %cst_37 = arith.constant 0.000000e+00 : f32
    %69 = vector.broadcast %cst_37 : f32 to vector<8x128xf32>
    %cst_38 = arith.constant 0.000000e+00 : f32
    %70 = vector.broadcast %cst_38 : f32 to vector<8x8xf32>
    %71 = vector.extract_strided_slice %59 {offsets = [0, 0], sizes = [8, 32], strides = [1, 1]} : vector<8x128xf32> to vector<8x32xf32>
    %72 = arith.truncf %71 : vector<8x32xf32> to vector<8x32xbf16>
    %73 = vector.extract_strided_slice %66 {offsets = [0, 0], sizes = [8, 32], strides = [1, 1]} : vector<8x128xf32> to vector<8x32xf32>
    %74 = arith.truncf %73 : vector<8x32xf32> to vector<8x32xbf16>
    %75 = vector.extract_strided_slice %67 {offsets = [0, 0], sizes = [8, 32], strides = [1, 1]} : vector<8x128xf32> to vector<8x32xf32>
    %76 = arith.truncf %75 : vector<8x32xf32> to vector<8x32xbf16>
    %cst_39 = arith.constant dense<0.000000e+00> : vector<8x8xf32>
    %77 = tpu.matmul %72, %74, %cst_39 {dimension_numbers = #tpu.dot_dimension_numbers<[1], [1], [0], [0], [0, 0, 1, 0], [], []>} : vector<8x32xbf16>, vector<8x32xbf16>, vector<8x8xf32> -> vector<8x8xf32>
    %cst_40 = arith.constant 0.176776692 : f32
    %78 = vector.broadcast %cst_40 : f32 to vector<8x8xf32>
    %79 = arith.mulf %77, %78 : vector<8x8xf32>
    %cst_41 = arith.constant dense<0xFF800000> : vector<8xf32>
    %80 = vector.multi_reduction <maximumf>, %79, %cst_41 [1] : vector<8x8xf32> to vector<8xf32>
    %81 = vector.shape_cast %80 : vector<8xf32> to vector<8x1xf32>
    %82 = vector.broadcast %81 : vector<8x1xf32> to vector<8x8xf32>
    %83 = arith.subf %79, %82 : vector<8x8xf32>
    %84 = math.exp %83 : vector<8x8xf32>
    %cst_42 = arith.constant dense<0.000000e+00> : vector<8xf32>
    %85 = vector.multi_reduction <add>, %84, %cst_42 [1] : vector<8x8xf32> to vector<8xf32>
    %86 = vector.shape_cast %85 : vector<8xf32> to vector<8x1xf32>
    %87 = tpu.reciprocal %86 {approx = true} : vector<8x1xf32> -> vector<8x1xf32>
    %88 = vector.broadcast %87 : vector<8x1xf32> to vector<8x8xf32>
    %89 = arith.mulf %84, %88 : vector<8x8xf32>
    %90 = arith.addf %70, %89 : vector<8x8xf32>
    %91 = arith.truncf %89 : vector<8x8xf32> to vector<8x8xbf16>
    %cst_43 = arith.constant dense<0.000000e+00> : vector<8x32xf32>
    %92 = tpu.matmul %91, %76, %cst_43 {dimension_numbers = #tpu.dot_dimension_numbers<[1], [0], [0], [1], [0, 0, 1, 1], [], []>} : vector<8x8xbf16>, vector<8x32xbf16>, vector<8x32xf32> -> vector<8x32xf32>
    %93 = arith.truncf %92 : vector<8x32xf32> to vector<8x32xbf16>
    %c0_44 = arith.constant 0 : index
    %c0_45 = arith.constant 0 : index
    %94 = vector.load %arg11[%c0_44, %c0_45] : memref<128x128xbf16, #tpu.memory_space<vmem>>, vector<32x128xbf16>
    %cst_46 = arith.constant dense<0.000000e+00> : vector<8x128xf32>
    %95 = tpu.matmul %93, %94, %cst_46 {dimension_numbers = #tpu.dot_dimension_numbers<[1], [0], [0], [1], [0, 0, 1, 1], [], []>} : vector<8x32xbf16>, vector<32x128xbf16>, vector<8x128xf32> -> vector<8x128xf32>
    %96 = arith.addf %69, %95 : vector<8x128xf32>
    %97 = vector.extract_strided_slice %59 {offsets = [0, 32], sizes = [8, 32], strides = [1, 1]} : vector<8x128xf32> to vector<8x32xf32>
    %98 = arith.truncf %97 : vector<8x32xf32> to vector<8x32xbf16>
    %99 = vector.extract_strided_slice %66 {offsets = [0, 32], sizes = [8, 32], strides = [1, 1]} : vector<8x128xf32> to vector<8x32xf32>
    %100 = arith.truncf %99 : vector<8x32xf32> to vector<8x32xbf16>
    %101 = vector.extract_strided_slice %67 {offsets = [0, 32], sizes = [8, 32], strides = [1, 1]} : vector<8x128xf32> to vector<8x32xf32>
    %102 = arith.truncf %101 : vector<8x32xf32> to vector<8x32xbf16>
    %cst_47 = arith.constant dense<0.000000e+00> : vector<8x8xf32>
    %103 = tpu.matmul %98, %100, %cst_47 {dimension_numbers = #tpu.dot_dimension_numbers<[1], [1], [0], [0], [0, 0, 1, 0], [], []>} : vector<8x32xbf16>, vector<8x32xbf16>, vector<8x8xf32> -> vector<8x8xf32>
    %cst_48 = arith.constant 0.176776692 : f32
    %104 = vector.broadcast %cst_48 : f32 to vector<8x8xf32>
    %105 = arith.mulf %103, %104 : vector<8x8xf32>
    %cst_49 = arith.constant dense<0xFF800000> : vector<8xf32>
    %106 = vector.multi_reduction <maximumf>, %105, %cst_49 [1] : vector<8x8xf32> to vector<8xf32>
    %107 = vector.shape_cast %106 : vector<8xf32> to vector<8x1xf32>
    %108 = vector.broadcast %107 : vector<8x1xf32> to vector<8x8xf32>
    %109 = arith.subf %105, %108 : vector<8x8xf32>
    %110 = math.exp %109 : vector<8x8xf32>
    %cst_50 = arith.constant dense<0.000000e+00> : vector<8xf32>
    %111 = vector.multi_reduction <add>, %110, %cst_50 [1] : vector<8x8xf32> to vector<8xf32>
    %112 = vector.shape_cast %111 : vector<8xf32> to vector<8x1xf32>
    %113 = tpu.reciprocal %112 {approx = true} : vector<8x1xf32> -> vector<8x1xf32>
    %114 = vector.broadcast %113 : vector<8x1xf32> to vector<8x8xf32>
    %115 = arith.mulf %110, %114 : vector<8x8xf32>
    %116 = arith.addf %90, %115 : vector<8x8xf32>
    %117 = arith.truncf %115 : vector<8x8xf32> to vector<8x8xbf16>
    %cst_51 = arith.constant dense<0.000000e+00> : vector<8x32xf32>
    %118 = tpu.matmul %117, %102, %cst_51 {dimension_numbers = #tpu.dot_dimension_numbers<[1], [0], [0], [1], [0, 0, 1, 1], [], []>} : vector<8x8xbf16>, vector<8x32xbf16>, vector<8x32xf32> -> vector<8x32xf32>
    %119 = arith.truncf %118 : vector<8x32xf32> to vector<8x32xbf16>
    %c32 = arith.constant 32 : index
    %c0_52 = arith.constant 0 : index
    %120 = vector.load %arg11[%c32, %c0_52] : memref<128x128xbf16, #tpu.memory_space<vmem>>, vector<32x128xbf16>
    %cst_53 = arith.constant dense<0.000000e+00> : vector<8x128xf32>
    %121 = tpu.matmul %119, %120, %cst_53 {dimension_numbers = #tpu.dot_dimension_numbers<[1], [0], [0], [1], [0, 0, 1, 1], [], []>} : vector<8x32xbf16>, vector<32x128xbf16>, vector<8x128xf32> -> vector<8x128xf32>
    %122 = arith.addf %96, %121 : vector<8x128xf32>
    %123 = vector.extract_strided_slice %59 {offsets = [0, 64], sizes = [8, 32], strides = [1, 1]} : vector<8x128xf32> to vector<8x32xf32>
    %124 = arith.truncf %123 : vector<8x32xf32> to vector<8x32xbf16>
    %125 = vector.extract_strided_slice %66 {offsets = [0, 64], sizes = [8, 32], strides = [1, 1]} : vector<8x128xf32> to vector<8x32xf32>
    %126 = arith.truncf %125 : vector<8x32xf32> to vector<8x32xbf16>
    %127 = vector.extract_strided_slice %67 {offsets = [0, 64], sizes = [8, 32], strides = [1, 1]} : vector<8x128xf32> to vector<8x32xf32>
    %128 = arith.truncf %127 : vector<8x32xf32> to vector<8x32xbf16>
    %cst_54 = arith.constant dense<0.000000e+00> : vector<8x8xf32>
    %129 = tpu.matmul %124, %126, %cst_54 {dimension_numbers = #tpu.dot_dimension_numbers<[1], [1], [0], [0], [0, 0, 1, 0], [], []>} : vector<8x32xbf16>, vector<8x32xbf16>, vector<8x8xf32> -> vector<8x8xf32>
    %cst_55 = arith.constant 0.176776692 : f32
    %130 = vector.broadcast %cst_55 : f32 to vector<8x8xf32>
    %131 = arith.mulf %129, %130 : vector<8x8xf32>
    %cst_56 = arith.constant dense<0xFF800000> : vector<8xf32>
    %132 = vector.multi_reduction <maximumf>, %131, %cst_56 [1] : vector<8x8xf32> to vector<8xf32>
    %133 = vector.shape_cast %132 : vector<8xf32> to vector<8x1xf32>
    %134 = vector.broadcast %133 : vector<8x1xf32> to vector<8x8xf32>
    %135 = arith.subf %131, %134 : vector<8x8xf32>
    %136 = math.exp %135 : vector<8x8xf32>
    %cst_57 = arith.constant dense<0.000000e+00> : vector<8xf32>
    %137 = vector.multi_reduction <add>, %136, %cst_57 [1] : vector<8x8xf32> to vector<8xf32>
    %138 = vector.shape_cast %137 : vector<8xf32> to vector<8x1xf32>
    %139 = tpu.reciprocal %138 {approx = true} : vector<8x1xf32> -> vector<8x1xf32>
    %140 = vector.broadcast %139 : vector<8x1xf32> to vector<8x8xf32>
    %141 = arith.mulf %136, %140 : vector<8x8xf32>
    %142 = arith.addf %116, %141 : vector<8x8xf32>
    %143 = arith.truncf %141 : vector<8x8xf32> to vector<8x8xbf16>
    %cst_58 = arith.constant dense<0.000000e+00> : vector<8x32xf32>
    %144 = tpu.matmul %143, %128, %cst_58 {dimension_numbers = #tpu.dot_dimension_numbers<[1], [0], [0], [1], [0, 0, 1, 1], [], []>} : vector<8x8xbf16>, vector<8x32xbf16>, vector<8x32xf32> -> vector<8x32xf32>
    %145 = arith.truncf %144 : vector<8x32xf32> to vector<8x32xbf16>
    %c64 = arith.constant 64 : index
    %c0_59 = arith.constant 0 : index
    %146 = vector.load %arg11[%c64, %c0_59] : memref<128x128xbf16, #tpu.memory_space<vmem>>, vector<32x128xbf16>
    %cst_60 = arith.constant dense<0.000000e+00> : vector<8x128xf32>
    %147 = tpu.matmul %145, %146, %cst_60 {dimension_numbers = #tpu.dot_dimension_numbers<[1], [0], [0], [1], [0, 0, 1, 1], [], []>} : vector<8x32xbf16>, vector<32x128xbf16>, vector<8x128xf32> -> vector<8x128xf32>
    %148 = arith.addf %122, %147 : vector<8x128xf32>
    %149 = vector.extract_strided_slice %59 {offsets = [0, 96], sizes = [8, 32], strides = [1, 1]} : vector<8x128xf32> to vector<8x32xf32>
    %150 = arith.truncf %149 : vector<8x32xf32> to vector<8x32xbf16>
    %151 = vector.extract_strided_slice %66 {offsets = [0, 96], sizes = [8, 32], strides = [1, 1]} : vector<8x128xf32> to vector<8x32xf32>
    %152 = arith.truncf %151 : vector<8x32xf32> to vector<8x32xbf16>
    %153 = vector.extract_strided_slice %67 {offsets = [0, 96], sizes = [8, 32], strides = [1, 1]} : vector<8x128xf32> to vector<8x32xf32>
    %154 = arith.truncf %153 : vector<8x32xf32> to vector<8x32xbf16>
    %cst_61 = arith.constant dense<0.000000e+00> : vector<8x8xf32>
    %155 = tpu.matmul %150, %152, %cst_61 {dimension_numbers = #tpu.dot_dimension_numbers<[1], [1], [0], [0], [0, 0, 1, 0], [], []>} : vector<8x32xbf16>, vector<8x32xbf16>, vector<8x8xf32> -> vector<8x8xf32>
    %cst_62 = arith.constant 0.176776692 : f32
    %156 = vector.broadcast %cst_62 : f32 to vector<8x8xf32>
    %157 = arith.mulf %155, %156 : vector<8x8xf32>
    %cst_63 = arith.constant dense<0xFF800000> : vector<8xf32>
    %158 = vector.multi_reduction <maximumf>, %157, %cst_63 [1] : vector<8x8xf32> to vector<8xf32>
    %159 = vector.shape_cast %158 : vector<8xf32> to vector<8x1xf32>
    %160 = vector.broadcast %159 : vector<8x1xf32> to vector<8x8xf32>
    %161 = arith.subf %157, %160 : vector<8x8xf32>
    %162 = math.exp %161 : vector<8x8xf32>
    %cst_64 = arith.constant dense<0.000000e+00> : vector<8xf32>
    %163 = vector.multi_reduction <add>, %162, %cst_64 [1] : vector<8x8xf32> to vector<8xf32>
    %164 = vector.shape_cast %163 : vector<8xf32> to vector<8x1xf32>
    %165 = tpu.reciprocal %164 {approx = true} : vector<8x1xf32> -> vector<8x1xf32>
    %166 = vector.broadcast %165 : vector<8x1xf32> to vector<8x8xf32>
    %167 = arith.mulf %162, %166 : vector<8x8xf32>
    %168 = arith.addf %142, %167 : vector<8x8xf32>
    %169 = arith.truncf %167 : vector<8x8xf32> to vector<8x8xbf16>
    %cst_65 = arith.constant dense<0.000000e+00> : vector<8x32xf32>
    %170 = tpu.matmul %169, %154, %cst_65 {dimension_numbers = #tpu.dot_dimension_numbers<[1], [0], [0], [1], [0, 0, 1, 1], [], []>} : vector<8x8xbf16>, vector<8x32xbf16>, vector<8x32xf32> -> vector<8x32xf32>
    %171 = arith.truncf %170 : vector<8x32xf32> to vector<8x32xbf16>
    %c96 = arith.constant 96 : index
    %c0_66 = arith.constant 0 : index
    %172 = vector.load %arg11[%c96, %c0_66] : memref<128x128xbf16, #tpu.memory_space<vmem>>, vector<32x128xbf16>
    %cst_67 = arith.constant dense<0.000000e+00> : vector<8x128xf32>
    %173 = tpu.matmul %171, %172, %cst_67 {dimension_numbers = #tpu.dot_dimension_numbers<[1], [0], [0], [1], [0, 0, 1, 1], [], []>} : vector<8x32xbf16>, vector<32x128xbf16>, vector<8x128xf32> -> vector<8x128xf32>
    %174 = arith.addf %148, %173 : vector<8x128xf32>
    %175 = vector.broadcast %68 : vector<1x128xf32> to vector<8x128xf32>
    %176 = arith.addf %174, %175 : vector<8x128xf32>
    %cst_68 = arith.constant 2.500000e-01 : f32
    %177 = vector.broadcast %cst_68 : f32 to vector<8x8xf32>
    %178 = arith.mulf %168, %177 : vector<8x8xf32>
    %179 = arith.addf %1, %176 : vector<8x128xf32>
    %c0_69 = arith.constant 0 : index
    %c0_70 = arith.constant 0 : index
    %180 = vector.load %arg13[%c0_69, %c0_70] : memref<1x128xf32, #tpu.memory_space<vmem>>, vector<1x128xf32>
    %c0_71 = arith.constant 0 : index
    %c0_72 = arith.constant 0 : index
    %181 = vector.load %arg14[%c0_71, %c0_72] : memref<1x128xf32, #tpu.memory_space<vmem>>, vector<1x128xf32>
    %cst_73 = arith.constant dense<0.000000e+00> : vector<8xf32>
    %182 = vector.multi_reduction <add>, %179, %cst_73 [1] : vector<8x128xf32> to vector<8xf32>
    %183 = vector.shape_cast %182 : vector<8xf32> to vector<8x1xf32>
    %cst_74 = arith.constant 1.280000e+02 : f32
    %184 = vector.broadcast %cst_74 : f32 to vector<8x1xf32>
    %185 = arith.divf %183, %184 : vector<8x1xf32>
    %186 = vector.broadcast %185 : vector<8x1xf32> to vector<8x128xf32>
    %187 = arith.subf %179, %186 : vector<8x128xf32>
    %188 = arith.mulf %187, %187 : vector<8x128xf32>
    %cst_75 = arith.constant dense<0.000000e+00> : vector<8xf32>
    %189 = vector.multi_reduction <add>, %188, %cst_75 [1] : vector<8x128xf32> to vector<8xf32>
    %190 = vector.shape_cast %189 : vector<8xf32> to vector<8x1xf32>
    %cst_76 = arith.constant 1.280000e+02 : f32
    %191 = vector.broadcast %cst_76 : f32 to vector<8x1xf32>
    %192 = arith.divf %190, %191 : vector<8x1xf32>
    %193 = vector.broadcast %185 : vector<8x1xf32> to vector<8x128xf32>
    %194 = arith.subf %179, %193 : vector<8x128xf32>
    %cst_77 = arith.constant 9.99999974E-6 : f32
    %195 = vector.broadcast %cst_77 : f32 to vector<8x1xf32>
    %196 = arith.addf %192, %195 : vector<8x1xf32>
    %197 = math.rsqrt %196 : vector<8x1xf32>
    %198 = vector.broadcast %197 : vector<8x1xf32> to vector<8x128xf32>
    %199 = arith.mulf %194, %198 : vector<8x128xf32>
    %200 = vector.broadcast %180 : vector<1x128xf32> to vector<8x128xf32>
    %201 = arith.mulf %199, %200 : vector<8x128xf32>
    %202 = vector.broadcast %181 : vector<1x128xf32> to vector<8x128xf32>
    %203 = arith.addf %201, %202 : vector<8x128xf32>
    %204 = arith.truncf %203 : vector<8x128xf32> to vector<8x128xbf16>
    %c0_78 = arith.constant 0 : index
    %c0_79 = arith.constant 0 : index
    %205 = vector.load %arg15[%c0_78, %c0_79] : memref<128x128xbf16, #tpu.memory_space<vmem>>, vector<128x128xbf16>
    %cst_80 = arith.constant dense<0.000000e+00> : vector<8x128xf32>
    %206 = tpu.matmul %204, %205, %cst_80 {dimension_numbers = #tpu.dot_dimension_numbers<[1], [0], [0], [1], [0, 0, 1, 1], [], []>} : vector<8x128xbf16>, vector<128x128xbf16>, vector<8x128xf32> -> vector<8x128xf32>
    %c0_81 = arith.constant 0 : index
    %c0_82 = arith.constant 0 : index
    %207 = vector.load %arg16[%c0_81, %c0_82] : memref<1x128xf32, #tpu.memory_space<vmem>>, vector<1x128xf32>
    %208 = vector.broadcast %207 : vector<1x128xf32> to vector<8x128xf32>
    %209 = arith.addf %206, %208 : vector<8x128xf32>
    %210 = arith.truncf %5 : vector<16x128xf32> to vector<16x128xbf16>
    %c0_83 = arith.constant 0 : index
    %c0_84 = arith.constant 0 : index
    %211 = vector.load %arg17[%c0_83, %c0_84] : memref<128x256xbf16, #tpu.memory_space<vmem>>, vector<128x256xbf16>
    %cst_85 = arith.constant dense<0.000000e+00> : vector<16x256xf32>
    %212 = tpu.matmul %210, %211, %cst_85 {dimension_numbers = #tpu.dot_dimension_numbers<[1], [0], [0], [1], [0, 0, 1, 1], [], []>} : vector<16x128xbf16>, vector<128x256xbf16>, vector<16x256xf32> -> vector<16x256xf32>
    %c0_86 = arith.constant 0 : index
    %c0_87 = arith.constant 0 : index
    %213 = vector.load %arg18[%c0_86, %c0_87] : memref<1x256xf32, #tpu.memory_space<vmem>>, vector<1x256xf32>
    %214 = vector.broadcast %213 : vector<1x256xf32> to vector<16x256xf32>
    %215 = arith.addf %212, %214 : vector<16x256xf32>
    %216 = vector.extract_strided_slice %215 {offsets = [0, 0], sizes = [16, 128], strides = [1, 1]} : vector<16x256xf32> to vector<16x128xf32>
    %217 = vector.extract_strided_slice %215 {offsets = [0, 128], sizes = [16, 128], strides = [1, 1]} : vector<16x256xf32> to vector<16x128xf32>
    %c0_88 = arith.constant 0 : index
    %c0_89 = arith.constant 0 : index
    %218 = vector.load %arg20[%c0_88, %c0_89] : memref<1x128xf32, #tpu.memory_space<vmem>>, vector<1x128xf32>
    %cst_90 = arith.constant 0.000000e+00 : f32
    %219 = vector.broadcast %cst_90 : f32 to vector<8x128xf32>
    %cst_91 = arith.constant 0.000000e+00 : f32
    %220 = vector.broadcast %cst_91 : f32 to vector<8x16xf32>
    %221 = vector.extract_strided_slice %209 {offsets = [0, 0], sizes = [8, 32], strides = [1, 1]} : vector<8x128xf32> to vector<8x32xf32>
    %222 = arith.truncf %221 : vector<8x32xf32> to vector<8x32xbf16>
    %223 = vector.extract_strided_slice %216 {offsets = [0, 0], sizes = [16, 32], strides = [1, 1]} : vector<16x128xf32> to vector<16x32xf32>
    %224 = arith.truncf %223 : vector<16x32xf32> to vector<16x32xbf16>
    %225 = vector.extract_strided_slice %217 {offsets = [0, 0], sizes = [16, 32], strides = [1, 1]} : vector<16x128xf32> to vector<16x32xf32>
    %226 = arith.truncf %225 : vector<16x32xf32> to vector<16x32xbf16>
    %cst_92 = arith.constant dense<0.000000e+00> : vector<8x16xf32>
    %227 = tpu.matmul %222, %224, %cst_92 {dimension_numbers = #tpu.dot_dimension_numbers<[1], [1], [0], [0], [0, 0, 1, 0], [], []>} : vector<8x32xbf16>, vector<16x32xbf16>, vector<8x16xf32> -> vector<8x16xf32>
    %cst_93 = arith.constant 0.176776692 : f32
    %228 = vector.broadcast %cst_93 : f32 to vector<8x16xf32>
    %229 = arith.mulf %227, %228 : vector<8x16xf32>
    %cst_94 = arith.constant dense<0xFF800000> : vector<8xf32>
    %230 = vector.multi_reduction <maximumf>, %229, %cst_94 [1] : vector<8x16xf32> to vector<8xf32>
    %231 = vector.shape_cast %230 : vector<8xf32> to vector<8x1xf32>
    %232 = vector.broadcast %231 : vector<8x1xf32> to vector<8x16xf32>
    %233 = arith.subf %229, %232 : vector<8x16xf32>
    %234 = math.exp %233 : vector<8x16xf32>
    %cst_95 = arith.constant dense<0.000000e+00> : vector<8xf32>
    %235 = vector.multi_reduction <add>, %234, %cst_95 [1] : vector<8x16xf32> to vector<8xf32>
    %236 = vector.shape_cast %235 : vector<8xf32> to vector<8x1xf32>
    %237 = tpu.reciprocal %236 {approx = true} : vector<8x1xf32> -> vector<8x1xf32>
    %238 = vector.broadcast %237 : vector<8x1xf32> to vector<8x16xf32>
    %239 = arith.mulf %234, %238 : vector<8x16xf32>
    %240 = arith.addf %220, %239 : vector<8x16xf32>
    %241 = arith.truncf %239 : vector<8x16xf32> to vector<8x16xbf16>
    %cst_96 = arith.constant dense<0.000000e+00> : vector<8x32xf32>
    %242 = tpu.matmul %241, %226, %cst_96 {dimension_numbers = #tpu.dot_dimension_numbers<[1], [0], [0], [1], [0, 0, 1, 1], [], []>} : vector<8x16xbf16>, vector<16x32xbf16>, vector<8x32xf32> -> vector<8x32xf32>
    %243 = arith.truncf %242 : vector<8x32xf32> to vector<8x32xbf16>
    %c0_97 = arith.constant 0 : index
    %c0_98 = arith.constant 0 : index
    %244 = vector.load %arg19[%c0_97, %c0_98] : memref<128x128xbf16, #tpu.memory_space<vmem>>, vector<32x128xbf16>
    %cst_99 = arith.constant dense<0.000000e+00> : vector<8x128xf32>
    %245 = tpu.matmul %243, %244, %cst_99 {dimension_numbers = #tpu.dot_dimension_numbers<[1], [0], [0], [1], [0, 0, 1, 1], [], []>} : vector<8x32xbf16>, vector<32x128xbf16>, vector<8x128xf32> -> vector<8x128xf32>
    %246 = arith.addf %219, %245 : vector<8x128xf32>
    %247 = vector.extract_strided_slice %209 {offsets = [0, 32], sizes = [8, 32], strides = [1, 1]} : vector<8x128xf32> to vector<8x32xf32>
    %248 = arith.truncf %247 : vector<8x32xf32> to vector<8x32xbf16>
    %249 = vector.extract_strided_slice %216 {offsets = [0, 32], sizes = [16, 32], strides = [1, 1]} : vector<16x128xf32> to vector<16x32xf32>
    %250 = arith.truncf %249 : vector<16x32xf32> to vector<16x32xbf16>
    %251 = vector.extract_strided_slice %217 {offsets = [0, 32], sizes = [16, 32], strides = [1, 1]} : vector<16x128xf32> to vector<16x32xf32>
    %252 = arith.truncf %251 : vector<16x32xf32> to vector<16x32xbf16>
    %cst_100 = arith.constant dense<0.000000e+00> : vector<8x16xf32>
    %253 = tpu.matmul %248, %250, %cst_100 {dimension_numbers = #tpu.dot_dimension_numbers<[1], [1], [0], [0], [0, 0, 1, 0], [], []>} : vector<8x32xbf16>, vector<16x32xbf16>, vector<8x16xf32> -> vector<8x16xf32>
    %cst_101 = arith.constant 0.176776692 : f32
    %254 = vector.broadcast %cst_101 : f32 to vector<8x16xf32>
    %255 = arith.mulf %253, %254 : vector<8x16xf32>
    %cst_102 = arith.constant dense<0xFF800000> : vector<8xf32>
    %256 = vector.multi_reduction <maximumf>, %255, %cst_102 [1] : vector<8x16xf32> to vector<8xf32>
    %257 = vector.shape_cast %256 : vector<8xf32> to vector<8x1xf32>
    %258 = vector.broadcast %257 : vector<8x1xf32> to vector<8x16xf32>
    %259 = arith.subf %255, %258 : vector<8x16xf32>
    %260 = math.exp %259 : vector<8x16xf32>
    %cst_103 = arith.constant dense<0.000000e+00> : vector<8xf32>
    %261 = vector.multi_reduction <add>, %260, %cst_103 [1] : vector<8x16xf32> to vector<8xf32>
    %262 = vector.shape_cast %261 : vector<8xf32> to vector<8x1xf32>
    %263 = tpu.reciprocal %262 {approx = true} : vector<8x1xf32> -> vector<8x1xf32>
    %264 = vector.broadcast %263 : vector<8x1xf32> to vector<8x16xf32>
    %265 = arith.mulf %260, %264 : vector<8x16xf32>
    %266 = arith.addf %240, %265 : vector<8x16xf32>
    %267 = arith.truncf %265 : vector<8x16xf32> to vector<8x16xbf16>
    %cst_104 = arith.constant dense<0.000000e+00> : vector<8x32xf32>
    %268 = tpu.matmul %267, %252, %cst_104 {dimension_numbers = #tpu.dot_dimension_numbers<[1], [0], [0], [1], [0, 0, 1, 1], [], []>} : vector<8x16xbf16>, vector<16x32xbf16>, vector<8x32xf32> -> vector<8x32xf32>
    %269 = arith.truncf %268 : vector<8x32xf32> to vector<8x32xbf16>
    %c32_105 = arith.constant 32 : index
    %c0_106 = arith.constant 0 : index
    %270 = vector.load %arg19[%c32_105, %c0_106] : memref<128x128xbf16, #tpu.memory_space<vmem>>, vector<32x128xbf16>
    %cst_107 = arith.constant dense<0.000000e+00> : vector<8x128xf32>
    %271 = tpu.matmul %269, %270, %cst_107 {dimension_numbers = #tpu.dot_dimension_numbers<[1], [0], [0], [1], [0, 0, 1, 1], [], []>} : vector<8x32xbf16>, vector<32x128xbf16>, vector<8x128xf32> -> vector<8x128xf32>
    %272 = arith.addf %246, %271 : vector<8x128xf32>
    %273 = vector.extract_strided_slice %209 {offsets = [0, 64], sizes = [8, 32], strides = [1, 1]} : vector<8x128xf32> to vector<8x32xf32>
    %274 = arith.truncf %273 : vector<8x32xf32> to vector<8x32xbf16>
    %275 = vector.extract_strided_slice %216 {offsets = [0, 64], sizes = [16, 32], strides = [1, 1]} : vector<16x128xf32> to vector<16x32xf32>
    %276 = arith.truncf %275 : vector<16x32xf32> to vector<16x32xbf16>
    %277 = vector.extract_strided_slice %217 {offsets = [0, 64], sizes = [16, 32], strides = [1, 1]} : vector<16x128xf32> to vector<16x32xf32>
    %278 = arith.truncf %277 : vector<16x32xf32> to vector<16x32xbf16>
    %cst_108 = arith.constant dense<0.000000e+00> : vector<8x16xf32>
    %279 = tpu.matmul %274, %276, %cst_108 {dimension_numbers = #tpu.dot_dimension_numbers<[1], [1], [0], [0], [0, 0, 1, 0], [], []>} : vector<8x32xbf16>, vector<16x32xbf16>, vector<8x16xf32> -> vector<8x16xf32>
    %cst_109 = arith.constant 0.176776692 : f32
    %280 = vector.broadcast %cst_109 : f32 to vector<8x16xf32>
    %281 = arith.mulf %279, %280 : vector<8x16xf32>
    %cst_110 = arith.constant dense<0xFF800000> : vector<8xf32>
    %282 = vector.multi_reduction <maximumf>, %281, %cst_110 [1] : vector<8x16xf32> to vector<8xf32>
    %283 = vector.shape_cast %282 : vector<8xf32> to vector<8x1xf32>
    %284 = vector.broadcast %283 : vector<8x1xf32> to vector<8x16xf32>
    %285 = arith.subf %281, %284 : vector<8x16xf32>
    %286 = math.exp %285 : vector<8x16xf32>
    %cst_111 = arith.constant dense<0.000000e+00> : vector<8xf32>
    %287 = vector.multi_reduction <add>, %286, %cst_111 [1] : vector<8x16xf32> to vector<8xf32>
    %288 = vector.shape_cast %287 : vector<8xf32> to vector<8x1xf32>
    %289 = tpu.reciprocal %288 {approx = true} : vector<8x1xf32> -> vector<8x1xf32>
    %290 = vector.broadcast %289 : vector<8x1xf32> to vector<8x16xf32>
    %291 = arith.mulf %286, %290 : vector<8x16xf32>
    %292 = arith.addf %266, %291 : vector<8x16xf32>
    %293 = arith.truncf %291 : vector<8x16xf32> to vector<8x16xbf16>
    %cst_112 = arith.constant dense<0.000000e+00> : vector<8x32xf32>
    %294 = tpu.matmul %293, %278, %cst_112 {dimension_numbers = #tpu.dot_dimension_numbers<[1], [0], [0], [1], [0, 0, 1, 1], [], []>} : vector<8x16xbf16>, vector<16x32xbf16>, vector<8x32xf32> -> vector<8x32xf32>
    %295 = arith.truncf %294 : vector<8x32xf32> to vector<8x32xbf16>
    %c64_113 = arith.constant 64 : index
    %c0_114 = arith.constant 0 : index
    %296 = vector.load %arg19[%c64_113, %c0_114] : memref<128x128xbf16, #tpu.memory_space<vmem>>, vector<32x128xbf16>
    %cst_115 = arith.constant dense<0.000000e+00> : vector<8x128xf32>
    %297 = tpu.matmul %295, %296, %cst_115 {dimension_numbers = #tpu.dot_dimension_numbers<[1], [0], [0], [1], [0, 0, 1, 1], [], []>} : vector<8x32xbf16>, vector<32x128xbf16>, vector<8x128xf32> -> vector<8x128xf32>
    %298 = arith.addf %272, %297 : vector<8x128xf32>
    %299 = vector.extract_strided_slice %209 {offsets = [0, 96], sizes = [8, 32], strides = [1, 1]} : vector<8x128xf32> to vector<8x32xf32>
    %300 = arith.truncf %299 : vector<8x32xf32> to vector<8x32xbf16>
    %301 = vector.extract_strided_slice %216 {offsets = [0, 96], sizes = [16, 32], strides = [1, 1]} : vector<16x128xf32> to vector<16x32xf32>
    %302 = arith.truncf %301 : vector<16x32xf32> to vector<16x32xbf16>
    %303 = vector.extract_strided_slice %217 {offsets = [0, 96], sizes = [16, 32], strides = [1, 1]} : vector<16x128xf32> to vector<16x32xf32>
    %304 = arith.truncf %303 : vector<16x32xf32> to vector<16x32xbf16>
    %cst_116 = arith.constant dense<0.000000e+00> : vector<8x16xf32>
    %305 = tpu.matmul %300, %302, %cst_116 {dimension_numbers = #tpu.dot_dimension_numbers<[1], [1], [0], [0], [0, 0, 1, 0], [], []>} : vector<8x32xbf16>, vector<16x32xbf16>, vector<8x16xf32> -> vector<8x16xf32>
    %cst_117 = arith.constant 0.176776692 : f32
    %306 = vector.broadcast %cst_117 : f32 to vector<8x16xf32>
    %307 = arith.mulf %305, %306 : vector<8x16xf32>
    %cst_118 = arith.constant dense<0xFF800000> : vector<8xf32>
    %308 = vector.multi_reduction <maximumf>, %307, %cst_118 [1] : vector<8x16xf32> to vector<8xf32>
    %309 = vector.shape_cast %308 : vector<8xf32> to vector<8x1xf32>
    %310 = vector.broadcast %309 : vector<8x1xf32> to vector<8x16xf32>
    %311 = arith.subf %307, %310 : vector<8x16xf32>
    %312 = math.exp %311 : vector<8x16xf32>
    %cst_119 = arith.constant dense<0.000000e+00> : vector<8xf32>
    %313 = vector.multi_reduction <add>, %312, %cst_119 [1] : vector<8x16xf32> to vector<8xf32>
    %314 = vector.shape_cast %313 : vector<8xf32> to vector<8x1xf32>
    %315 = tpu.reciprocal %314 {approx = true} : vector<8x1xf32> -> vector<8x1xf32>
    %316 = vector.broadcast %315 : vector<8x1xf32> to vector<8x16xf32>
    %317 = arith.mulf %312, %316 : vector<8x16xf32>
    %318 = arith.addf %292, %317 : vector<8x16xf32>
    %319 = arith.truncf %317 : vector<8x16xf32> to vector<8x16xbf16>
    %cst_120 = arith.constant dense<0.000000e+00> : vector<8x32xf32>
    %320 = tpu.matmul %319, %304, %cst_120 {dimension_numbers = #tpu.dot_dimension_numbers<[1], [0], [0], [1], [0, 0, 1, 1], [], []>} : vector<8x16xbf16>, vector<16x32xbf16>, vector<8x32xf32> -> vector<8x32xf32>
    %321 = arith.truncf %320 : vector<8x32xf32> to vector<8x32xbf16>
    %c96_121 = arith.constant 96 : index
    %c0_122 = arith.constant 0 : index
    %322 = vector.load %arg19[%c96_121, %c0_122] : memref<128x128xbf16, #tpu.memory_space<vmem>>, vector<32x128xbf16>
    %cst_123 = arith.constant dense<0.000000e+00> : vector<8x128xf32>
    %323 = tpu.matmul %321, %322, %cst_123 {dimension_numbers = #tpu.dot_dimension_numbers<[1], [0], [0], [1], [0, 0, 1, 1], [], []>} : vector<8x32xbf16>, vector<32x128xbf16>, vector<8x128xf32> -> vector<8x128xf32>
    %324 = arith.addf %298, %323 : vector<8x128xf32>
    %325 = vector.broadcast %218 : vector<1x128xf32> to vector<8x128xf32>
    %326 = arith.addf %324, %325 : vector<8x128xf32>
    %cst_124 = arith.constant 2.500000e-01 : f32
    %327 = vector.broadcast %cst_124 : f32 to vector<8x16xf32>
    %328 = arith.mulf %318, %327 : vector<8x16xf32>
    %329 = arith.addf %179, %326 : vector<8x128xf32>
    %c0_125 = arith.constant 0 : index
    %c0_126 = arith.constant 0 : index
    %330 = vector.load %arg21[%c0_125, %c0_126] : memref<1x128xf32, #tpu.memory_space<vmem>>, vector<1x128xf32>
    %c0_127 = arith.constant 0 : index
    %c0_128 = arith.constant 0 : index
    %331 = vector.load %arg22[%c0_127, %c0_128] : memref<1x128xf32, #tpu.memory_space<vmem>>, vector<1x128xf32>
    %cst_129 = arith.constant dense<0.000000e+00> : vector<8xf32>
    %332 = vector.multi_reduction <add>, %329, %cst_129 [1] : vector<8x128xf32> to vector<8xf32>
    %333 = vector.shape_cast %332 : vector<8xf32> to vector<8x1xf32>
    %cst_130 = arith.constant 1.280000e+02 : f32
    %334 = vector.broadcast %cst_130 : f32 to vector<8x1xf32>
    %335 = arith.divf %333, %334 : vector<8x1xf32>
    %336 = vector.broadcast %335 : vector<8x1xf32> to vector<8x128xf32>
    %337 = arith.subf %329, %336 : vector<8x128xf32>
    %338 = arith.mulf %337, %337 : vector<8x128xf32>
    %cst_131 = arith.constant dense<0.000000e+00> : vector<8xf32>
    %339 = vector.multi_reduction <add>, %338, %cst_131 [1] : vector<8x128xf32> to vector<8xf32>
    %340 = vector.shape_cast %339 : vector<8xf32> to vector<8x1xf32>
    %cst_132 = arith.constant 1.280000e+02 : f32
    %341 = vector.broadcast %cst_132 : f32 to vector<8x1xf32>
    %342 = arith.divf %340, %341 : vector<8x1xf32>
    %343 = vector.broadcast %335 : vector<8x1xf32> to vector<8x128xf32>
    %344 = arith.subf %329, %343 : vector<8x128xf32>
    %cst_133 = arith.constant 9.99999974E-6 : f32
    %345 = vector.broadcast %cst_133 : f32 to vector<8x1xf32>
    %346 = arith.addf %342, %345 : vector<8x1xf32>
    %347 = math.rsqrt %346 : vector<8x1xf32>
    %348 = vector.broadcast %347 : vector<8x1xf32> to vector<8x128xf32>
    %349 = arith.mulf %344, %348 : vector<8x128xf32>
    %350 = vector.broadcast %330 : vector<1x128xf32> to vector<8x128xf32>
    %351 = arith.mulf %349, %350 : vector<8x128xf32>
    %352 = vector.broadcast %331 : vector<1x128xf32> to vector<8x128xf32>
    %353 = arith.addf %351, %352 : vector<8x128xf32>
    %354 = arith.truncf %353 : vector<8x128xf32> to vector<8x128xbf16>
    %c0_134 = arith.constant 0 : index
    %c0_135 = arith.constant 0 : index
    %355 = vector.load %arg23[%c0_134, %c0_135] : memref<128x256xbf16, #tpu.memory_space<vmem>>, vector<128x256xbf16>
    %cst_136 = arith.constant dense<0.000000e+00> : vector<8x256xf32>
    %356 = tpu.matmul %354, %355, %cst_136 {dimension_numbers = #tpu.dot_dimension_numbers<[1], [0], [0], [1], [0, 0, 1, 1], [], []>} : vector<8x128xbf16>, vector<128x256xbf16>, vector<8x256xf32> -> vector<8x256xf32>
    %c0_137 = arith.constant 0 : index
    %c0_138 = arith.constant 0 : index
    %357 = vector.load %arg24[%c0_137, %c0_138] : memref<1x256xf32, #tpu.memory_space<vmem>>, vector<1x256xf32>
    %358 = vector.broadcast %357 : vector<1x256xf32> to vector<8x256xf32>
    %359 = arith.addf %356, %358 : vector<8x256xf32>
    %cst_139 = arith.constant 0.000000e+00 : f32
    %360 = vector.broadcast %cst_139 : f32 to vector<8x256xf32>
    %361 = arith.maximumf %359, %360 : vector<8x256xf32>
    %362 = arith.truncf %361 : vector<8x256xf32> to vector<8x256xbf16>
    %c0_140 = arith.constant 0 : index
    %c0_141 = arith.constant 0 : index
    %363 = vector.load %arg25[%c0_140, %c0_141] : memref<256x128xbf16, #tpu.memory_space<vmem>>, vector<256x128xbf16>
    %cst_142 = arith.constant dense<0.000000e+00> : vector<8x128xf32>
    %364 = tpu.matmul %362, %363, %cst_142 {dimension_numbers = #tpu.dot_dimension_numbers<[1], [0], [0], [1], [0, 0, 1, 1], [], []>} : vector<8x256xbf16>, vector<256x128xbf16>, vector<8x128xf32> -> vector<8x128xf32>
    %c0_143 = arith.constant 0 : index
    %c0_144 = arith.constant 0 : index
    %365 = vector.load %arg26[%c0_143, %c0_144] : memref<1x128xf32, #tpu.memory_space<vmem>>, vector<1x128xf32>
    %366 = vector.broadcast %365 : vector<1x128xf32> to vector<8x128xf32>
    %367 = arith.addf %364, %366 : vector<8x128xf32>
    %368 = arith.addf %329, %367 : vector<8x128xf32>
    %c0_145 = arith.constant 0 : index
    %c0_146 = arith.constant 0 : index
    %c0_147 = arith.constant 0 : index
    %369 = vector.load %arg27[%c0_145, %c0_146, %c0_147] : memref<1x8x128xf32, #tpu.memory_space<vmem>>, vector<1x8x128xf32>
    %370 = vector.shape_cast %369 : vector<1x8x128xf32> to vector<8x128xf32>
    %371 = vector.shape_cast %368 : vector<8x128xf32> to vector<1x8x128xf32>
    tpu.vector_store %arg27[%c0_145, %c0_146, %c0_147], %371 {strides = array<i32>} : memref<1x8x128xf32, #tpu.memory_space<vmem>>, vector<1x8x128xf32>,
    %c0_148 = arith.constant 0 : index
    %c0_149 = arith.constant 0 : index
    %c0_150 = arith.constant 0 : index
    %372 = vector.load %arg28[%c0_148, %c0_149, %c0_150] : memref<1x8x8xf32, #tpu.memory_space<vmem>>, vector<1x8x8xf32>
    %373 = vector.shape_cast %372 : vector<1x8x8xf32> to vector<8x8xf32>
    %374 = vector.shape_cast %178 : vector<8x8xf32> to vector<1x8x8xf32>
    tpu.vector_store %arg28[%c0_148, %c0_149, %c0_150], %374 {strides = array<i32>} : memref<1x8x8xf32, #tpu.memory_space<vmem>>, vector<1x8x8xf32>,
    %c0_151 = arith.constant 0 : index
    %c0_152 = arith.constant 0 : index
    %c0_153 = arith.constant 0 : index
    %375 = vector.load %arg29[%c0_151, %c0_152, %c0_153] : memref<1x8x16xf32, #tpu.memory_space<vmem>>, vector<1x8x16xf32>
    %376 = vector.shape_cast %375 : vector<1x8x16xf32> to vector<8x16xf32>
    %377 = vector.shape_cast %328 : vector<8x16xf32> to vector<1x8x16xf32>
    tpu.vector_store %arg29[%c0_151, %c0_152, %c0_153], %377 {strides = array<i32>} : memref<1x8x16xf32, #tpu.memory_space<vmem>>, vector<1x8x16xf32>,
    return
  }
  func.func @transform_0(%arg0: i32, %arg1: i32) -> (i32, i32, i32) {
    %c0_i32 = arith.constant 0 : i32
    %c0_i32_0 = arith.constant 0 : i32
    return %arg0, %arg1, %c0_i32 : i32, i32, i32
  }
  func.func @transform_1(%arg0: i32, %arg1: i32) -> (i32, i32, i32) {
    %c0_i32 = arith.constant 0 : i32
    %c0_i32_0 = arith.constant 0 : i32
    %c0_i32_1 = arith.constant 0 : i32
    return %arg0, %c0_i32, %c0_i32_0 : i32, i32, i32
  }
  func.func @transform_2(%arg0: i32, %arg1: i32) -> (i32, i32, i32) {
    %c0_i32 = arith.constant 0 : i32
    %c0_i32_0 = arith.constant 0 : i32
    %c0_i32_1 = arith.constant 0 : i32
    return %arg0, %c0_i32, %c0_i32_0 : i32, i32, i32
  }
  func.func @transform_3(%arg0: i32, %arg1: i32) -> (i32, i32) {
    %c0_i32 = arith.constant 0 : i32
    %c0_i32_0 = arith.constant 0 : i32
    %c0_i32_1 = arith.constant 0 : i32
    return %c0_i32, %c0_i32_0 : i32, i32
  }
  func.func @transform_4(%arg0: i32, %arg1: i32) -> (i32, i32) {
    %c0_i32 = arith.constant 0 : i32
    %c0_i32_0 = arith.constant 0 : i32
    %c0_i32_1 = arith.constant 0 : i32
    return %c0_i32, %c0_i32_0 : i32, i32
  }
  func.func @transform_5(%arg0: i32, %arg1: i32) -> (i32, i32) {
    %c0_i32 = arith.constant 0 : i32
    %c0_i32_0 = arith.constant 0 : i32
    %c0_i32_1 = arith.constant 0 : i32
    return %c0_i32, %c0_i32_0 : i32, i32
  }
  func.func @transform_6(%arg0: i32, %arg1: i32) -> (i32, i32) {
    %c0_i32 = arith.constant 0 : i32
    %c0_i32_0 = arith.constant 0 : i32
    %c0_i32_1 = arith.constant 0 : i32
    return %c0_i32, %c0_i32_0 : i32, i32
  }
  func.func @transform_7(%arg0: i32, %arg1: i32) -> (i32, i32) {
    %c0_i32 = arith.constant 0 : i32
    %c0_i32_0 = arith.constant 0 : i32
    %c0_i32_1 = arith.constant 0 : i32
    return %c0_i32, %c0_i32_0 : i32, i32
  }
  func.func @transform_8(%arg0: i32, %arg1: i32) -> (i32, i32) {
    %c0_i32 = arith.constant 0 : i32
    %c0_i32_0 = arith.constant 0 : i32
    %c0_i32_1 = arith.constant 0 : i32
    return %c0_i32, %c0_i32_0 : i32, i32
  }
  func.func @transform_9(%arg0: i32, %arg1: i32) -> (i32, i32) {
    %c0_i32 = arith.constant 0 : i32
    %c0_i32_0 = arith.constant 0 : i32
    %c0_i32_1 = arith.constant 0 : i32
    return %c0_i32, %c0_i32_0 : i32, i32
  }
  func.func @transform_10(%arg0: i32, %arg1: i32) -> (i32, i32) {
    %c0_i32 = arith.constant 0 : i32
    %c0_i32_0 = arith.constant 0 : i32
    %c0_i32_1 = arith.constant 0 : i32
    return %c0_i32, %c0_i32_0 : i32, i32
  }
  func.func @transform_11(%arg0: i32, %arg1: i32) -> (i32, i32) {
    %c0_i32 = arith.constant 0 : i32
    %c0_i32_0 = arith.constant 0 : i32
    %c0_i32_1 = arith.constant 0 : i32
    return %c0_i32, %c0_i32_0 : i32, i32
  }
  func.func @transform_12(%arg0: i32, %arg1: i32) -> (i32, i32) {
    %c0_i32 = arith.constant 0 : i32
    %c0_i32_0 = arith.constant 0 : i32
    %c0_i32_1 = arith.constant 0 : i32
    return %c0_i32, %c0_i32_0 : i32, i32
  }
  func.func @transform_13(%arg0: i32, %arg1: i32) -> (i32, i32) {
    %c0_i32 = arith.constant 0 : i32
    %c0_i32_0 = arith.constant 0 : i32
    %c0_i32_1 = arith.constant 0 : i32
    return %c0_i32, %c0_i32_0 : i32, i32
  }
  func.func @transform_14(%arg0: i32, %arg1: i32) -> (i32, i32) {
    %c0_i32 = arith.constant 0 : i32
    %c0_i32_0 = arith.constant 0 : i32
    %c0_i32_1 = arith.constant 0 : i32
    return %c0_i32, %c0_i32_0 : i32, i32
  }
  func.func @transform_15(%arg0: i32, %arg1: i32) -> (i32, i32) {
    %c0_i32 = arith.constant 0 : i32
    %c0_i32_0 = arith.constant 0 : i32
    %c0_i32_1 = arith.constant 0 : i32
    return %c0_i32, %c0_i32_0 : i32, i32
  }
  func.func @transform_16(%arg0: i32, %arg1: i32) -> (i32, i32) {
    %c0_i32 = arith.constant 0 : i32
    %c0_i32_0 = arith.constant 0 : i32
    %c0_i32_1 = arith.constant 0 : i32
    return %c0_i32, %c0_i32_0 : i32, i32
  }
  func.func @transform_17(%arg0: i32, %arg1: i32) -> (i32, i32) {
    %c0_i32 = arith.constant 0 : i32
    %c0_i32_0 = arith.constant 0 : i32
    %c0_i32_1 = arith.constant 0 : i32
    return %c0_i32, %c0_i32_0 : i32, i32
  }
  func.func @transform_18(%arg0: i32, %arg1: i32) -> (i32, i32) {
    %c0_i32 = arith.constant 0 : i32
    %c0_i32_0 = arith.constant 0 : i32
    %c0_i32_1 = arith.constant 0 : i32
    return %c0_i32, %c0_i32_0 : i32, i32
  }
  func.func @transform_19(%arg0: i32, %arg1: i32) -> (i32, i32) {
    %c0_i32 = arith.constant 0 : i32
    %c0_i32_0 = arith.constant 0 : i32
    %c0_i32_1 = arith.constant 0 : i32
    return %c0_i32, %c0_i32_0 : i32, i32
  }
  func.func @transform_20(%arg0: i32, %arg1: i32) -> (i32, i32) {
    %c0_i32 = arith.constant 0 : i32
    %c0_i32_0 = arith.constant 0 : i32
    %c0_i32_1 = arith.constant 0 : i32
    return %c0_i32, %c0_i32_0 : i32, i32
  }
  func.func @transform_21(%arg0: i32, %arg1: i32) -> (i32, i32) {
    %c0_i32 = arith.constant 0 : i32
    %c0_i32_0 = arith.constant 0 : i32
    %c0_i32_1 = arith.constant 0 : i32
    return %c0_i32, %c0_i32_0 : i32, i32
  }
  func.func @transform_22(%arg0: i32, %arg1: i32) -> (i32, i32) {
    %c0_i32 = arith.constant 0 : i32
    %c0_i32_0 = arith.constant 0 : i32
    %c0_i32_1 = arith.constant 0 : i32
    return %c0_i32, %c0_i32_0 : i32, i32
  }
  func.func @transform_23(%arg0: i32, %arg1: i32) -> (i32, i32) {
    %c0_i32 = arith.constant 0 : i32
    %c0_i32_0 = arith.constant 0 : i32
    %c0_i32_1 = arith.constant 0 : i32
    return %c0_i32, %c0_i32_0 : i32, i32
  }
  func.func @transform_24(%arg0: i32, %arg1: i32) -> (i32, i32) {
    %c0_i32 = arith.constant 0 : i32
    %c0_i32_0 = arith.constant 0 : i32
    %c0_i32_1 = arith.constant 0 : i32
    return %c0_i32, %c0_i32_0 : i32, i32
  }
  func.func @transform_25(%arg0: i32, %arg1: i32) -> (i32, i32, i32) {
    %c0_i32 = arith.constant 0 : i32
    %c0_i32_0 = arith.constant 0 : i32
    return %arg0, %arg1, %c0_i32 : i32, i32, i32
  }
  func.func @transform_26(%arg0: i32, %arg1: i32) -> (i32, i32, i32) {
    %c0_i32 = arith.constant 0 : i32
    %c0_i32_0 = arith.constant 0 : i32
    return %arg0, %arg1, %c0_i32 : i32, i32, i32
  }
  func.func @transform_27(%arg0: i32, %arg1: i32) -> (i32, i32, i32) {
    %c0_i32 = arith.constant 0 : i32
    %c0_i32_0 = arith.constant 0 : i32
    return %arg0, %arg1, %c0_i32 : i32, i32, i32
  }
}

module attributes {stable_mosaic.version = 11 : i64} {
  func.func @decoder_layer_kernel(%arg0: i32, %arg1: i32, %arg2: memref<1x8x128xf32, #tpu.memory_space<vmem>>, %arg3: memref<1x8x128xf32, #tpu.memory_space<vmem>>, %arg4: memref<1x16x128xf32, #tpu.memory_space<vmem>>, %arg5: memref<1x128xf32, #tpu.memory_space<vmem>>, %arg6: memref<1x128xf32, #tpu.memory_space<vmem>>, %arg7: memref<128x128xbf16, #tpu.memory_space<vmem>>, %arg8: memref<1x128xf32, #tpu.memory_space<vmem>>, %arg9: memref<128x256xbf16, #tpu.memory_space<vmem>>, %arg10: memref<1x256xf32, #tpu.memory_space<vmem>>, %arg11: memref<128x128xbf16, #tpu.memory_space<vmem>>, %arg12: memref<1x128xf32, #tpu.memory_space<vmem>>, %arg13: memref<1x128xf32, #tpu.memory_space<vmem>>, %arg14: memref<1x128xf32, #tpu.memory_space<vmem>>, %arg15: memref<128x128xbf16, #tpu.memory_space<vmem>>, %arg16: memref<1x128xf32, #tpu.memory_space<vmem>>, %arg17: memref<128x256xbf16, #tpu.memory_space<vmem>>, %arg18: memref<1x256xf32, #tpu.memory_space<vmem>>, %arg19: memref<128x128xbf16, #tpu.memory_space<vmem>>, %arg20: memref<1x128xf32, #tpu.memory_space<vmem>>, %arg21: memref<1x128xf32, #tpu.memory_space<vmem>>, %arg22: memref<1x128xf32, #tpu.memory_space<vmem>>, %arg23: memref<128x256xbf16, #tpu.memory_space<vmem>>, %arg24: memref<1x256xf32, #tpu.memory_space<vmem>>, %arg25: memref<256x128xbf16, #tpu.memory_space<vmem>>, %arg26: memref<1x128xf32, #tpu.memory_space<vmem>>, %arg27: memref<1x8x128xf32, #tpu.memory_space<vmem>>, %arg28: memref<1x8x8xf32, #tpu.memory_space<vmem>>, %arg29: memref<1x8x16xf32, #tpu.memory_space<vmem>>) attributes {dimension_semantics = [#tpu.dimension_semantics<parallel>, #tpu.dimension_semantics<parallel>], iteration_bounds = array<i64: 2, 1>, scalar_prefetch = 0 : i64, scratch_operands = 0 : i64, tpu.core_type = #tpu.core_type<tc>, window_params = [{transform_indices = @transform_0, window_bounds = array<i64: 1, 8, 128>}, {transform_indices = @transform_1, window_bounds = array<i64: 1, 8, 128>}, {transform_indices = @transform_2, window_bounds = array<i64: 1, 16, 128>}, {pipeline_mode = #tpu.pipeline_mode<synchronous>, transform_indices = @transform_3, window_bounds = array<i64: 1, 128>}, {pipeline_mode = #tpu.pipeline_mode<synchronous>, transform_indices = @transform_4, window_bounds = array<i64: 1, 128>}, {pipeline_mode = #tpu.pipeline_mode<synchronous>, transform_indices = @transform_5, window_bounds = array<i64: 128, 128>}, {pipeline_mode = #tpu.pipeline_mode<synchronous>, transform_indices = @transform_6, window_bounds = array<i64: 1, 128>}, {pipeline_mode = #tpu.pipeline_mode<synchronous>, transform_indices = @transform_7, window_bounds = array<i64: 128, 256>}, {pipeline_mode = #tpu.pipeline_mode<synchronous>, transform_indices = @transform_8, window_bounds = array<i64: 1, 256>}, {pipeline_mode = #tpu.pipeline_mode<synchronous>, transform_indices = @transform_9, window_bounds = array<i64: 128, 128>}, {pipeline_mode = #tpu.pipeline_mode<synchronous>, transform_indices = @transform_10, window_bounds = array<i64: 1, 128>}, {pipeline_mode = #tpu.pipeline_mode<synchronous>, transform_indices = @transform_11, window_bounds = array<i64: 1, 128>}, {pipeline_mode = #tpu.pipeline_mode<synchronous>, transform_indices = @transform_12, window_bounds = array<i64: 1, 128>}, {pipeline_mode = #tpu.pipeline_mode<synchronous>, transform_indices = @transform_13, window_bounds = array<i64: 128, 128>}, {pipeline_mode = #tpu.pipeline_mode<synchronous>, transform_indices = @transform_14, window_bounds = array<i64: 1, 128>}, {pipeline_mode = #tpu.pipeline_mode<synchronous>, transform_indices = @transform_15, window_bounds = array<i64: 128, 256>}, {pipeline_mode = #tpu.pipeline_mode<synchronous>, transform_indices = @transform_16, window_bounds = array<i64: 1, 256>}, {pipeline_mode = #tpu.pipeline_mode<synchronous>, transform_indices = @transform_17, window_bounds = array<i64: 128, 128>}, {pipeline_mode = #tpu.pipeline_mode<synchronous>, transform_indices = @transform_18, window_bounds = array<i64: 1, 128>}, {pipeline_mode = #tpu.pipeline_mode<synchronous>, transform_indices = @transform_19, window_bounds = array<i64: 1, 128>}, {pipeline_mode = #tpu.pipeline_mode<synchronous>, transform_indices = @transform_20, window_bounds = array<i64: 1, 128>}, {pipeline_mode = #tpu.pipeline_mode<synchronous>, transform_indices = @transform_21, window_bounds = array<i64: 128, 256>}, {pipeline_mode = #tpu.pipeline_mode<synchronous>, transform_indices = @transform_22, window_bounds = array<i64: 1, 256>}, {pipeline_mode = #tpu.pipeline_mode<synchronous>, transform_indices = @transform_23, window_bounds = array<i64: 256, 128>}, {pipeline_mode = #tpu.pipeline_mode<synchronous>, transform_indices = @transform_24, window_bounds = array<i64: 1, 128>}, {transform_indices = @transform_25, window_bounds = array<i64: 1, 8, 128>}, {transform_indices = @transform_26, window_bounds = array<i64: 1, 8, 8>}, {transform_indices = @transform_27, window_bounds = array<i64: 1, 8, 16>}]} {
    %c0 = arith.constant 0 : index
    %c0_0 = arith.constant 0 : index
    %c0_1 = arith.constant 0 : index
    %0 = vector.load %arg2[%c0, %c0_0, %c0_1] : memref<1x8x128xf32, #tpu.memory_space<vmem>>, vector<1x8x128xf32>
    %1 = vector.shape_cast %0 : vector<1x8x128xf32> to vector<8x128xf32>
    %c0_2 = arith.constant 0 : index
    %c0_3 = arith.constant 0 : index
    %c0_4 = arith.constant 0 : index
    %2 = vector.load %arg3[%c0_2, %c0_3, %c0_4] : memref<1x8x128xf32, #tpu.memory_space<vmem>>, vector<1x8x128xf32>
    %3 = vector.shape_cast %2 : vector<1x8x128xf32> to vector<8x128xf32>
    %c0_5 = arith.constant 0 : index
    %c0_6 = arith.constant 0 : index
    %c0_7 = arith.constant 0 : index
    %4 = vector.load %arg4[%c0_5, %c0_6, %c0_7] : memref<1x16x128xf32, #tpu.memory_space<vmem>>, vector<1x16x128xf32>
    %5 = vector.shape_cast %4 : vector<1x16x128xf32> to vector<16x128xf32>
    %c0_8 = arith.constant 0 : index
    %c0_9 = arith.constant 0 : index
    %6 = vector.load %arg5[%c0_8, %c0_9] : memref<1x128xf32, #tpu.memory_space<vmem>>, vector<1x128xf32>
    %c0_10 = arith.constant 0 : index
    %c0_11 = arith.constant 0 : index
    %7 = vector.load %arg6[%c0_10, %c0_11] : memref<1x128xf32, #tpu.memory_space<vmem>>, vector<1x128xf32>
    %cst = arith.constant dense<0.000000e+00> : vector<8xf32>
    %8 = vector.multi_reduction <add>, %1, %cst [1] : vector<8x128xf32> to vector<8xf32>
    %9 = vector.shape_cast %8 : vector<8xf32> to vector<8x1xf32>
    %cst_12 = arith.constant 1.280000e+02 : f32
    %10 = vector.broadcast %cst_12 : f32 to vector<8x1xf32>
    %11 = arith.divf %9, %10 : vector<8x1xf32>
    %12 = vector.broadcast %11 : vector<8x1xf32> to vector<8x128xf32>
    %13 = arith.subf %1, %12 : vector<8x128xf32>
    %14 = arith.mulf %13, %13 : vector<8x128xf32>
    %cst_13 = arith.constant dense<0.000000e+00> : vector<8xf32>
    %15 = vector.multi_reduction <add>, %14, %cst_13 [1] : vector<8x128xf32> to vector<8xf32>
    %16 = vector.shape_cast %15 : vector<8xf32> to vector<8x1xf32>
    %cst_14 = arith.constant 1.280000e+02 : f32
    %17 = vector.broadcast %cst_14 : f32 to vector<8x1xf32>
    %18 = arith.divf %16, %17 : vector<8x1xf32>
    %19 = vector.broadcast %11 : vector<8x1xf32> to vector<8x128xf32>
    %20 = arith.subf %1, %19 : vector<8x128xf32>
    %cst_15 = arith.constant 9.99999974E-6 : f32
    %21 = vector.broadcast %cst_15 : f32 to vector<8x1xf32>
    %22 = arith.addf %18, %21 : vector<8x1xf32>
    %23 = math.rsqrt %22 : vector<8x1xf32>
    %24 = vector.broadcast %23 : vector<8x1xf32> to vector<8x128xf32>
    %25 = arith.mulf %20, %24 : vector<8x128xf32>
    %26 = vector.broadcast %6 : vector<1x128xf32> to vector<8x128xf32>
    %27 = arith.mulf %25, %26 : vector<8x128xf32>
    %28 = vector.broadcast %7 : vector<1x128xf32> to vector<8x128xf32>
    %29 = arith.addf %27, %28 : vector<8x128xf32>
    %c0_16 = arith.constant 0 : index
    %c0_17 = arith.constant 0 : index
    %30 = vector.load %arg5[%c0_16, %c0_17] : memref<1x128xf32, #tpu.memory_space<vmem>>, vector<1x128xf32>
    %c0_18 = arith.constant 0 : index
    %c0_19 = arith.constant 0 : index
    %31 = vector.load %arg6[%c0_18, %c0_19] : memref<1x128xf32, #tpu.memory_space<vmem>>, vector<1x128xf32>
    %cst_20 = arith.constant dense<0.000000e+00> : vector<8xf32>
    %32 = vector.multi_reduction <add>, %3, %cst_20 [1] : vector<8x128xf32> to vector<8xf32>
    %33 = vector.shape_cast %32 : vector<8xf32> to vector<8x1xf32>
    %cst_21 = arith.constant 1.280000e+02 : f32
    %34 = vector.broadcast %cst_21 : f32 to vector<8x1xf32>
    %35 = arith.divf %33, %34 : vector<8x1xf32>
    %36 = vector.broadcast %35 : vector<8x1xf32> to vector<8x128xf32>
    %37 = arith.subf %3, %36 : vector<8x128xf32>
    %38 = arith.mulf %37, %37 : vector<8x128xf32>
    %cst_22 = arith.constant dense<0.000000e+00> : vector<8xf32>
    %39 = vector.multi_reduction <add>, %38, %cst_22 [1] : vector<8x128xf32> to vector<8xf32>
    %40 = vector.shape_cast %39 : vector<8xf32> to vector<8x1xf32>
    %cst_23 = arith.constant 1.280000e+02 : f32
    %41 = vector.broadcast %cst_23 : f32 to vector<8x1xf32>
    %42 = arith.divf %40, %41 : vector<8x1xf32>
    %43 = vector.broadcast %35 : vector<8x1xf32> to vector<8x128xf32>
    %44 = arith.subf %3, %43 : vector<8x128xf32>
    %cst_24 = arith.constant 9.99999974E-6 : f32
    %45 = vector.broadcast %cst_24 : f32 to vector<8x1xf32>
    %46 = arith.addf %42, %45 : vector<8x1xf32>
    %47 = math.rsqrt %46 : vector<8x1xf32>
    %48 = vector.broadcast %47 : vector<8x1xf32> to vector<8x128xf32>
    %49 = arith.mulf %44, %48 : vector<8x128xf32>
    %50 = vector.broadcast %30 : vector<1x128xf32> to vector<8x128xf32>
    %51 = arith.mulf %49, %50 : vector<8x128xf32>
    %52 = vector.broadcast %31 : vector<1x128xf32> to vector<8x128xf32>
    %53 = arith.addf %51, %52 : vector<8x128xf32>
    %54 = arith.truncf %29 : vector<8x128xf32> to vector<8x128xbf16>
    %c0_25 = arith.constant 0 : index
    %c0_26 = arith.constant 0 : index
    %55 = vector.load %arg7[%c0_25, %c0_26] : memref<128x128xbf16, #tpu.memory_space<vmem>>, vector<128x128xbf16>
    %cst_27 = arith.constant dense<0.000000e+00> : vector<8x128xf32>
    %56 = tpu.matmul %54, %55, %cst_27 {dimension_numbers = #tpu.dot_dimension_numbers<[1], [0], [0], [1], [0, 0, 1, 1], [], []>} : vector<8x128xbf16>, vector<128x128xbf16>, vector<8x128xf32> -> vector<8x128xf32>
    %c0_28 = arith.constant 0 : index
    %c0_29 = arith.constant 0 : index
    %57 = vector.load %arg8[%c0_28, %c0_29] : memref<1x128xf32, #tpu.memory_space<vmem>>, vector<1x128xf32>
    %58 = vector.broadcast %57 : vector<1x128xf32> to vector<8x128xf32>
    %59 = arith.addf %56, %58 : vector<8x128xf32>
    %60 = arith.truncf %53 : vector<8x128xf32> to vector<8x128xbf16>
    %c0_30 = arith.constant 0 : index
    %c0_31 = arith.constant 0 : index
    %61 = vector.load %arg9[%c0_30, %c0_31] : memref<128x256xbf16, #tpu.memory_space<vmem>>, vector<128x256xbf16>
    %cst_32 = arith.constant dense<0.000000e+00> : vector<8x256xf32>
    %62 = tpu.matmul %60, %61, %cst_32 {dimension_numbers = #tpu.dot_dimension_numbers<[1], [0], [0], [1], [0, 0, 1, 1], [], []>} : vector<8x128xbf16>, vector<128x256xbf16>, vector<8x256xf32> -> vector<8x256xf32>
    %c0_33 = arith.constant 0 : index
    %c0_34 = arith.constant 0 : index
    %63 = vector.load %arg10[%c0_33, %c0_34] : memref<1x256xf32, #tpu.memory_space<vmem>>, vector<1x256xf32>
    %64 = vector.broadcast %63 : vector<1x256xf32> to vector<8x256xf32>
    %65 = arith.addf %62, %64 : vector<8x256xf32>
    %66 = vector.extract_strided_slice %65 {offsets = [0, 0], sizes = [8, 128], strides = [1, 1]} : vector<8x256xf32> to vector<8x128xf32>
    %67 = vector.extract_strided_slice %65 {offsets = [0, 128], sizes = [8, 128], strides = [1, 1]} : vector<8x256xf32> to vector<8x128xf32>
    %c0_35 = arith.constant 0 : index
    %c0_36 = arith.constant 0 : index
    %68 = vector.load %arg12[%c0_35, %c0_36] : memref<1x128xf32, #tpu.memory_space<vmem>>, vector<1x128xf32>
    %cst_37 = arith.constant 0.000000e+00 : f32
    %69 = vector.broadcast %cst_37 : f32 to vector<8x128xf32>
    %cst_38 = arith.constant 0.000000e+00 : f32
    %70 = vector.broadcast %cst_38 : f32 to vector<8x8xf32>
    %71 = vector.extract_strided_slice %59 {offsets = [0, 0], sizes = [8, 32], strides = [1, 1]} : vector<8x128xf32> to vector<8x32xf32>
    %72 = arith.truncf %71 : vector<8x32xf32> to vector<8x32xbf16>
    %73 = vector.extract_strided_slice %66 {offsets = [0, 0], sizes = [8, 32], strides = [1, 1]} : vector<8x128xf32> to vector<8x32xf32>
    %74 = arith.truncf %73 : vector<8x32xf32> to vector<8x32xbf16>
    %75 = vector.extract_strided_slice %67 {offsets = [0, 0], sizes = [8, 32], strides = [1, 1]} : vector<8x128xf32> to vector<8x32xf32>
    %76 = arith.truncf %75 : vector<8x32xf32> to vector<8x32xbf16>
    %cst_39 = arith.constant dense<0.000000e+00> : vector<8x8xf32>
    %77 = tpu.matmul %72, %74, %cst_39 {dimension_numbers = #tpu.dot_dimension_numbers<[1], [1], [0], [0], [0, 0, 1, 0], [], []>} : vector<8x32xbf16>, vector<8x32xbf16>, vector<8x8xf32> -> vector<8x8xf32>
    %cst_40 = arith.constant 0.176776692 : f32
    %78 = vector.broadcast %cst_40 : f32 to vector<8x8xf32>
    %79 = arith.mulf %77, %78 : vector<8x8xf32>
    %cst_41 = arith.constant dense<0xFF800000> : vector<8xf32>
    %80 = vector.multi_reduction <maximumf>, %79, %cst_41 [1] : vector<8x8xf32> to vector<8xf32>
    %81 = vector.shape_cast %80 : vector<8xf32> to vector<8x1xf32>
    %82 = vector.broadcast %81 : vector<8x1xf32> to vector<8x8xf32>
    %83 = arith.subf %79, %82 : vector<8x8xf32>
    %84 = math.exp %83 : vector<8x8xf32>
    %cst_42 = arith.constant dense<0.000000e+00> : vector<8xf32>
    %85 = vector.multi_reduction <add>, %84, %cst_42 [1] : vector<8x8xf32> to vector<8xf32>
    %86 = vector.shape_cast %85 : vector<8xf32> to vector<8x1xf32>
    %87 = tpu.reciprocal %86 {approx = true} : vector<8x1xf32> -> vector<8x1xf32>
    %88 = vector.broadcast %87 : vector<8x1xf32> to vector<8x8xf32>
    %89 = arith.mulf %84, %88 : vector<8x8xf32>
    %90 = arith.addf %70, %89 : vector<8x8xf32>
    %91 = arith.truncf %89 : vector<8x8xf32> to vector<8x8xbf16>
    %cst_43 = arith.constant dense<0.000000e+00> : vector<8x32xf32>
    %92 = tpu.matmul %91, %76, %cst_43 {dimension_numbers = #tpu.dot_dimension_numbers<[1], [0], [0], [1], [0, 0, 1, 1], [], []>} : vector<8x8xbf16>, vector<8x32xbf16>, vector<8x32xf32> -> vector<8x32xf32>
    %93 = arith.truncf %92 : vector<8x32xf32> to vector<8x32xbf16>
    %c0_44 = arith.constant 0 : index
    %c0_45 = arith.constant 0 : index
    %94 = vector.load %arg11[%c0_44, %c0_45] : memref<128x128xbf16, #tpu.memory_space<vmem>>, vector<32x128xbf16>
    %cst_46 = arith.constant dense<0.000000e+00> : vector<8x128xf32>
    %95 = tpu.matmul %93, %94, %cst_46 {dimension_numbers = #tpu.dot_dimension_numbers<[1], [0], [0], [1], [0, 0, 1, 1], [], []>} : vector<8x32xbf16>, vector<32x128xbf16>, vector<8x128xf32> -> vector<8x128xf32>
    %96 = arith.addf %69, %95 : vector<8x128xf32>
    %97 = vector.extract_strided_slice %59 {offsets = [0, 32], sizes = [8, 32], strides = [1, 1]} : vector<8x128xf32> to vector<8x32xf32>
    %98 = arith.truncf %97 : vector<8x32xf32> to vector<8x32xbf16>
    %99 = vector.extract_strided_slice %66 {offsets = [0, 32], sizes = [8, 32], strides = [1, 1]} : vector<8x128xf32> to vector<8x32xf32>
    %100 = arith.truncf %99 : vector<8x32xf32> to vector<8x32xbf16>
    %101 = vector.extract_strided_slice %67 {offsets = [0, 32], sizes = [8, 32], strides = [1, 1]} : vector<8x128xf32> to vector<8x32xf32>
    %102 = arith.truncf %101 : vector<8x32xf32> to vector<8x32xbf16>
    %cst_47 = arith.constant dense<0.000000e+00> : vector<8x8xf32>
    %103 = tpu.matmul %98, %100, %cst_47 {dimension_numbers = #tpu.dot_dimension_numbers<[1], [1], [0], [0], [0, 0, 1, 0], [], []>} : vector<8x32xbf16>, vector<8x32xbf16>, vector<8x8xf32> -> vector<8x8xf32>
    %cst_48 = arith.constant 0.176776692 : f32
    %104 = vector.broadcast %cst_48 : f32 to vector<8x8xf32>
    %105 = arith.mulf %103, %104 : vector<8x8xf32>
    %cst_49 = arith.constant dense<0xFF800000> : vector<8xf32>
    %106 = vector.multi_reduction <maximumf>, %105, %cst_49 [1] : vector<8x8xf32> to vector<8xf32>
    %107 = vector.shape_cast %106 : vector<8xf32> to vector<8x1xf32>
    %108 = vector.broadcast %107 : vector<8x1xf32> to vector<8x8xf32>
    %109 = arith.subf %105, %108 : vector<8x8xf32>
    %110 = math.exp %109 : vector<8x8xf32>
    %cst_50 = arith.constant dense<0.000000e+00> : vector<8xf32>
    %111 = vector.multi_reduction <add>, %110, %cst_50 [1] : vector<8x8xf32> to vector<8xf32>
    %112 = vector.shape_cast %111 : vector<8xf32> to vector<8x1xf32>
    %113 = tpu.reciprocal %112 {approx = true} : vector<8x1xf32> -> vector<8x1xf32>
    %114 = vector.broadcast %113 : vector<8x1xf32> to vector<8x8xf32>
    %115 = arith.mulf %110, %114 : vector<8x8xf32>
    %116 = arith.addf %90, %115 : vector<8x8xf32>
    %117 = arith.truncf %115 : vector<8x8xf32> to vector<8x8xbf16>
    %cst_51 = arith.constant dense<0.000000e+00> : vector<8x32xf32>
    %118 = tpu.matmul %117, %102, %cst_51 {dimension_numbers = #tpu.dot_dimension_numbers<[1], [0], [0], [1], [0, 0, 1, 1], [], []>} : vector<8x8xbf16>, vector<8x32xbf16>, vector<8x32xf32> -> vector<8x32xf32>
    %119 = arith.truncf %118 : vector<8x32xf32> to vector<8x32xbf16>
    %c32 = arith.constant 32 : index
    %c0_52 = arith.constant 0 : index
    %120 = vector.load %arg11[%c32, %c0_52] : memref<128x128xbf16, #tpu.memory_space<vmem>>, vector<32x128xbf16>
    %cst_53 = arith.constant dense<0.000000e+00> : vector<8x128xf32>
    %121 = tpu.matmul %119, %120, %cst_53 {dimension_numbers = #tpu.dot_dimension_numbers<[1], [0], [0], [1], [0, 0, 1, 1], [], []>} : vector<8x32xbf16>, vector<32x128xbf16>, vector<8x128xf32> -> vector<8x128xf32>
    %122 = arith.addf %96, %121 : vector<8x128xf32>
    %123 = vector.extract_strided_slice %59 {offsets = [0, 64], sizes = [8, 32], strides = [1, 1]} : vector<8x128xf32> to vector<8x32xf32>
    %124 = arith.truncf %123 : vector<8x32xf32> to vector<8x32xbf16>
    %125 = vector.extract_strided_slice %66 {offsets = [0, 64], sizes = [8, 32], strides = [1, 1]} : vector<8x128xf32> to vector<8x32xf32>
    %126 = arith.truncf %125 : vector<8x32xf32> to vector<8x32xbf16>
    %127 = vector.extract_strided_slice %67 {offsets = [0, 64], sizes = [8, 32], strides = [1, 1]} : vector<8x128xf32> to vector<8x32xf32>
    %128 = arith.truncf %127 : vector<8x32xf32> to vector<8x32xbf16>
    %cst_54 = arith.constant dense<0.000000e+00> : vector<8x8xf32>
    %129 = tpu.matmul %124, %126, %cst_54 {dimension_numbers = #tpu.dot_dimension_numbers<[1], [1], [0], [0], [0, 0, 1, 0], [], []>} : vector<8x32xbf16>, vector<8x32xbf16>, vector<8x8xf32> -> vector<8x8xf32>
    %cst_55 = arith.constant 0.176776692 : f32
    %130 = vector.broadcast %cst_55 : f32 to vector<8x8xf32>
    %131 = arith.mulf %129, %130 : vector<8x8xf32>
    %cst_56 = arith.constant dense<0xFF800000> : vector<8xf32>
    %132 = vector.multi_reduction <maximumf>, %131, %cst_56 [1] : vector<8x8xf32> to vector<8xf32>
    %133 = vector.shape_cast %132 : vector<8xf32> to vector<8x1xf32>
    %134 = vector.broadcast %133 : vector<8x1xf32> to vector<8x8xf32>
    %135 = arith.subf %131, %134 : vector<8x8xf32>
    %136 = math.exp %135 : vector<8x8xf32>
    %cst_57 = arith.constant dense<0.000000e+00> : vector<8xf32>
    %137 = vector.multi_reduction <add>, %136, %cst_57 [1] : vector<8x8xf32> to vector<8xf32>
    %138 = vector.shape_cast %137 : vector<8xf32> to vector<8x1xf32>
    %139 = tpu.reciprocal %138 {approx = true} : vector<8x1xf32> -> vector<8x1xf32>
    %140 = vector.broadcast %139 : vector<8x1xf32> to vector<8x8xf32>
    %141 = arith.mulf %136, %140 : vector<8x8xf32>
    %142 = arith.addf %116, %141 : vector<8x8xf32>
    %143 = arith.truncf %141 : vector<8x8xf32> to vector<8x8xbf16>
    %cst_58 = arith.constant dense<0.000000e+00> : vector<8x32xf32>
    %144 = tpu.matmul %143, %128, %cst_58 {dimension_numbers = #tpu.dot_dimension_numbers<[1], [0], [0], [1], [0, 0, 1, 1], [], []>} : vector<8x8xbf16>, vector<8x32xbf16>, vector<8x32xf32> -> vector<8x32xf32>
    %145 = arith.truncf %144 : vector<8x32xf32> to vector<8x32xbf16>
    %c64 = arith.constant 64 : index
    %c0_59 = arith.constant 0 : index
    %146 = vector.load %arg11[%c64, %c0_59] : memref<128x128xbf16, #tpu.memory_space<vmem>>, vector<32x128xbf16>
    %cst_60 = arith.constant dense<0.000000e+00> : vector<8x128xf32>
    %147 = tpu.matmul %145, %146, %cst_60 {dimension_numbers = #tpu.dot_dimension_numbers<[1], [0], [0], [1], [0, 0, 1, 1], [], []>} : vector<8x32xbf16>, vector<32x128xbf16>, vector<8x128xf32> -> vector<8x128xf32>
    %148 = arith.addf %122, %147 : vector<8x128xf32>
    %149 = vector.extract_strided_slice %59 {offsets = [0, 96], sizes = [8, 32], strides = [1, 1]} : vector<8x128xf32> to vector<8x32xf32>
    %150 = arith.truncf %149 : vector<8x32xf32> to vector<8x32xbf16>
    %151 = vector.extract_strided_slice %66 {offsets = [0, 96], sizes = [8, 32], strides = [1, 1]} : vector<8x128xf32> to vector<8x32xf32>
    %152 = arith.truncf %151 : vector<8x32xf32> to vector<8x32xbf16>
    %153 = vector.extract_strided_slice %67 {offsets = [0, 96], sizes = [8, 32], strides = [1, 1]} : vector<8x128xf32> to vector<8x32xf32>
    %154 = arith.truncf %153 : vector<8x32xf32> to vector<8x32xbf16>
    %cst_61 = arith.constant dense<0.000000e+00> : vector<8x8xf32>
    %155 = tpu.matmul %150, %152, %cst_61 {dimension_numbers = #tpu.dot_dimension_numbers<[1], [1], [0], [0], [0, 0, 1, 0], [], []>} : vector<8x32xbf16>, vector<8x32xbf16>, vector<8x8xf32> -> vector<8x8xf32>
    %cst_62 = arith.constant 0.176776692 : f32
    %156 = vector.broadcast %cst_62 : f32 to vector<8x8xf32>
    %157 = arith.mulf %155, %156 : vector<8x8xf32>
    %cst_63 = arith.constant dense<0xFF800000> : vector<8xf32>
    %158 = vector.multi_reduction <maximumf>, %157, %cst_63 [1] : vector<8x8xf32> to vector<8xf32>
    %159 = vector.shape_cast %158 : vector<8xf32> to vector<8x1xf32>
    %160 = vector.broadcast %159 : vector<8x1xf32> to vector<8x8xf32>
    %161 = arith.subf %157, %160 : vector<8x8xf32>
    %162 = math.exp %161 : vector<8x8xf32>
    %cst_64 = arith.constant dense<0.000000e+00> : vector<8xf32>
    %163 = vector.multi_reduction <add>, %162, %cst_64 [1] : vector<8x8xf32> to vector<8xf32>
    %164 = vector.shape_cast %163 : vector<8xf32> to vector<8x1xf32>
    %165 = tpu.reciprocal %164 {approx = true} : vector<8x1xf32> -> vector<8x1xf32>
    %166 = vector.broadcast %165 : vector<8x1xf32> to vector<8x8xf32>
    %167 = arith.mulf %162, %166 : vector<8x8xf32>
    %168 = arith.addf %142, %167 : vector<8x8xf32>
    %169 = arith.truncf %167 : vector<8x8xf32> to vector<8x8xbf16>
    %cst_65 = arith.constant dense<0.000000e+00> : vector<8x32xf32>
    %170 = tpu.matmul %169, %154, %cst_65 {dimension_numbers = #tpu.dot_dimension_numbers<[1], [0], [0], [1], [0, 0, 1, 1], [], []>} : vector<8x8xbf16>, vector<8x32xbf16>, vector<8x32xf32> -> vector<8x32xf32>
    %171 = arith.truncf %170 : vector<8x32xf32> to vector<8x32xbf16>
    %c96 = arith.constant 96 : index
    %c0_66 = arith.constant 0 : index
    %172 = vector.load %arg11[%c96, %c0_66] : memref<128x128xbf16, #tpu.memory_space<vmem>>, vector<32x128xbf16>
    %cst_67 = arith.constant dense<0.000000e+00> : vector<8x128xf32>
    %173 = tpu.matmul %171, %172, %cst_67 {dimension_numbers = #tpu.dot_dimension_numbers<[1], [0], [0], [1], [0, 0, 1, 1], [], []>} : vector<8x32xbf16>, vector<32x128xbf16>, vector<8x128xf32> -> vector<8x128xf32>
    %174 = arith.addf %148, %173 : vector<8x128xf32>
    %175 = vector.broadcast %68 : vector<1x128xf32> to vector<8x128xf32>
    %176 = arith.addf %174, %175 : vector<8x128xf32>
    %cst_68 = arith.constant 2.500000e-01 : f32
    %177 = vector.broadcast %cst_68 : f32 to vector<8x8xf32>
    %178 = arith.mulf %168, %177 : vector<8x8xf32>
    %179 = arith.addf %1, %176 : vector<8x128xf32>
    %c0_69 = arith.constant 0 : index
    %c0_70 = arith.constant 0 : index
    %180 = vector.load %arg13[%c0_69, %c0_70] : memref<1x128xf32, #tpu.memory_space<vmem>>, vector<1x128xf32>
    %c0_71 = arith.constant 0 : index
    %c0_72 = arith.constant 0 : index
    %181 = vector.load %arg14[%c0_71, %c0_72] : memref<1x128xf32, #tpu.memory_space<vmem>>, vector<1x128xf32>
    %cst_73 = arith.constant dense<0.000000e+00> : vector<8xf32>
    %182 = vector.multi_reduction <add>, %179, %cst_73 [1] : vector<8x128xf32> to vector<8xf32>
    %183 = vector.shape_cast %182 : vector<8xf32> to vector<8x1xf32>
    %cst_74 = arith.constant 1.280000e+02 : f32
    %184 = vector.broadcast %cst_74 : f32 to vector<8x1xf32>
    %185 = arith.divf %183, %184 : vector<8x1xf32>
    %186 = vector.broadcast %185 : vector<8x1xf32> to vector<8x128xf32>
    %187 = arith.subf %179, %186 : vector<8x128xf32>
    %188 = arith.mulf %187, %187 : vector<8x128xf32>
    %cst_75 = arith.constant dense<0.000000e+00> : vector<8xf32>
    %189 = vector.multi_reduction <add>, %188, %cst_75 [1] : vector<8x128xf32> to vector<8xf32>
    %190 = vector.shape_cast %189 : vector<8xf32> to vector<8x1xf32>
    %cst_76 = arith.constant 1.280000e+02 : f32
    %191 = vector.broadcast %cst_76 : f32 to vector<8x1xf32>
    %192 = arith.divf %190, %191 : vector<8x1xf32>
    %193 = vector.broadcast %185 : vector<8x1xf32> to vector<8x128xf32>
    %194 = arith.subf %179, %193 : vector<8x128xf32>
    %cst_77 = arith.constant 9.99999974E-6 : f32
    %195 = vector.broadcast %cst_77 : f32 to vector<8x1xf32>
    %196 = arith.addf %192, %195 : vector<8x1xf32>
    %197 = math.rsqrt %196 : vector<8x1xf32>
    %198 = vector.broadcast %197 : vector<8x1xf32> to vector<8x128xf32>
    %199 = arith.mulf %194, %198 : vector<8x128xf32>
    %200 = vector.broadcast %180 : vector<1x128xf32> to vector<8x128xf32>
    %201 = arith.mulf %199, %200 : vector<8x128xf32>
    %202 = vector.broadcast %181 : vector<1x128xf32> to vector<8x128xf32>
    %203 = arith.addf %201, %202 : vector<8x128xf32>
    %204 = arith.truncf %203 : vector<8x128xf32> to vector<8x128xbf16>
    %c0_78 = arith.constant 0 : index
    %c0_79 = arith.constant 0 : index
    %205 = vector.load %arg15[%c0_78, %c0_79] : memref<128x128xbf16, #tpu.memory_space<vmem>>, vector<128x128xbf16>
    %cst_80 = arith.constant dense<0.000000e+00> : vector<8x128xf32>
    %206 = tpu.matmul %204, %205, %cst_80 {dimension_numbers = #tpu.dot_dimension_numbers<[1], [0], [0], [1], [0, 0, 1, 1], [], []>} : vector<8x128xbf16>, vector<128x128xbf16>, vector<8x128xf32> -> vector<8x128xf32>
    %c0_81 = arith.constant 0 : index
    %c0_82 = arith.constant 0 : index
    %207 = vector.load %arg16[%c0_81, %c0_82] : memref<1x128xf32, #tpu.memory_space<vmem>>, vector<1x128xf32>
    %208 = vector.broadcast %207 : vector<1x128xf32> to vector<8x128xf32>
    %209 = arith.addf %206, %208 : vector<8x128xf32>
    %210 = arith.truncf %5 : vector<16x128xf32> to vector<16x128xbf16>
    %c0_83 = arith.constant 0 : index
    %c0_84 = arith.constant 0 : index
    %211 = vector.load %arg17[%c0_83, %c0_84] : memref<128x256xbf16, #tpu.memory_space<vmem>>, vector<128x256xbf16>
    %cst_85 = arith.constant dense<0.000000e+00> : vector<16x256xf32>
    %212 = tpu.matmul %210, %211, %cst_85 {dimension_numbers = #tpu.dot_dimension_numbers<[1], [0], [0], [1], [0, 0, 1, 1], [], []>} : vector<16x128xbf16>, vector<128x256xbf16>, vector<16x256xf32> -> vector<16x256xf32>
    %c0_86 = arith.constant 0 : index
    %c0_87 = arith.constant 0 : index
    %213 = vector.load %arg18[%c0_86, %c0_87] : memref<1x256xf32, #tpu.memory_space<vmem>>, vector<1x256xf32>
    %214 = vector.broadcast %213 : vector<1x256xf32> to vector<16x256xf32>
    %215 = arith.addf %212, %214 : vector<16x256xf32>
    %216 = vector.extract_strided_slice %215 {offsets = [0, 0], sizes = [16, 128], strides = [1, 1]} : vector<16x256xf32> to vector<16x128xf32>
    %217 = vector.extract_strided_slice %215 {offsets = [0, 128], sizes = [16, 128], strides = [1, 1]} : vector<16x256xf32> to vector<16x128xf32>
    %c0_88 = arith.constant 0 : index
    %c0_89 = arith.constant 0 : index
    %218 = vector.load %arg20[%c0_88, %c0_89] : memref<1x128xf32, #tpu.memory_space<vmem>>, vector<1x128xf32>
    %cst_90 = arith.constant 0.000000e+00 : f32
    %219 = vector.broadcast %cst_90 : f32 to vector<8x128xf32>
    %cst_91 = arith.constant 0.000000e+00 : f32
    %220 = vector.broadcast %cst_91 : f32 to vector<8x16xf32>
    %221 = vector.extract_strided_slice %209 {offsets = [0, 0], sizes = [8, 32], strides = [1, 1]} : vector<8x128xf32> to vector<8x32xf32>
    %222 = arith.truncf %221 : vector<8x32xf32> to vector<8x32xbf16>
    %223 = vector.extract_strided_slice %216 {offsets = [0, 0], sizes = [16, 32], strides = [1, 1]} : vector<16x128xf32> to vector<16x32xf32>
    %224 = arith.truncf %223 : vector<16x32xf32> to vector<16x32xbf16>
    %225 = vector.extract_strided_slice %217 {offsets = [0, 0], sizes = [16, 32], strides = [1, 1]} : vector<16x128xf32> to vector<16x32xf32>
    %226 = arith.truncf %225 : vector<16x32xf32> to vector<16x32xbf16>
    %cst_92 = arith.constant dense<0.000000e+00> : vector<8x16xf32>
    %227 = tpu.matmul %222, %224, %cst_92 {dimension_numbers = #tpu.dot_dimension_numbers<[1], [1], [0], [0], [0, 0, 1, 0], [], []>} : vector<8x32xbf16>, vector<16x32xbf16>, vector<8x16xf32> -> vector<8x16xf32>
    %cst_93 = arith.constant 0.176776692 : f32
    %228 = vector.broadcast %cst_93 : f32 to vector<8x16xf32>
    %229 = arith.mulf %227, %228 : vector<8x16xf32>
    %cst_94 = arith.constant dense<0xFF800000> : vector<8xf32>
    %230 = vector.multi_reduction <maximumf>, %229, %cst_94 [1] : vector<8x16xf32> to vector<8xf32>
    %231 = vector.shape_cast %230 : vector<8xf32> to vector<8x1xf32>
    %232 = vector.broadcast %231 : vector<8x1xf32> to vector<8x16xf32>
    %233 = arith.subf %229, %232 : vector<8x16xf32>
    %234 = math.exp %233 : vector<8x16xf32>
    %cst_95 = arith.constant dense<0.000000e+00> : vector<8xf32>
    %235 = vector.multi_reduction <add>, %234, %cst_95 [1] : vector<8x16xf32> to vector<8xf32>
    %236 = vector.shape_cast %235 : vector<8xf32> to vector<8x1xf32>
    %237 = tpu.reciprocal %236 {approx = true} : vector<8x1xf32> -> vector<8x1xf32>
    %238 = vector.broadcast %237 : vector<8x1xf32> to vector<8x16xf32>
    %239 = arith.mulf %234, %238 : vector<8x16xf32>
    %240 = arith.addf %220, %239 : vector<8x16xf32>
    %241 = arith.truncf %239 : vector<8x16xf32> to vector<8x16xbf16>
    %cst_96 = arith.constant dense<0.000000e+00> : vector<8x32xf32>
    %242 = tpu.matmul %241, %226, %cst_96 {dimension_numbers = #tpu.dot_dimension_numbers<[1], [0], [0], [1], [0, 0, 1, 1], [], []>} : vector<8x16xbf16>, vector<16x32xbf16>, vector<8x32xf32> -> vector<8x32xf32>
    %243 = arith.truncf %242 : vector<8x32xf32> to vector<8x32xbf16>
    %c0_97 = arith.constant 0 : index
    %c0_98 = arith.constant 0 : index
    %244 = vector.load %arg19[%c0_97, %c0_98] : memref<128x128xbf16, #tpu.memory_space<vmem>>, vector<32x128xbf16>
    %cst_99 = arith.constant dense<0.000000e+00> : vector<8x128xf32>
    %245 = tpu.matmul %243, %244, %cst_99 {dimension_numbers = #tpu.dot_dimension_numbers<[1], [0], [0], [1], [0, 0, 1, 1], [], []>} : vector<8x32xbf16>, vector<32x128xbf16>, vector<8x128xf32> -> vector<8x128xf32>
    %246 = arith.addf %219, %245 : vector<8x128xf32>
    %247 = vector.extract_strided_slice %209 {offsets = [0, 32], sizes = [8, 32], strides = [1, 1]} : vector<8x128xf32> to vector<8x32xf32>
    %248 = arith.truncf %247 : vector<8x32xf32> to vector<8x32xbf16>
    %249 = vector.extract_strided_slice %216 {offsets = [0, 32], sizes = [16, 32], strides = [1, 1]} : vector<16x128xf32> to vector<16x32xf32>
    %250 = arith.truncf %249 : vector<16x32xf32> to vector<16x32xbf16>
    %251 = vector.extract_strided_slice %217 {offsets = [0, 32], sizes = [16, 32], strides = [1, 1]} : vector<16x128xf32> to vector<16x32xf32>
    %252 = arith.truncf %251 : vector<16x32xf32> to vector<16x32xbf16>
    %cst_100 = arith.constant dense<0.000000e+00> : vector<8x16xf32>
    %253 = tpu.matmul %248, %250, %cst_100 {dimension_numbers = #tpu.dot_dimension_numbers<[1], [1], [0], [0], [0, 0, 1, 0], [], []>} : vector<8x32xbf16>, vector<16x32xbf16>, vector<8x16xf32> -> vector<8x16xf32>
    %cst_101 = arith.constant 0.176776692 : f32
    %254 = vector.broadcast %cst_101 : f32 to vector<8x16xf32>
    %255 = arith.mulf %253, %254 : vector<8x16xf32>
    %cst_102 = arith.constant dense<0xFF800000> : vector<8xf32>
    %256 = vector.multi_reduction <maximumf>, %255, %cst_102 [1] : vector<8x16xf32> to vector<8xf32>
    %257 = vector.shape_cast %256 : vector<8xf32> to vector<8x1xf32>
    %258 = vector.broadcast %257 : vector<8x1xf32> to vector<8x16xf32>
    %259 = arith.subf %255, %258 : vector<8x16xf32>
    %260 = math.exp %259 : vector<8x16xf32>
    %cst_103 = arith.constant dense<0.000000e+00> : vector<8xf32>
    %261 = vector.multi_reduction <add>, %260, %cst_103 [1] : vector<8x16xf32> to vector<8xf32>
    %262 = vector.shape_cast %261 : vector<8xf32> to vector<8x1xf32>
    %263 = tpu.reciprocal %262 {approx = true} : vector<8x1xf32> -> vector<8x1xf32>
    %264 = vector.broadcast %263 : vector<8x1xf32> to vector<8x16xf32>
    %265 = arith.mulf %260, %264 : vector<8x16xf32>
    %266 = arith.addf %240, %265 : vector<8x16xf32>
    %267 = arith.truncf %265 : vector<8x16xf32> to vector<8x16xbf16>
    %cst_104 = arith.constant dense<0.000000e+00> : vector<8x32xf32>
    %268 = tpu.matmul %267, %252, %cst_104 {dimension_numbers = #tpu.dot_dimension_numbers<[1], [0], [0], [1], [0, 0, 1, 1], [], []>} : vector<8x16xbf16>, vector<16x32xbf16>, vector<8x32xf32> -> vector<8x32xf32>
    %269 = arith.truncf %268 : vector<8x32xf32> to vector<8x32xbf16>
    %c32_105 = arith.constant 32 : index
    %c0_106 = arith.constant 0 : index
    %270 = vector.load %arg19[%c32_105, %c0_106] : memref<128x128xbf16, #tpu.memory_space<vmem>>, vector<32x128xbf16>
    %cst_107 = arith.constant dense<0.000000e+00> : vector<8x128xf32>
    %271 = tpu.matmul %269, %270, %cst_107 {dimension_numbers = #tpu.dot_dimension_numbers<[1], [0], [0], [1], [0, 0, 1, 1], [], []>} : vector<8x32xbf16>, vector<32x128xbf16>, vector<8x128xf32> -> vector<8x128xf32>
    %272 = arith.addf %246, %271 : vector<8x128xf32>
    %273 = vector.extract_strided_slice %209 {offsets = [0, 64], sizes = [8, 32], strides = [1, 1]} : vector<8x128xf32> to vector<8x32xf32>
    %274 = arith.truncf %273 : vector<8x32xf32> to vector<8x32xbf16>
    %275 = vector.extract_strided_slice %216 {offsets = [0, 64], sizes = [16, 32], strides = [1, 1]} : vector<16x128xf32> to vector<16x32xf32>
    %276 = arith.truncf %275 : vector<16x32xf32> to vector<16x32xbf16>
    %277 = vector.extract_strided_slice %217 {offsets = [0, 64], sizes = [16, 32], strides = [1, 1]} : vector<16x128xf32> to vector<16x32xf32>
    %278 = arith.truncf %277 : vector<16x32xf32> to vector<16x32xbf16>
    %cst_108 = arith.constant dense<0.000000e+00> : vector<8x16xf32>
    %279 = tpu.matmul %274, %276, %cst_108 {dimension_numbers = #tpu.dot_dimension_numbers<[1], [1], [0], [0], [0, 0, 1, 0], [], []>} : vector<8x32xbf16>, vector<16x32xbf16>, vector<8x16xf32> -> vector<8x16xf32>
    %cst_109 = arith.constant 0.176776692 : f32
    %280 = vector.broadcast %cst_109 : f32 to vector<8x16xf32>
    %281 = arith.mulf %279, %280 : vector<8x16xf32>
    %cst_110 = arith.constant dense<0xFF800000> : vector<8xf32>
    %282 = vector.multi_reduction <maximumf>, %281, %cst_110 [1] : vector<8x16xf32> to vector<8xf32>
    %283 = vector.shape_cast %282 : vector<8xf32> to vector<8x1xf32>
    %284 = vector.broadcast %283 : vector<8x1xf32> to vector<8x16xf32>
    %285 = arith.subf %281, %284 : vector<8x16xf32>
    %286 = math.exp %285 : vector<8x16xf32>
    %cst_111 = arith.constant dense<0.000000e+00> : vector<8xf32>
    %287 = vector.multi_reduction <add>, %286, %cst_111 [1] : vector<8x16xf32> to vector<8xf32>
    %288 = vector.shape_cast %287 : vector<8xf32> to vector<8x1xf32>
    %289 = tpu.reciprocal %288 {approx = true} : vector<8x1xf32> -> vector<8x1xf32>
    %290 = vector.broadcast %289 : vector<8x1xf32> to vector<8x16xf32>
    %291 = arith.mulf %286, %290 : vector<8x16xf32>
    %292 = arith.addf %266, %291 : vector<8x16xf32>
    %293 = arith.truncf %291 : vector<8x16xf32> to vector<8x16xbf16>
    %cst_112 = arith.constant dense<0.000000e+00> : vector<8x32xf32>
    %294 = tpu.matmul %293, %278, %cst_112 {dimension_numbers = #tpu.dot_dimension_numbers<[1], [0], [0], [1], [0, 0, 1, 1], [], []>} : vector<8x16xbf16>, vector<16x32xbf16>, vector<8x32xf32> -> vector<8x32xf32>
    %295 = arith.truncf %294 : vector<8x32xf32> to vector<8x32xbf16>
    %c64_113 = arith.constant 64 : index
    %c0_114 = arith.constant 0 : index
    %296 = vector.load %arg19[%c64_113, %c0_114] : memref<128x128xbf16, #tpu.memory_space<vmem>>, vector<32x128xbf16>
    %cst_115 = arith.constant dense<0.000000e+00> : vector<8x128xf32>
    %297 = tpu.matmul %295, %296, %cst_115 {dimension_numbers = #tpu.dot_dimension_numbers<[1], [0], [0], [1], [0, 0, 1, 1], [], []>} : vector<8x32xbf16>, vector<32x128xbf16>, vector<8x128xf32> -> vector<8x128xf32>
    %298 = arith.addf %272, %297 : vector<8x128xf32>
    %299 = vector.extract_strided_slice %209 {offsets = [0, 96], sizes = [8, 32], strides = [1, 1]} : vector<8x128xf32> to vector<8x32xf32>
    %300 = arith.truncf %299 : vector<8x32xf32> to vector<8x32xbf16>
    %301 = vector.extract_strided_slice %216 {offsets = [0, 96], sizes = [16, 32], strides = [1, 1]} : vector<16x128xf32> to vector<16x32xf32>
    %302 = arith.truncf %301 : vector<16x32xf32> to vector<16x32xbf16>
    %303 = vector.extract_strided_slice %217 {offsets = [0, 96], sizes = [16, 32], strides = [1, 1]} : vector<16x128xf32> to vector<16x32xf32>
    %304 = arith.truncf %303 : vector<16x32xf32> to vector<16x32xbf16>
    %cst_116 = arith.constant dense<0.000000e+00> : vector<8x16xf32>
    %305 = tpu.matmul %300, %302, %cst_116 {dimension_numbers = #tpu.dot_dimension_numbers<[1], [1], [0], [0], [0, 0, 1, 0], [], []>} : vector<8x32xbf16>, vector<16x32xbf16>, vector<8x16xf32> -> vector<8x16xf32>
    %cst_117 = arith.constant 0.176776692 : f32
    %306 = vector.broadcast %cst_117 : f32 to vector<8x16xf32>
    %307 = arith.mulf %305, %306 : vector<8x16xf32>
    %cst_118 = arith.constant dense<0xFF800000> : vector<8xf32>
    %308 = vector.multi_reduction <maximumf>, %307, %cst_118 [1] : vector<8x16xf32> to vector<8xf32>
    %309 = vector.shape_cast %308 : vector<8xf32> to vector<8x1xf32>
    %310 = vector.broadcast %309 : vector<8x1xf32> to vector<8x16xf32>
    %311 = arith.subf %307, %310 : vector<8x16xf32>
    %312 = math.exp %311 : vector<8x16xf32>
    %cst_119 = arith.constant dense<0.000000e+00> : vector<8xf32>
    %313 = vector.multi_reduction <add>, %312, %cst_119 [1] : vector<8x16xf32> to vector<8xf32>
    %314 = vector.shape_cast %313 : vector<8xf32> to vector<8x1xf32>
    %315 = tpu.reciprocal %314 {approx = true} : vector<8x1xf32> -> vector<8x1xf32>
    %316 = vector.broadcast %315 : vector<8x1xf32> to vector<8x16xf32>
    %317 = arith.mulf %312, %316 : vector<8x16xf32>
    %318 = arith.addf %292, %317 : vector<8x16xf32>
    %319 = arith.truncf %317 : vector<8x16xf32> to vector<8x16xbf16>
    %cst_120 = arith.constant dense<0.000000e+00> : vector<8x32xf32>
    %320 = tpu.matmul %319, %304, %cst_120 {dimension_numbers = #tpu.dot_dimension_numbers<[1], [0], [0], [1], [0, 0, 1, 1], [], []>} : vector<8x16xbf16>, vector<16x32xbf16>, vector<8x32xf32> -> vector<8x32xf32>
    %321 = arith.truncf %320 : vector<8x32xf32> to vector<8x32xbf16>
    %c96_121 = arith.constant 96 : index
    %c0_122 = arith.constant 0 : index
    %322 = vector.load %arg19[%c96_121, %c0_122] : memref<128x128xbf16, #tpu.memory_space<vmem>>, vector<32x128xbf16>
    %cst_123 = arith.constant dense<0.000000e+00> : vector<8x128xf32>
    %323 = tpu.matmul %321, %322, %cst_123 {dimension_numbers = #tpu.dot_dimension_numbers<[1], [0], [0], [1], [0, 0, 1, 1], [], []>} : vector<8x32xbf16>, vector<32x128xbf16>, vector<8x128xf32> -> vector<8x128xf32>
    %324 = arith.addf %298, %323 : vector<8x128xf32>
    %325 = vector.broadcast %218 : vector<1x128xf32> to vector<8x128xf32>
    %326 = arith.addf %324, %325 : vector<8x128xf32>
    %cst_124 = arith.constant 2.500000e-01 : f32
    %327 = vector.broadcast %cst_124 : f32 to vector<8x16xf32>
    %328 = arith.mulf %318, %327 : vector<8x16xf32>
    %329 = arith.addf %179, %326 : vector<8x128xf32>
    %c0_125 = arith.constant 0 : index
    %c0_126 = arith.constant 0 : index
    %330 = vector.load %arg21[%c0_125, %c0_126] : memref<1x128xf32, #tpu.memory_space<vmem>>, vector<1x128xf32>
    %c0_127 = arith.constant 0 : index
    %c0_128 = arith.constant 0 : index
    %331 = vector.load %arg22[%c0_127, %c0_128] : memref<1x128xf32, #tpu.memory_space<vmem>>, vector<1x128xf32>
    %cst_129 = arith.constant dense<0.000000e+00> : vector<8xf32>
    %332 = vector.multi_reduction <add>, %329, %cst_129 [1] : vector<8x128xf32> to vector<8xf32>
    %333 = vector.shape_cast %332 : vector<8xf32> to vector<8x1xf32>
    %cst_130 = arith.constant 1.280000e+02 : f32
    %334 = vector.broadcast %cst_130 : f32 to vector<8x1xf32>
    %335 = arith.divf %333, %334 : vector<8x1xf32>
    %336 = vector.broadcast %335 : vector<8x1xf32> to vector<8x128xf32>
    %337 = arith.subf %329, %336 : vector<8x128xf32>
    %338 = arith.mulf %337, %337 : vector<8x128xf32>
    %cst_131 = arith.constant dense<0.000000e+00> : vector<8xf32>
    %339 = vector.multi_reduction <add>, %338, %cst_131 [1] : vector<8x128xf32> to vector<8xf32>
    %340 = vector.shape_cast %339 : vector<8xf32> to vector<8x1xf32>
    %cst_132 = arith.constant 1.280000e+02 : f32
    %341 = vector.broadcast %cst_132 : f32 to vector<8x1xf32>
    %342 = arith.divf %340, %341 : vector<8x1xf32>
    %343 = vector.broadcast %335 : vector<8x1xf32> to vector<8x128xf32>
    %344 = arith.subf %329, %343 : vector<8x128xf32>
    %cst_133 = arith.constant 9.99999974E-6 : f32
    %345 = vector.broadcast %cst_133 : f32 to vector<8x1xf32>
    %346 = arith.addf %342, %345 : vector<8x1xf32>
    %347 = math.rsqrt %346 : vector<8x1xf32>
    %348 = vector.broadcast %347 : vector<8x1xf32> to vector<8x128xf32>
    %349 = arith.mulf %344, %348 : vector<8x128xf32>
    %350 = vector.broadcast %330 : vector<1x128xf32> to vector<8x128xf32>
    %351 = arith.mulf %349, %350 : vector<8x128xf32>
    %352 = vector.broadcast %331 : vector<1x128xf32> to vector<8x128xf32>
    %353 = arith.addf %351, %352 : vector<8x128xf32>
    %354 = arith.truncf %353 : vector<8x128xf32> to vector<8x128xbf16>
    %c0_134 = arith.constant 0 : index
    %c0_135 = arith.constant 0 : index
    %355 = vector.load %arg23[%c0_134, %c0_135] : memref<128x256xbf16, #tpu.memory_space<vmem>>, vector<128x256xbf16>
    %cst_136 = arith.constant dense<0.000000e+00> : vector<8x256xf32>
    %356 = tpu.matmul %354, %355, %cst_136 {dimension_numbers = #tpu.dot_dimension_numbers<[1], [0], [0], [1], [0, 0, 1, 1], [], []>} : vector<8x128xbf16>, vector<128x256xbf16>, vector<8x256xf32> -> vector<8x256xf32>
    %c0_137 = arith.constant 0 : index
    %c0_138 = arith.constant 0 : index
    %357 = vector.load %arg24[%c0_137, %c0_138] : memref<1x256xf32, #tpu.memory_space<vmem>>, vector<1x256xf32>
    %358 = vector.broadcast %357 : vector<1x256xf32> to vector<8x256xf32>
    %359 = arith.addf %356, %358 : vector<8x256xf32>
    %cst_139 = arith.constant 0.000000e+00 : f32
    %360 = vector.broadcast %cst_139 : f32 to vector<8x256xf32>
    %361 = arith.maximumf %359, %360 : vector<8x256xf32>
    %362 = arith.truncf %361 : vector<8x256xf32> to vector<8x256xbf16>
    %c0_140 = arith.constant 0 : index
    %c0_141 = arith.constant 0 : index
    %363 = vector.load %arg25[%c0_140, %c0_141] : memref<256x128xbf16, #tpu.memory_space<vmem>>, vector<256x128xbf16>
    %cst_142 = arith.constant dense<0.000000e+00> : vector<8x128xf32>
    %364 = tpu.matmul %362, %363, %cst_142 {dimension_numbers = #tpu.dot_dimension_numbers<[1], [0], [0], [1], [0, 0, 1, 1], [], []>} : vector<8x256xbf16>, vector<256x128xbf16>, vector<8x128xf32> -> vector<8x128xf32>
    %c0_143 = arith.constant 0 : index
    %c0_144 = arith.constant 0 : index
    %365 = vector.load %arg26[%c0_143, %c0_144] : memref<1x128xf32, #tpu.memory_space<vmem>>, vector<1x128xf32>
    %366 = vector.broadcast %365 : vector<1x128xf32> to vector<8x128xf32>
    %367 = arith.addf %364, %366 : vector<8x128xf32>
    %368 = arith.addf %329, %367 : vector<8x128xf32>
    %c0_145 = arith.constant 0 : index
    %c0_146 = arith.constant 0 : index
    %c0_147 = arith.constant 0 : index
    %369 = vector.load %arg27[%c0_145, %c0_146, %c0_147] : memref<1x8x128xf32, #tpu.memory_space<vmem>>, vector<1x8x128xf32>
    %370 = vector.shape_cast %369 : vector<1x8x128xf32> to vector<8x128xf32>
    %371 = vector.shape_cast %368 : vector<8x128xf32> to vector<1x8x128xf32>
    tpu.vector_store %arg27[%c0_145, %c0_146, %c0_147], %371 {strides = array<i32>} : memref<1x8x128xf32, #tpu.memory_space<vmem>>, vector<1x8x128xf32>,
    %c0_148 = arith.constant 0 : index
    %c0_149 = arith.constant 0 : index
    %c0_150 = arith.constant 0 : index
    %372 = vector.load %arg28[%c0_148, %c0_149, %c0_150] : memref<1x8x8xf32, #tpu.memory_space<vmem>>, vector<1x8x8xf32>
    %373 = vector.shape_cast %372 : vector<1x8x8xf32> to vector<8x8xf32>
    %374 = vector.shape_cast %178 : vector<8x8xf32> to vector<1x8x8xf32>
    tpu.vector_store %arg28[%c0_148, %c0_149, %c0_150], %374 {strides = array<i32>} : memref<1x8x8xf32, #tpu.memory_space<vmem>>, vector<1x8x8xf32>,
    %c0_151 = arith.constant 0 : index
    %c0_152 = arith.constant 0 : index
    %c0_153 = arith.constant 0 : index
    %375 = vector.load %arg29[%c0_151, %c0_152, %c0_153] : memref<1x8x16xf32, #tpu.memory_space<vmem>>, vector<1x8x16xf32>
    %376 = vector.shape_cast %375 : vector<1x8x16xf32> to vector<8x16xf32>
    %377 = vector.shape_cast %328 : vector<8x16xf32> to vector<1x8x16xf32>
    tpu.vector_store %arg29[%c0_151, %c0_152, %c0_153], %377 {strides = array<i32>} : memref<1x8x16xf32, #tpu.memory_space<vmem>>, vector<1x8x16xf32>,
    return
  }
  func.func @transform_0(%arg0: i32, %arg1: i32) -> (i32, i32, i32) {
    %c0_i32 = arith.constant 0 : i32
    %c0_i32_0 = arith.constant 0 : i32
    return %arg0, %arg1, %c0_i32 : i32, i32, i32
  }
  func.func @transform_1(%arg0: i32, %arg1: i32) -> (i32, i32, i32) {
    %c0_i32 = arith.constant 0 : i32
    %c0_i32_0 = arith.constant 0 : i32
    %c0_i32_1 = arith.constant 0 : i32
    return %arg0, %c0_i32, %c0_i32_0 : i32, i32, i32
  }
  func.func @transform_2(%arg0: i32, %arg1: i32) -> (i32, i32, i32) {
    %c0_i32 = arith.constant 0 : i32
    %c0_i32_0 = arith.constant 0 : i32
    %c0_i32_1 = arith.constant 0 : i32
    return %arg0, %c0_i32, %c0_i32_0 : i32, i32, i32
  }
  func.func @transform_3(%arg0: i32, %arg1: i32) -> (i32, i32) {
    %c0_i32 = arith.constant 0 : i32
    %c0_i32_0 = arith.constant 0 : i32
    %c0_i32_1 = arith.constant 0 : i32
    return %c0_i32, %c0_i32_0 : i32, i32
  }
  func.func @transform_4(%arg0: i32, %arg1: i32) -> (i32, i32) {
    %c0_i32 = arith.constant 0 : i32
    %c0_i32_0 = arith.constant 0 : i32
    %c0_i32_1 = arith.constant 0 : i32
    return %c0_i32, %c0_i32_0 : i32, i32
  }
  func.func @transform_5(%arg0: i32, %arg1: i32) -> (i32, i32) {
    %c0_i32 = arith.constant 0 : i32
    %c0_i32_0 = arith.constant 0 : i32
    %c0_i32_1 = arith.constant 0 : i32
    return %c0_i32, %c0_i32_0 : i32, i32
  }
  func.func @transform_6(%arg0: i32, %arg1: i32) -> (i32, i32) {
    %c0_i32 = arith.constant 0 : i32
    %c0_i32_0 = arith.constant 0 : i32
    %c0_i32_1 = arith.constant 0 : i32
    return %c0_i32, %c0_i32_0 : i32, i32
  }
  func.func @transform_7(%arg0: i32, %arg1: i32) -> (i32, i32) {
    %c0_i32 = arith.constant 0 : i32
    %c0_i32_0 = arith.constant 0 : i32
    %c0_i32_1 = arith.constant 0 : i32
    return %c0_i32, %c0_i32_0 : i32, i32
  }
  func.func @transform_8(%arg0: i32, %arg1: i32) -> (i32, i32) {
    %c0_i32 = arith.constant 0 : i32
    %c0_i32_0 = arith.constant 0 : i32
    %c0_i32_1 = arith.constant 0 : i32
    return %c0_i32, %c0_i32_0 : i32, i32
  }
  func.func @transform_9(%arg0: i32, %arg1: i32) -> (i32, i32) {
    %c0_i32 = arith.constant 0 : i32
    %c0_i32_0 = arith.constant 0 : i32
    %c0_i32_1 = arith.constant 0 : i32
    return %c0_i32, %c0_i32_0 : i32, i32
  }
  func.func @transform_10(%arg0: i32, %arg1: i32) -> (i32, i32) {
    %c0_i32 = arith.constant 0 : i32
    %c0_i32_0 = arith.constant 0 : i32
    %c0_i32_1 = arith.constant 0 : i32
    return %c0_i32, %c0_i32_0 : i32, i32
  }
  func.func @transform_11(%arg0: i32, %arg1: i32) -> (i32, i32) {
    %c0_i32 = arith.constant 0 : i32
    %c0_i32_0 = arith.constant 0 : i32
    %c0_i32_1 = arith.constant 0 : i32
    return %c0_i32, %c0_i32_0 : i32, i32
  }
  func.func @transform_12(%arg0: i32, %arg1: i32) -> (i32, i32) {
    %c0_i32 = arith.constant 0 : i32
    %c0_i32_0 = arith.constant 0 : i32
    %c0_i32_1 = arith.constant 0 : i32
    return %c0_i32, %c0_i32_0 : i32, i32
  }
  func.func @transform_13(%arg0: i32, %arg1: i32) -> (i32, i32) {
    %c0_i32 = arith.constant 0 : i32
    %c0_i32_0 = arith.constant 0 : i32
    %c0_i32_1 = arith.constant 0 : i32
    return %c0_i32, %c0_i32_0 : i32, i32
  }
  func.func @transform_14(%arg0: i32, %arg1: i32) -> (i32, i32) {
    %c0_i32 = arith.constant 0 : i32
    %c0_i32_0 = arith.constant 0 : i32
    %c0_i32_1 = arith.constant 0 : i32
    return %c0_i32, %c0_i32_0 : i32, i32
  }
  func.func @transform_15(%arg0: i32, %arg1: i32) -> (i32, i32) {
    %c0_i32 = arith.constant 0 : i32
    %c0_i32_0 = arith.constant 0 : i32
    %c0_i32_1 = arith.constant 0 : i32
    return %c0_i32, %c0_i32_0 : i32, i32
  }
  func.func @transform_16(%arg0: i32, %arg1: i32) -> (i32, i32) {
    %c0_i32 = arith.constant 0 : i32
    %c0_i32_0 = arith.constant 0 : i32
    %c0_i32_1 = arith.constant 0 : i32
    return %c0_i32, %c0_i32_0 : i32, i32
  }
  func.func @transform_17(%arg0: i32, %arg1: i32) -> (i32, i32) {
    %c0_i32 = arith.constant 0 : i32
    %c0_i32_0 = arith.constant 0 : i32
    %c0_i32_1 = arith.constant 0 : i32
    return %c0_i32, %c0_i32_0 : i32, i32
  }
  func.func @transform_18(%arg0: i32, %arg1: i32) -> (i32, i32) {
    %c0_i32 = arith.constant 0 : i32
    %c0_i32_0 = arith.constant 0 : i32
    %c0_i32_1 = arith.constant 0 : i32
    return %c0_i32, %c0_i32_0 : i32, i32
  }
  func.func @transform_19(%arg0: i32, %arg1: i32) -> (i32, i32) {
    %c0_i32 = arith.constant 0 : i32
    %c0_i32_0 = arith.constant 0 : i32
    %c0_i32_1 = arith.constant 0 : i32
    return %c0_i32, %c0_i32_0 : i32, i32
  }
  func.func @transform_20(%arg0: i32, %arg1: i32) -> (i32, i32) {
    %c0_i32 = arith.constant 0 : i32
    %c0_i32_0 = arith.constant 0 : i32
    %c0_i32_1 = arith.constant 0 : i32
    return %c0_i32, %c0_i32_0 : i32, i32
  }
  func.func @transform_21(%arg0: i32, %arg1: i32) -> (i32, i32) {
    %c0_i32 = arith.constant 0 : i32
    %c0_i32_0 = arith.constant 0 : i32
    %c0_i32_1 = arith.constant 0 : i32
    return %c0_i32, %c0_i32_0 : i32, i32
  }
  func.func @transform_22(%arg0: i32, %arg1: i32) -> (i32, i32) {
    %c0_i32 = arith.constant 0 : i32
    %c0_i32_0 = arith.constant 0 : i32
    %c0_i32_1 = arith.constant 0 : i32
    return %c0_i32, %c0_i32_0 : i32, i32
  }
  func.func @transform_23(%arg0: i32, %arg1: i32) -> (i32, i32) {
    %c0_i32 = arith.constant 0 : i32
    %c0_i32_0 = arith.constant 0 : i32
    %c0_i32_1 = arith.constant 0 : i32
    return %c0_i32, %c0_i32_0 : i32, i32
  }
  func.func @transform_24(%arg0: i32, %arg1: i32) -> (i32, i32) {
    %c0_i32 = arith.constant 0 : i32
    %c0_i32_0 = arith.constant 0 : i32
    %c0_i32_1 = arith.constant 0 : i32
    return %c0_i32, %c0_i32_0 : i32, i32
  }
  func.func @transform_25(%arg0: i32, %arg1: i32) -> (i32, i32, i32) {
    %c0_i32 = arith.constant 0 : i32
    %c0_i32_0 = arith.constant 0 : i32
    return %arg0, %arg1, %c0_i32 : i32, i32, i32
  }
  func.func @transform_26(%arg0: i32, %arg1: i32) -> (i32, i32, i32) {
    %c0_i32 = arith.constant 0 : i32
    %c0_i32_0 = arith.constant 0 : i32
    return %arg0, %arg1, %c0_i32 : i32, i32, i32
  }
  func.func @transform_27(%arg0: i32, %arg1: i32) -> (i32, i32, i32) {
    %c0_i32 = arith.constant 0 : i32
    %c0_i32_0 = arith.constant 0 : i32
    return %arg0, %arg1, %c0_i32 : i32, i32, i32
  }
}

</mosaic_0001>

<bundles_post_ra>
// kernel: tpu_custom_call.1
= control target key start
LH: loop header
LB: loop body
LE: loop exit
PB: predicated region body
PF: predicated region fallthrough
CT: control target
= control target key end

     0   :  { %s5156_s0 = inlined_call_operand.hbm [shape: f32[2,8,128], index: 0, kind: input, shape index: {}]   ;;  %s5157_s1 = inlined_call_operand.hbm [shape: f32[2,8,128], index: 1, kind: input, shape index: {}]   ;;  %s5158_s2 = inlined_call_operand.hbm [shape: f32[2,16,128], index: 2, kind: input, shape index: {}]   ;;  %s5159_s3 = inlined_call_operand.hbm [shape: f32[1,128], index: 3, kind: input, shape index: {}]   ;;  %s5160_s4 = inlined_call_operand.hbm [shape: f32[1,128], index: 4, kind: input, shape index: {}]   ;;  %s5161_s5 = inlined_call_operand.hbm [shape: bf16[128,128], index: 5, kind: input, shape index: {}]   ;;  %s5162_s6 = inlined_call_operand.hbm [shape: f32[1,128], index: 6, kind: input, shape index: {}]   ;;  %s5163_s7 = inlined_call_operand.hbm [shape: bf16[128,256], index: 7, kind: input, shape index: {}]   ;;  %s5164_s8 = inlined_call_operand.vmem [shape: f32[1,256], index: 8, kind: input, shape index: {}]   ;;  %s5165_s9 = inlined_call_operand.hbm [shape: bf16[128,128], index: 9, kind: input, shape index: {}]   ;;  %s5166_s10 = inlined_call_operand.vmem [shape: f32[1,128], index: 10, kind: input, shape index: {}]   ;;  %s5167_s11 = inlined_call_operand.vmem [shape: f32[1,128], index: 11, kind: input, shape index: {}]   ;;  %s5168_s12 = inlined_call_operand.vmem [shape: f32[1,128], index: 12, kind: input, shape index: {}]   ;;  %s5169_s13 = inlined_call_operand.hbm [shape: bf16[128,128], index: 13, kind: input, shape index: {}]   ;;  %s5170_s14 = inlined_call_operand.vmem [shape: f32[1,128], index: 14, kind: input, shape index: {}]   ;;  %s5171_s15 = inlined_call_operand.hbm [shape: bf16[128,256], index: 15, kind: input, shape index: {}]   ;;  %s5172_s16 = inlined_call_operand.vmem [shape: f32[1,256], index: 16, kind: input, shape index: {}]   ;;  %s5173_s17 = inlined_call_operand.hbm [shape: bf16[128,128], index: 17, kind: input, shape index: {}]   ;;  %s5174_s18 = inlined_call_operand.vmem [shape: f32[1,128], index: 18, kind: input, shape index: {}]   ;;  %s5175_s19 = inlined_call_operand.vmem [shape: f32[1,128], index: 19, kind: input, shape index: {}]   ;;  %s5176_s20 = inlined_call_operand.vmem [shape: f32[1,128], index: 20, kind: input, shape index: {}]   ;;  %s5177_s21 = inlined_call_operand.hbm [shape: bf16[128,256], index: 21, kind: input, shape index: {}]   ;;  %s5178_s22 = inlined_call_operand.vmem [shape: f32[1,256], index: 22, kind: input, shape index: {}]   ;;  %s5179_s23 = inlined_call_operand.hbm [shape: bf16[256,128], index: 23, kind: input, shape index: {}]   ;;  %s5180_s24 = inlined_call_operand.vmem [shape: f32[1,128], index: 24, kind: input, shape index: {}]   ;;  %s5181_s25 = inlined_call_operand.hbm [shape: f32[2,8,128], index: 25, kind: output, shape index: {0}]   ;;  %s5182_s26 = inlined_call_operand.hbm [shape: f32[2,8,8], index: 26, kind: output, shape index: {1}]   ;;  %s5183_s27 = inlined_call_operand.hbm [shape: f32[2,8,16], index: 27, kind: output, shape index: {2}]  }
   0x1   :  { %5206 = sst [smem:[#allocation47_spill]] %s5156_s0 }
   0x2   :  { %5207 = sst [smem:[#allocation48_spill]] %s5157_s1 }
   0x3   :  { %5208 = sst [smem:[#allocation49_spill]] %s5158_s2 }
   0x4   :  { %5209 = sst [smem:[#allocation50_spill]] %s5159_s3 }
   0x5   :  { %5210 = sst [smem:[#allocation51_spill]] %s5160_s4 }
   0x6   :  { %5211 = sst [smem:[#allocation52_spill]] %s5161_s5 }
   0x7   :  { %5212 = sst [smem:[#allocation53_spill]] %s5162_s6 }
   0x8   :  { %5213 = sst [smem:[#allocation54_spill]] %s5163_s7 }
   0x9   :  { %5214 = sst [smem:[#allocation55_spill]] %s5164_s8 }
   0xa   :  { %5215 = sst [smem:[#allocation56_spill]] %s5165_s9 }
   0xb   :  { %5216 = sst [smem:[#allocation57_spill]] %s5166_s10 }
   0xc   :  { %5217 = sst [smem:[#allocation58_spill]] %s5167_s11 }
   0xd   :  { %5218 = sst [smem:[#allocation59_spill]] %s5169_s13 }
   0xe   :  { %5219 = sst [smem:[#allocation60_spill]] %s5170_s14 }
   0xf   :  { %5220 = sst [smem:[#allocation61_spill]] %s5171_s15 }
  0x10   :  { %5221 = sst [smem:[#allocation62_spill]] %s5173_s17 }
  0x11   :  { %5222 = sst [smem:[#allocation63_spill]] %s5174_s18 }
  0x12   :  { %5223 = sst [smem:[#allocation64_spill]] %s5175_s19 }
  0x13   :  { %5224 = sst [smem:[#allocation65_spill]] %s5176_s20 }
  0x14   :  { %5225 = sst [smem:[#allocation66_spill]] %s5177_s21 }
  0x15   :  { %5226 = sst [smem:[#allocation67_spill]] %s5178_s22 }
  0x16   :  { %5227 = sst [smem:[#allocation68_spill]] %s5179_s23 }
  0x17   :  { %5228 = sst [smem:[#allocation69_spill]] %s5180_s24 }
  0x18   :  { %5229 = sst [smem:[#allocation70_spill]] %s5181_s25 }
  0x19   :  { %5230 = sst [smem:[#allocation71_spill]] %s5182_s26 }
  0x1a   :  { %5231 = sst [smem:[#allocation72_spill]] %s5183_s27 }
  0x1b   :  { %33 = vsyncpa [#allocation3], 0 }
  0x1c   :  { %35 = vsyncpa [#allocation3 + $0x1], 0 }
  0x1d   :  { %36 = vsyncpa [#allocation6], 0 }
  0x1e   :  { %38 = vsyncpa [#allocation6 + $0x1], 0 }
  0x1f   :  { %39 = vsyncpa [#allocation9], 0 }
  0x20   :  { %40 = vsyncpa [#allocation12], 0 }
  0x21   :  { %41 = vsyncpa [#allocation15], 0 }
  0x22   :  { %42 = vsyncpa [#allocation18], 0 }
  0x23   :  { %43 = vsyncpa [#allocation21], 0 }
  0x24   :  { %44 = vsyncpa [#allocation24], 0 }
  0x25   :  { %45 = vsyncpa [#allocation4], 0 }
  0x26   :  { %47 = vsyncpa [#allocation4 + $0x1], 0 }
  0x27   :  { %48 = vsyncpa [#allocation27], 0 }
  0x28   :  { %50 = vsyncpa [#allocation27 + $0x1], 0  ;;  %s4621_s7 = smov 0   ;;  %s4623_s4 = smov 0  }
  0x29   :  { %s4625_s8 = smov 0   ;;  %s4627_s30 = smov 0  }
  0x2a   :  { %s4629_s9 = smov 0   ;;  %s4631_s5 = smov 0  }
  0x2b LB: > { %5232 = sst [smem:[#allocation39_spill]] %s4440_s7  ;;  %s4652_s28 = sadd.s32 4294967295, %s4460_s5   ;;  %s4460_s5 = sphi %s4631_s5, %s56_s5   ;;  %s4456_s9 = sphi %s4629_s9, %s5294_s9   ;;  %s4452_s30 = sphi %s4627_s30, %s5293_s30   ;;  %s4448_s8 = sphi %s4625_s8, %s5289_s8   ;;  %s4444_s4 = sphi %s4623_s4, %s5292_s4   ;;  %s4440_s7 = sphi %s4621_s7, %s5291_s7  }
  0x2c   : > { %5233 = sst [smem:[#allocation40_spill]] %s4448_s8  ;;  %p3065_p0 = scmp.ge.s32.totalorder %s4460_s5, 1 }
  0x2d   : > { %5234 = sst [smem:[#allocation41_spill]] %s4452_s30  ;;  %p91_p1 = scmp.eq.s32.totalorder %s4652_s28, 0 }
  0x2e   : > { %5235 = sst [smem:[#allocation42_spill]] %s4460_s5  ;;  %p699_p2 = scmp.lt.s32.totalorder %s4460_s5, 3 }
  0x2f   : > { %s5236_s29 = sld [smem:[#allocation50_spill]]  ;;  %s4462_s11 = smov [#allocation8]  }
  0x30   : > { %p4660_p3 = pnand %p3065_p0, %p699_p2  ;;  %s713_s2 = sshll.u32 %s4462_s11, 4  ;;  %s714_s2 = int_to_ptr.vmem [resolvable:$true] %s713_s2 }
  0x31   : > { %s5238_s24 = sld [smem:[#allocation52_spill]]  ;;  %s4463_s10 = smov [#allocation11]  }
  0x32   : > { %p3672_p5 = pneg %p4660_p3  ;;  %s5192_s11 = smov 64  }
  0x33   : > { %s5194_s26 = smov 4   ;;  %s5240_s3 = sld [smem:[#allocation54_spill]] }
  0x34   : > { %p4672_p6 = pnand %p3672_p5, %p91_p1  ;;  %s4466_s22 = smov [#allocation14]  }
  0x35   : > { %s711_s1 = sshll.u32 %s5236_s29, 4  ;;  %s736_s29 = sshll.u32 %s4463_s10, 4  ;;  %s712_s1 = int_to_ptr.hbm [resolvable:$true] %s711_s1  ;;  %s737_s29 = int_to_ptr.vmem [resolvable:$true] %s736_s29 }
  0x36   : > { %3675 = dma.hbm_to_vmem [thread:$0]  (!%p4672_p6), %s712_s1, 16, %s714_s2, [#allocation9]  }
  0x37   : > { %s734_s27 = sshll.u32 %s5238_s24, 4  ;;  %s762_s20 = sshll.u32 %s4466_s22, 4  ;;  %s735_s27 = int_to_ptr.hbm [resolvable:$true] %s734_s27  ;;  %s763_s20 = int_to_ptr.vmem [resolvable:$true] %s762_s20 }
  0x38   : > { %3681 = dma.hbm_to_vmem [thread:$0]  (!%p4672_p6), %s735_s27, 1024, %s737_s29, [#allocation12], %s5192_s11, %s5192_s11, %s5194_s26  }
  0x39   : > { %s760_s30 = sshll.u32 %s5240_s3, 4  ;;  %s5241_s13 = sld [smem:[#allocation59_spill]]  ;;  %s761_s30 = int_to_ptr.hbm [resolvable:$true] %s760_s30 }
  0x3a   : > { %s5188_s19 = smov 128   ;;  %s5190_s18 = smov 8  }
  0x3b   : > { %3687 = dma.hbm_to_vmem [thread:$0]  (!%p4672_p6), %s761_s30, 2048, %s763_s20, [#allocation15], %s5188_s19, %s5188_s19, %s5190_s18  }
  0x3c   : > { %s4469_s22 = smov [#allocation17]   ;;  %s5242_s17 = sld [smem:[#allocation62_spill]] }
  0x3d   : > { %s802_s27 = sshll.u32 %s4469_s22, 4  ;;  %s4470_s20 = smov [#allocation20]   ;;  %s803_s27 = int_to_ptr.vmem [resolvable:$true] %s802_s27 }
  0x3e   : > { %s836_s30 = sshll.u32 %s4470_s20, 4  ;;  %s5187_s3 = sadd.s32 4294967294, %s4460_s5   ;;  %s837_s30 = int_to_ptr.vmem [resolvable:$true] %s836_s30 }
  0x3f   : > { %s800_s2 = sshll.u32 %s5241_s13, 4  ;;  %s68_s10 = sadd.s32 1, %s4456_s9  ;;  %s801_s2 = int_to_ptr.hbm [resolvable:$true] %s800_s2 }
  0x40   : > { %3693 = dma.hbm_to_vmem [thread:$0]  (!%p4672_p6), %s801_s2, 1024, %s803_s27, [#allocation18], %s5192_s11, %s5192_s11, %s5194_s26  }
  0x41   : > { %s77_s1 = sadd.s32 1, %s4448_s8  ;;  %p70_p7 = scmp.ge.s32.totalorder %s68_s10, 2 }
  0x42   : > { %s834_s25 = sshll.u32 %s5242_s17, 4  ;;  %p84_p8 = scmp.ne.s32.totalorder %s4448_s8, %s4444_s4  ;;  %s835_s25 = int_to_ptr.hbm [resolvable:$true] %s834_s25 }
  0x43   : > { %3699 = dma.hbm_to_vmem [thread:$0]  (!%p4672_p6), %s835_s25, 1024, %s837_s30, [#allocation21], %s5192_s11, %s5192_s11, %s5194_s26  }
  0x44   : > { %p85_p9 = scmp.eq.s32.totalorder %s4460_s5, 0  ;;  %p90_p10 = scmp.ne.s32.totalorder %s4444_s4, %s4440_s7 }
  0x45   : > { %s5296_s10 = smov (%p70_p7, %s68_s10), 0  ;;  %p630_p13 = scmp.eq.s32.totalorder %s4652_s28, 1 }
  0x46   : > { %5243 = sst [smem:[#allocation43_spill]] %s5296_s10  ;;  %p4717_p11 = por %p85_p9, %p84_p8 }
  0x47   : > { %p4723_p12 = por %p91_p1, %p90_p10  ;;  %s72_s27 = ssub.s32 %s4456_s9, %s5296_s10 }
  0x48   : > { %p75_p0 = scmp.eq.s32.totalorder %s72_s27, 0  ;;  %p636_p2 = scmp.eq.s32.totalorder %s5187_s3, 1 }
  0x49   : > { %p4732_p5 = por %p630_p13, %p84_p8  ;;  %p3737_p7 = scmp.lt.s32.totalorder %s4460_s5, 2 }
  0x4a   : > { %s4738_s24 = scalar_select %p75_p0, %s4448_s8, %s77_s1  }
  0x4b   : > { %s5246_s29 = scalar_select %p4732_p5, 1, 0 }
  0x4c   : > { %5248 = sst [smem:[#allocation45_spill]] %s4738_s24  ;;  %p4740_p9 = por %p636_p2, %p90_p10 }
  0x4d   : > { %5247 = sst [smem:[#allocation44_spill]] %s5246_s29  ;;  %s4745_s20 = sand.u32 1, %s4448_s8  }
  0x4e   : > { %s5249_s25 = scalar_select %p4740_p9, 1, 0 }
  0x4f   : > { %s5202_s30 = sshll.u32 %s4745_s20, 3  ;;  %s5203_s27 = sshll.u32 %s4456_s9, 3 }
  0x50   : > { %5250 = sst [smem:[#allocation46_spill]] %s5249_s25  ;;  %p4751_p4 = pnand %p3737_p7, %p4717_p11 }
  0x51   : > { %s913_s19 = sand.u32 1, %s4460_s5   ;;  %s5252_s11 = sld [smem:[#allocation48_spill]] }
  0x52   : > { %s917_s17 = scalar_lea.vmem [#allocation5], %s5202_s30  ;;  %s4763_s24 = scalar_lea.sflag [#allocation6], %s913_s19 }
  0x53   : > { %s925_s10 = sshll.u32 %s917_s17, 4  ;;  %s3082_s2 = sshll.u32 %s4745_s20, 4  ;;  %s926_s10 = int_to_ptr.vmem [resolvable:$true] %s925_s10 }
  0x54   : > { %s5253_s25 = sld [smem:[#allocation51_spill]]  ;;  %s4772_s18 = scalar_lea.vmem [#allocation7], %s3082_s2 }
  0x55   : > { %s5254_s30 = sld [smem:[#allocation53_spill]]  ;;  %s4473_s19 = smov [#allocation16]  }
  0x56   : > { %s5256_s15 = sld [smem:[#allocation61_spill]]  ;;  %s4474_s1 = smov [#allocation19]  }
  0x57   : > { %s921_s26 = scalar_lea.hbm %s5252_s11, %s5203_s27  ;;  %s4471_s11 = smov [#allocation10]  }
  0x58   : > { %s923_s13 = sshll.u32 %s921_s26, 4  ;;  %s725_s17 = sshll.u32 %s4471_s11, 4  ;;  %s924_s13 = int_to_ptr.hbm [resolvable:$true] %s923_s13  ;;  %s726_s17 = int_to_ptr.vmem [resolvable:$true] %s725_s17 }
  0x59   : > { %3712 = dma.hbm_to_vmem [thread:$0]  (!%p4751_p4), %s924_s13, 128, %s926_s10, %s4763_s24  }
  0x5a   : > { %s723_s7 = sshll.u32 %s5253_s25, 4  ;;  %s4472_s13 = smov [#allocation13]   ;;  %s724_s7 = int_to_ptr.hbm [resolvable:$true] %s723_s7 }
  0x5b   : > { %s749_s27 = sshll.u32 %s5254_s30, 4  ;;  %s751_s8 = sshll.u32 %s4472_s13, 4  ;;  %s750_s27 = int_to_ptr.hbm [resolvable:$true] %s749_s27  ;;  %s752_s8 = int_to_ptr.vmem [resolvable:$true] %s751_s8 }
  0x5c   : > { %3678 = dma.hbm_to_vmem [thread:$0]  (!%p4672_p6), %s724_s7, 16, %s726_s17, [#allocation9]  }
  0x5d   : > { %s5255_s25 = sld [smem:[#allocation56_spill]]  ;;  %s817_s29 = sshll.u32 %s5256_s15, 4  ;;  %s818_s29 = int_to_ptr.hbm [resolvable:$true] %s817_s29 }
  0x5e   : > { %3684 = dma.hbm_to_vmem [thread:$0]  (!%p4672_p6), %s750_s27, 16, %s752_s8, [#allocation12]  }
  0x5f   : > { %s779_s30 = sshll.u32 %s4473_s19, 4  ;;  %s5257_s7 = smov 4   ;;  %s780_s30 = int_to_ptr.vmem [resolvable:$true] %s779_s30 }
  0x60   : > { %s5258_s17 = smov 64   ;;  %s819_s13 = sshll.u32 %s4474_s1, 4  ;;  %s820_s13 = int_to_ptr.vmem [resolvable:$true] %s819_s13 }
  0x61   : > { %s5259_s21 = sld [smem:[#allocation66_spill]]  ;;  %s5260_s8 = smov 8  }
  0x62   : > { %s5261_s10 = smov 128   ;;  %s5262_s23 = sld [smem:[#allocation68_spill]] }
  0x63   : > { %s777_s2 = sshll.u32 %s5255_s25, 4  ;;  %s4475_s19 = smov [#allocation22]   ;;  %s778_s2 = int_to_ptr.hbm [resolvable:$true] %s777_s2 }
  0x64   : > { %3690 = dma.hbm_to_vmem [thread:$0]  (!%p4672_p6), %s778_s2, 1024, %s780_s30, [#allocation15], %s5258_s17, %s5258_s17, %s5257_s7  }
  0x65   : > { %3696 = dma.hbm_to_vmem [thread:$0]  (!%p4672_p6), %s818_s29, 2048, %s820_s13, [#allocation18], %s5261_s10, %s5261_s10, %s5260_s8  }
  0x66   : > { %s859_s30 = sshll.u32 %s4475_s19, 4  ;;  %s4476_s1 = smov [#allocation23]   ;;  %s860_s30 = int_to_ptr.vmem [resolvable:$true] %s859_s30 }
  0x67   : > { %s857_s26 = sshll.u32 %s5259_s21, 4  ;;  %s876_s5 = sshll.u32 %s4476_s1, 4  ;;  %s858_s26 = int_to_ptr.hbm [resolvable:$true] %s857_s26  ;;  %s877_s5 = int_to_ptr.vmem [resolvable:$true] %s876_s5 }
  0x68   : > { %s874_s2 = sshll.u32 %s5262_s23, 4  ;;  %s5263_s29 = sshll.u32 %s4456_s9, 3  ;;  %s875_s2 = int_to_ptr.hbm [resolvable:$true] %s874_s2 }
  0x69   : > { %3702 = dma.hbm_to_vmem [thread:$0]  (!%p4672_p6), %s858_s26, 2048, %s860_s30, [#allocation21], %s5261_s10, %s5261_s10, %s5260_s8  }
  0x6a   : > { %3705 = dma.hbm_to_vmem [thread:$0]  (!%p4672_p6), %s875_s2, 2048, %s877_s5, [#allocation24], %s5258_s17, %s5258_s17, %s5257_s7  }
  0x6b   : > { %s5264_s25 = sld [smem:[#allocation47_spill]]  ;;  %s5265_s19 = sshll.u32 %s4745_s20, 3 }
  0x6c   : > { %s897_s15 = scalar_lea.vmem [#allocation2], %s5265_s19  ;;  %s3519_s26 = sshll.u32 %s4456_s9, 4 }
  0x6d   : > { %s906_s21 = sshll.u32 %s897_s15, 4  ;;  %s894_s30 = scalar_lea.sflag [#allocation3], %s4745_s20  ;;  %s907_s21 = int_to_ptr.vmem [resolvable:$true] %s906_s21 }
  0x6e   : > { %s5266_s0 = sshll.u32 %s4772_s18, 4  ;;  %s5267_s7 = sld [smem:[#allocation49_spill]]  ;;  %s945_s0 = int_to_ptr.vmem [resolvable:$true] %s5266_s0 }
  0x6f   : > { %s4839_s15 = sand.u32 (!%p4660_p3), 1, %s4444_s4  }
  0x70   : > { %s959_s14 = scalar_lea.sflag (!%p4660_p3), [#allocation3], %s4839_s15 }
  0x71   : > { %s902_s11 = scalar_lea.hbm %s5264_s25, %s5263_s29 }
  0x72   : > { %s904_s23 = sshll.u32 %s902_s11, 4  ;;  %956 = sbr.rel (%p4660_p3) target bundleno = 3887 (0xf2f), region = 120  ;;  %s905_s23 = int_to_ptr.hbm [resolvable:$true] %s904_s23 }
  0x73   : > { %3709 = dma.hbm_to_vmem [thread:$0]  (!%p4751_p4), %s905_s23, 128, %s907_s21, %s894_s30  }
  0x74   : > { %s941_s17 = scalar_lea.hbm %s5267_s7, %s3519_s26  ;;  %s4842_s21 = sshll.u32 (!%p4660_p3), %s4839_s15, 3 }
  0x75   : > { %s942_s2 = sshll.u32 %s941_s17, 4  ;;  %s962_s23 = scalar_lea.vmem (!%p4660_p3), [#allocation2], %s4842_s21  ;;  %s943_s2 = int_to_ptr.hbm [resolvable:$true] %s942_s2 }
  0x76   : > { %3715 = dma.hbm_to_vmem [thread:$0]  (!%p4751_p4), %s943_s2, 256, %s945_s0, %s4763_s24, %s5261_s10, %s5261_s10, %s5260_s8  }
  0x77   : > { %4399 = dma.done.wait (%p4723_p12), %s959_s14, 128  }
  0x78   : > { %4401 = vsyncadd (%p4723_p12), %s959_s14, 4294967168  ;;  %s968_s6 = sand.u32 1, %s4652_s28   ;;  %s972_s24 = scalar_lea.vmem [#allocation5], %s4842_s21 }
  0x79   : > { %s969_s3 = scalar_lea.sflag [#allocation6], %s968_s6 }
  0x7a   : > { %4403 = dma.done.wait (%p4723_p12), %s969_s3, 384  }
  0x7b   : > { %4405 = vsyncadd (%p4723_p12), %s969_s3, 4294966912  ;;  %s3088_s20 = sshll.u32 %s4839_s15, 4 }
  0x7c   : > { %s4859_s18 = scalar_lea.vmem [#allocation7], %s3088_s20 }
  0x7d   : > { %4407 = dma.done.wait (%p91_p1), [#allocation9], 32  }
  0x7e   : > { %4409 = vsyncadd (%p91_p1), [#allocation9], 4294967264 }
  0x7f   : > { %4411 = dma.done.wait (%p91_p1), [#allocation12], 1040  }
  0x80   : > { %4413 = vsyncadd (%p91_p1), [#allocation12], 4294966256 }
  0x81   : > { %4415 = dma.done.wait (%p91_p1), [#allocation15], 3072  }
  0x82   : > { %4417 = vsyncadd (%p91_p1), [#allocation15], 4294964224 }
  0x83   : > { %4419 = dma.done.wait (%p91_p1), [#allocation18], 3072  }
  0x84   : > { %4421 = vsyncadd (%p91_p1), [#allocation18], 4294964224 }
  0x85   : > { %4423 = dma.done.wait (%p91_p1), [#allocation21], 3072  }
  0x86   : > { %4425 = vsyncadd (%p91_p1), [#allocation21], 4294964224 }
  0x87   : > { %4427 = dma.done.wait (%p91_p1), [#allocation24], 2048  }
  0x88   : > { %4429 = vsyncadd (%p91_p1), [#allocation24], 4294965248  ;;  %v1131_v0 = vld [vmem:[%s972_s24] sm:$0xff]  ;;  %v4885_v1 = vld [vmem:[%s962_s23] sm:$0xff]  ;;  %v4477_v2 = vmov 128.0   ;;  %s5268_s10 = sld [smem:[#allocation55_spill]] }
  0x89   : > { %1171 = vadd.xlane.f32.xlu0 %v1131_v0  ;;  %3828 = vrcp.f32 %v4477_v2  ;;  %v3193_v5 = vld [vmem:[#allocation14 + $0x70] sm:$0xf]  ;;  %v3543_v6 = vld [vmem:[#allocation14 + $0x74] sm:$0xf0]  ;;  %v3542_v7 = vld [vmem:[#allocation14 + $0x74] sm:$0xf] }
  0x8a   : > { %v3194_v8 = vor.u32 %v3543_v6, %v3193_v5  ;;  %v3195_v9 = vld [vmem:[#allocation14 + $0x78] sm:$0xf0]  ;;  %v3185_v23 = vld [vmem:[#allocation14 + $0x60] sm:$0xf]  ;;  %v3541_v24 = vld [vmem:[#allocation14 + $0x64] sm:$0xf0] }
  0x8b   : > { %v3198_v10 = vor.u32 %v3542_v7, %v3195_v9  ;;  %v3540_v25 = vld [vmem:[#allocation14 + $0x64] sm:$0xf]  ;;  %v3186_v26 = vor.u32 %v3541_v24, %v3185_v23  ;;  %v3187_v27 = vld [vmem:[#allocation14 + $0x68] sm:$0xf0]  ;;  %v3177_v29 = vld [vmem:[#allocation14 + $0x50] sm:$0xf] }
  0x8c   : > { %1378 = vmatpush.bf16.msra.mxu1 %v3194_v8  ;;  %v3190_v28 = vor.u32 %v3540_v25, %v3187_v27  ;;  %v3539_v30 = vld [vmem:[#allocation14 + $0x54] sm:$0xf0]  ;;  %v3538_v31 = vld [vmem:[#allocation14 + $0x54] sm:$0xf]  ;;  %v3179_v34 = vld [vmem:[#allocation14 + $0x58] sm:$0xf0] }
  0x8d   : > { %1391 = vmatpush.bf16.msra.mxu2 %v3198_v10  ;;  %v3527_v32 = vld [vmem:[#allocation11 + $0x38] sm:$0xff]  ;;  %v3178_v33 = vor.u32 %v3539_v30, %v3177_v29  ;;  %v3182_v35 = vor.u32 %v3538_v31, %v3179_v34  ;;  %v3169_v36 = vld [vmem:[#allocation14 + $0x40] sm:$0xf]  ;;  %v3537_v37 = vld [vmem:[#allocation14 + $0x44] sm:$0xf0]  ;;  %vm1408_vm7 = vcmask 261120  }
  0x8e   : > { %1262 = vmatpush.bf16.msra.mxu0 %v3527_v32  ;;  %v3536_v38 = vld [vmem:[#allocation14 + $0x44] sm:$0xf]  ;;  %v3526_v39 = vld [vmem:[#allocation11 + $0x30] sm:$0xff]  ;;  %v3170_v40 = vor.u32 %v3537_v37, %v3169_v36  ;;  %v3535_v44 = vld [vmem:[#allocation14 + $0x34] sm:$0xf0]  ;;  %s4478_s5 = smov 96  }
  0x8f   : > { %v3829_v3 = vpop.eup %3828  ;;  %v3171_v41 = vld [vmem:[#allocation14 + $0x48] sm:$0xf0]  ;;  %v3161_v43 = vld [vmem:[#allocation14 + $0x30] sm:$0xf]  ;;  %v3534_v45 = vld [vmem:[#allocation14 + $0x34] sm:$0xf] }
  0x90   : > { %v1139_v4 = vmul.f32 128.0, %v3829_v3  ;;  %vm1143_vm0 = vweird.f32 %v3829_v3  ;;  %1379 = vmatpush.bf16.msra.mxu1 %v3186_v26  ;;  %v3174_v42 = vor.u32 %v3536_v38, %v3171_v41  ;;  %v3525_v46 = vld [vmem:[#allocation11 + $0x28] sm:$0xff]  ;;  %v3162_v47 = vor.u32 %v3535_v44, %v3161_v43  ;;  %v3163_v48 = vld [vmem:[#allocation14 + $0x38] sm:$0xf0]  ;;  %v3153_v50 = vld [vmem:[#allocation14 + $0x20] sm:$0xf] }
  0x91   : > { %1136 = vadd.xlane.f32.xlu0 %v4885_v1  ;;  %1392 = vmatpush.bf16.msra.mxu2 %v3190_v28  ;;  %v3166_v49 = vor.u32 %v3534_v45, %v3163_v48  ;;  %v3533_v51 = vld [vmem:[#allocation14 + $0x24] sm:$0xf0]  ;;  %v3532_v52 = vld [vmem:[#allocation14 + $0x24] sm:$0xf]  ;;  %v3155_v55 = vld [vmem:[#allocation14 + $0x28] sm:$0xf0] }
  0x92   : > { %v1140_v11 = vsub.f32 1.0, %v1139_v4  ;;  %1263 = vmatpush.bf16.msra.mxu0 %v3526_v39  ;;  %v3524_v53 = vld [vmem:[#allocation11 + $0x20] sm:$0xff]  ;;  %v3154_v54 = vor.u32 %v3533_v51, %v3153_v50  ;;  %v3158_v56 = vor.u32 %v3532_v52, %v3155_v55  ;;  %v3145_v57 = vld [vmem:[#allocation14 + $0x10] sm:$0xf]  ;;  %v3531_v58 = vld [vmem:[#allocation14 + $0x14] sm:$0xf0] }
  0x93   : > { %v3530_v59 = vld [vmem:[#allocation14 + $0x14] sm:$0xf]  ;;  %v3146_v61 = vor.u32 %v3531_v58, %v3145_v57  ;;  %v3147_v62 = vld [vmem:[#allocation14 + $0x18] sm:$0xf0]  ;;  %v3529_v2 = vld [vmem:[#allocation14 + $0x4] sm:$0xf0] }
  0x94   : > { %v1141_v12 = vmul.f32 %v3829_v3, %v1140_v11  ;;  %1380 = vmatpush.bf16.msra.mxu1 %v3178_v33  ;;  %v3523_v60 = vld [vmem:[#allocation11 + $0x18] sm:$0xff]  ;;  %v3150_v63 = vor.u32 %v3530_v59, %v3147_v62  ;;  %v3522_v4 = vld [vmem:[#allocation11 + $0x10] sm:$0xff]  ;;  %v3521_v8 = vld [vmem:[#allocation11 + $0x8] sm:$0xff]  ;;  %vm1446_vm8 = vcmask 1043456   ;;  %s4479_s29 = smov 64   ;;  %vm1429_vm9 = vcmask 64512  }
  0x95   : > { %1393 = vmatpush.bf16.msra.mxu2 %v3182_v35  ;;  %v3139_v6 = vld [vmem:[#allocation14 + $0x8] sm:$0xf0]  ;;  %v3520_v10 = vld [vmem:[#allocation11] sm:$0xff]  ;;  %v3817_v27 = vld [vmem:[#allocation8] ss:$0 sm:$0xff]  ;;  %s4480_s13 = smov 32  }
  0x96   : > { %v1142_v13 = vadd.f32 %v3829_v3, %v1141_v12  ;;  %1264 = vmatpush.bf16.msra.mxu0 %v3525_v46  ;;  %v3818_v30 = vld [vmem:[#allocation10] ss:$0 sm:$0xff]  ;;  %s1121_s27 = scalar_lea.vmem [#allocation26], %s4842_s21  ;;  %s5269_s19 = sld [smem:[#allocation57_spill]]  ;;  %vm2047_vm13 = vcmask 130048  }
  0x97   : > { %s5270_s0 = sld [smem:[#allocation58_spill]]  ;;  %s1128_s24 = scalar_lea.vmem [#allocation28], %s4842_s21 }
  0x98   : > { %v4888_v14 = vsel %vm1143_vm0, %v3829_v3, %v1142_v13  ;;  %1381 = vmatpush.bf16.msra.mxu1 %v3170_v40  ;;  %v3528_v3 = vld [vmem:[#allocation14 + $0x4] sm:$0xf]  ;;  %s5271_s3 = sld [smem:[#allocation60_spill]]  ;;  %s2752_s23 = sshll.u32 %s1121_s27, 4  ;;  %s2753_s23 = int_to_ptr.vmem [resolvable:$true] %s2752_s23 }
  0x99   : > { %1394 = vmatpush.bf16.msra.mxu2 %v3174_v42  ;;  %v3142_v7 = vor.u32 %v3528_v3, %v3139_v6  ;;  %s5272_s22 = sld [smem:[#allocation63_spill]]  ;;  %s5081_s20 = scalar_lea.sflag [#allocation27], %s968_s6 }
  0x9a   : > { %1265 = vmatpush.bf16.msra.mxu0 %v3524_v53  ;;  %s5274_s25 = sld [smem:[#allocation65_spill]] }
  0x9b   : > { %s5275_s26 = sld [smem:[#allocation67_spill]] }
  0x9c   : > { %1382 = vmatpush.bf16.msra.mxu1 %v3162_v47  ;;  %s5276_s30 = sld [smem:[#allocation41_spill]] }
  0x9d   : > { %1395 = vmatpush.bf16.msra.mxu2 %v3166_v49  ;;  %s5278_s2 = sld [smem:[#allocation71_spill]] }
  0x9e   : > { %1266 = vmatpush.bf16.msra.mxu0 %v3523_v60 }
  0xa0   : > { %1383 = vmatpush.bf16.msra.mxu1 %v3154_v54 }
  0xa1   : > { %1396 = vmatpush.bf16.msra.mxu2 %v3158_v56 }
  0xa2   : > { %1267 = vmatpush.bf16.msra.mxu0 %v3522_v4  ;;  %s5071_s1 = sshll.u32 %s5276_s30, 3 }
  0xa3   : > { %s2750_s14 = scalar_lea.hbm %s5278_s2, %s5071_s1 }
  0xa4   : > { %1384 = vmatpush.bf16.msra.mxu1 %v3146_v61 }
  0xa5   : > { %1397 = vmatpush.bf16.msra.mxu2 %v3150_v63 }
  0xa6   : > { %1268 = vmatpush.bf16.msra.mxu0 %v3521_v8  ;;  %v3544_v8 = vld [vmem:[#allocation16] sm:$0xff] }
  0xa9   : > { %1398 = vmatpush.bf16.msra.mxu2 %v3142_v7  ;;  %v3545_v7 = vld [vmem:[#allocation16 + $0x8] sm:$0xff] }
  0xaa   : > { %1269 = vmatpush.bf16.msra.mxu0 %v3520_v10 }
  0xad   : > { %1583 = vmatpush.bf16.msrb.mxu2 %v3545_v7  ;;  %v3549_v7 = vld [vmem:[#allocation16 + $0x28] sm:$0xff] }
  0xb1   : > { %1584 = vmatpush.bf16.msrb.mxu2 %v3544_v8  ;;  %v3548_v8 = vld [vmem:[#allocation16 + $0x20] sm:$0xff] }
  0xfc   : > { %v1172_v15 = vpop.xlane.xlu0 %1171 }
  0xfd   : > { %v1173_v16 = vmul.f32 %v1172_v15, %v4888_v14 }
  0xff   : > { %v4891_v17 = vsub.f32 %v1131_v0, %v1173_v16  ;;  %v3137_v0 = vld [vmem:[#allocation14] sm:$0xf] }
 0x100   : > { %v3138_v5 = vor.u32 %v3529_v2, %v3137_v0 }
 0x101   : > { %v1175_v18 = vmul.f32 %v4891_v17, %v4891_v17 }
 0x102   : > { %1385 = vmatpush.bf16.msra.mxu1 %v3138_v5 }
 0x103   : > { %1176 = vadd.xlane.f32.xlu1 %v1175_v18 }
 0x104   : > { %v1137_v19 = vpop.xlane.xlu0 %1136 }
 0x105   : > { %v1145_v20 = vmul.f32 %v4888_v14, %v1137_v19 }
 0x107   : > { %v4897_v21 = vsub.f32 %v4885_v1, %v1145_v20 }
 0x109   : > { %v1147_v22 = vmul.f32 %v4897_v21, %v4897_v21 }
 0x10b   : > { %1148 = vadd.xlane.f32.xlu1 %v1147_v22 }
 0x176   : > { %v1177_v9 = vpop.xlane.xlu1 %1176 }
 0x177   : > { %v1178_v11 = vmul.f32 %v1177_v9, %v4888_v14 }
 0x179   : > { %v1179_v12 = vadd.f32 1e-05, %v1178_v11 }
 0x17b   : > { %3830 = vrsqrt.f32 %v1179_v12  ;;  %vm1186_vm2 = vweird.f32 %v1179_v12 }
 0x17e   : > { %v1149_v13 = vpop.xlane.xlu1 %1148 }
 0x17f   : > { %v1150_v15 = vmul.f32 %v1149_v13, %v4888_v14 }
 0x181   : > { %v3831_v16 = vpop.eup %3830  ;;  %v1151_v18 = vadd.f32 1e-05, %v1150_v15 }
 0x182   : > { %v1181_v19 = vmul.f32 %v3831_v16, %v1179_v12  ;;  %vm1187_vm1 = vweird.f32 %v3831_v16 }
 0x183   : > { %3832 = vrsqrt.f32 %v1151_v18  ;;  %vm1188_vm3 = vmor %vm1186_vm2, %vm1187_vm1  ;;  %vm1158_vm5 = vweird.f32 %v1151_v18 }
 0x184   : > { %v1182_v20 = vmul.f32 %v3831_v16, %v1181_v19 }
 0x186   : > { %v1183_v22 = vmul.f32 0.5, %v1182_v20 }
 0x188   : > { %v1184_v23 = vsub.f32 1.5, %v1183_v22 }
 0x189   : > { %v3833_v24 = vpop.eup %3832 }
 0x18a   : > { %v1185_v25 = vmul.f32 %v3831_v16, %v1184_v23  ;;  %v1153_v26 = vmul.f32 %v3833_v24, %v1151_v18  ;;  %vm1159_vm4 = vweird.f32 %v3833_v24 }
 0x18b   : > { %vm1160_vm6 = vmor %vm1158_vm5, %vm1159_vm4 }
 0x18c   : > { %v1154_v28 = vmul.f32 %v3833_v24, %v1153_v26  ;;  %v1189_v29 = vsel %vm1188_vm3, %v3831_v16, %v1185_v25 }
 0x18d   : > { %v1190_v31 = vmul.f32 %v1189_v29, %v4891_v17  ;;  %v1292_v17 = vld [vmem:[%s5268_s10] sm:$0x3] }
 0x18e   : > { %v1155_v32 = vmul.f32 0.5, %v1154_v28  ;;  %v1294_v43 = vperm.slane %v1292_v17, 0  ;;  %v1295_v47 = vperm.slane %v1292_v17, 1 }
 0x18f   : > { %v1191_v33 = vmul.f32 %v3817_v27, %v1190_v31 }
 0x190   : > { %v1156_v34 = vsub.f32 1.5, %v1155_v32 }
 0x191   : > { %v1192_v35 = vadd.f32 %v3818_v30, %v1191_v33 }
 0x192   : > { %v1157_v36 = vmul.f32 %v3833_v24, %v1156_v34 }
 0x193   : > { %v1275_v37 = vpack.c.bf16 %v1192_v35, %v1192_v35 }
 0x194   : > { %v1161_v38 = vsel %vm1160_vm6, %v3833_v24, %v1157_v36 }
 0x195   : > { %1386 = vmatmul.bf16.vlgmr.msra.gmra.mxu1 %v1275_v37  ;;  %1399 = vmatmul.bf16.vlgmr.msra.gmra.mxu2 %v1275_v37  ;;  %v1162_v39 = vmul.f32 %v1161_v38, %v4897_v21  ;;  %v3819_v21 = vld [vmem:[#allocation13] ss:$0 sm:$0xff] }
 0x197   : > { %v1166_v40 = vmul.f32 %v3817_v27, %v1162_v39 }
 0x199   : > { %v1170_v41 = vadd.f32 %v3818_v30, %v1166_v40 }
 0x19b   : > { %v1193_v42 = vpack.c.bf16 %v1170_v41, %v1170_v41 }
 0x19d   : > { %1270 = vmatmul.bf16.vlgmr.msra.gmra.mxu0 %v1193_v42 }
 0x212   : > { %v1387_v44 = vpop.f32.mrf.mxu1 }
 0x213   : > { %v1388_v45 = vadd.f32 %v1387_v44, %v1294_v43 }
 0x215   : > { %v1406_v46 = vpack.c.bf16 %v1388_v45, %v1388_v45 }
 0x217   : > { %1472 = vrot.lane.b32.xlu0 %v1406_v46, %s4478_s5  ;;  %v1413_v48 = vsel %vm1408_vm7, %v1406_v46, 0 }
 0x218   : > { %v1400_v49 = vpop.f32.mrf.mxu2  ;;  %1422 = vmatpush.bf16.xpose.msra.mxu3 %v1413_v48 }
 0x219   : > { %v1401_v50 = vadd.f32 %v1400_v49, %v1295_v47 }
 0x21a   : > { %v1271_v51 = vpop.f32.mrf.mxu0  ;;  %v1389_v52 = vpop.f32.mrf.mxu1 }
 0x21b   : > { %v4910_v53 = vpack.c.bf16 %v1401_v50, %v1401_v50  ;;  %v1272_v54 = vadd.f32 %v3819_v21, %v1271_v51 }
 0x21d   : > { %v1405_v55 = vpack.c.bf16 %v1272_v54, %v1272_v54  ;;  %v1448_v56 = vsel %vm1446_vm8, %v4910_v53, 0 }
 0x21f   : > { %1592 = vrot.lane.b32.xlu0 %v1406_v46, %s4479_s29  ;;  %1469 = vrot.lane.b32.xlu1 %v1405_v55, %s4478_s5 }
 0x220   : > { %1457 = vmatpush.bf16.msrb.mxu3 %v1448_v56  ;;  %v1402_v57 = vpop.f32.mrf.mxu2 }
 0x221   : > { %3199 = vmatmul.msk.bf16.vlgmr.msra.gmra.mxu3 %vm1408_vm7, %v1405_v55 }
 0x222   : > { %v1273_v58 = vpop.f32.mrf.mxu0 }
 0x227   : > { %1590 = vrot.lane.b32.xlu1 %v1405_v55, %s4479_s29 }
 0x289   : > { %v1473_v59 = vpop.permute.xlu0 %1472 }
 0x28a   : > { %v1478_v60 = vsel %vm1408_vm7, %v1473_v59, 0 }
 0x28b   : > { %1487 = vmatpush.bf16.xpose.msra.mxu3 %v1478_v60 }
 0x291   : > { %v1593_v13 = vpop.permute.xlu0 %1592  ;;  %v1470_v19 = vpop.permute.xlu1 %1469 }
 0x292   : > { %v1598_v18 = vsel %vm1408_vm7, %v1593_v13, 0 }
 0x299   : > { %v1591_v20 = vpop.permute.xlu1 %1590 }
 0x2a4   : > { %v1424_v61 = vpop.f32.mrf.mxu3 }
 0x2a5   : > { %v1428_v62 = vmul.f32 0.17677669, %v1424_v61 }
 0x2a7   : > { %v1430_v63 = vsel %vm1429_vm9, %v1428_v62, -inf }
 0x2a8   : > { %1431 = vmax.xlane.f32.xlu2 %v1430_v63 }
 0x2ac   : > { %v1426_v0 = vpop.f32.mrf.mxu3 }
 0x31b   : > { %v1432_v2 = vpop.xlane.xlu2 %1431 }
 0x31c   : > { %v1433_v3 = vsub.f32 %v1428_v62, %v1432_v2 }
 0x31e   : > { %v1434_v4 = vmul.f32 1.442695, %v1433_v3 }
 0x320   : > { %3834 = vpow2.f32 %v1434_v4 }
 0x326   : > { %v3835_v5 = vpop.eup %3834 }
 0x327   : > { %v1436_v6 = vsel %vm1429_vm9, %v3835_v5, 0.0 }
 0x328   : > { %1437 = vadd.xlane.f32.xlu2 %v1436_v6  ;;  %v3546_v6 = vld [vmem:[#allocation16 + $0x10] sm:$0xff] }
 0x340   : > { %1684 = vrot.lane.b32.xlu2 %v1406_v46, %s4480_s13 }
 0x348   : > { %1682 = vrot.lane.b32.xlu2 %v1405_v55, %s4480_s13 }
 0x39b   : > { %v1438_v9 = vpop.xlane.xlu2 %1437 }
 0x39c   : > { %3836 = vrcp.f32 %v1438_v9 }
 0x3a2   : > { %v3837_v10 = vpop.eup %3836 }
 0x3a3   : > { %v4923_v11 = vmul.f32 %v3837_v10, %v3835_v5  ;;  %v1685_v12 = vpop.permute.xlu2 %1684  ;;  %v3547_v5 = vld [vmem:[#allocation16 + $0x18] sm:$0xff] }
 0x3a4   : > { %v1690_v15 = vsel %vm1408_vm7, %v1685_v12, 0  ;;  %1555 = vmatpush.bf16.msrb.mxu1 %v3547_v5 }
 0x3a5   : > { %1699 = vmatpush.bf16.xpose.msra.mxu2 %v1690_v15  ;;  %v1442_v16 = vpack.c.bf16 %v4923_v11, %v4923_v11 }
 0x3a7   : > { %3200 = vmatmul.msk.bf16.vlgmr.msrb.gmra.mxu3 %vm1429_vm9, %v1442_v16 }
 0x3a8   : > { %1607 = vmatpush.bf16.xpose.msrb.mxu3 %v1598_v18  ;;  %1556 = vmatpush.bf16.msrb.mxu1 %v3546_v6  ;;  %v1132_v6 = vld [vmem:[%s4859_s18] sm:$0xff] }
 0x3ab   : > { %v1683_v27 = vpop.permute.xlu2 %1682 }
 0x3ac   : > { %1674 = vmatpush.bf16.msra.mxu1 %v3549_v7  ;;  %v1133_v7 = vld [vmem:[%s4859_s18 + $0x8] sm:$0xff] }
 0x3b0   : > { %1675 = vmatpush.bf16.msra.mxu1 %v3548_v8  ;;  %v4974_v8 = vpack.c.bf16 %v1133_v7, %v1132_v6  ;;  %v3287_v6 = vld [vmem:[#allocation19 + $0x18] sm:$0xf0] }
 0x3b7   : > { %3201 = vmatmul.msk.bf16.vlgmr.msra.gmra.mxu3 %vm1408_vm7, %v1470_v19 }
 0x3c7   : > { %3221 = vmatmul.msk.bf16.vlgmr.msrb.gmra.mxu3 %vm1408_vm7, %v1591_v20 }
 0x42a   : > { %v1459_v22 = vpop.f32.mrf.mxu3 }
 0x42b   : > { %v1463_v23 = vpack.c.bf16 %v1459_v22, %v1459_v22 }
 0x42d   : > { %3220 = vmatmul.msk.bf16.vlgmr.msrb.gmra.mxu2 %vm1408_vm7, %v1463_v23 }
 0x432   : > { %v1461_v24 = vpop.f32.mrf.mxu3 }
 0x43a   : > { %v1489_v25 = vpop.f32.mrf.mxu3 }
 0x43b   : > { %v1493_v26 = vmul.f32 0.17677669, %v1489_v25  ;;  %v3551_v25 = vld [vmem:[#allocation16 + $0x38] sm:$0xff] }
 0x43d   : > { %3232 = vmatmul.msk.bf16.vlgmr.msra.gmra.mxu2 %vm1408_vm7, %v1683_v27  ;;  %v1494_v28 = vsel %vm1429_vm9, %v1493_v26, -inf }
 0x43e   : > { %1495 = vmax.xlane.f32.xlu0 %v1494_v28 }
 0x442   : > { %v1491_v29 = vpop.f32.mrf.mxu3 }
 0x44a   : > { %v1609_v30 = vpop.f32.mrf.mxu3 }
 0x44b   : > { %v1613_v31 = vmul.f32 0.17677669, %v1609_v30 }
 0x44d   : > { %v1614_v32 = vsel %vm1429_vm9, %v1613_v31, -inf }
 0x44e   : > { %1615 = vmax.xlane.f32.xlu1 %v1614_v32 }
 0x452   : > { %v1611_v33 = vpop.f32.mrf.mxu3 }
 0x4b0   : > { %v4936_v34 = vpop.f32.mrf.mxu2 }
 0x4b1   : > { %v1496_v35 = vpop.xlane.xlu0 %1495 }
 0x4b2   : > { %v1497_v36 = vsub.f32 %v1493_v26, %v1496_v35  ;;  %v3550_v26 = vld [vmem:[#allocation16 + $0x30] sm:$0xff] }
 0x4b4   : > { %v1498_v37 = vmul.f32 1.442695, %v1497_v36 }
 0x4b6   : > { %3838 = vpow2.f32 %v1498_v37  ;;  %v3820_v37 = vld [vmem:[%s5269_s19] ss:$0 sm:$0xff] }
 0x4b8   : > { %v1588_v38 = vpop.f32.mrf.mxu2 }
 0x4bc   : > { %v3839_v39 = vpop.eup %3838 }
 0x4bd   : > { %v1500_v40 = vsel %vm1429_vm9, %v3839_v39, 0.0 }
 0x4be   : > { %1501 = vadd.xlane.f32.xlu0 %v1500_v40 }
 0x4c0   : > { %v1701_v41 = vpop.f32.mrf.mxu2 }
 0x4c1   : > { %v1705_v42 = vmul.f32 0.17677669, %v1701_v41  ;;  %v1616_v17 = vpop.xlane.xlu1 %1615 }
 0x4c2   : > { %v1617_v43 = vsub.f32 %v1613_v31, %v1616_v17  ;;  %v3575_v17 = vld [vmem:[#allocation19 + $0x74] sm:$0xf0] }
 0x4c3   : > { %v1706_v44 = vsel %vm1429_vm9, %v1705_v42, -inf }
 0x4c4   : > { %v1618_v45 = vmul.f32 1.442695, %v1617_v43  ;;  %1707 = vmax.xlane.f32.xlu2 %v1706_v44  ;;  %v3325_v43 = vld [vmem:[#allocation19 + $0x60] sm:$0xf] }
 0x4c6   : > { %3840 = vpow2.f32 %v1618_v45  ;;  %v3573_v45 = vld [vmem:[#allocation19 + $0x64] sm:$0xf0] }
 0x4c8   : > { %v1703_v46 = vpop.f32.mrf.mxu2 }
 0x4c9   : > { %v3326_v46 = vor.u32 %v3573_v45, %v3325_v43 }
 0x4cc   : > { %v3841_v47 = vpop.eup %3840 }
 0x4cd   : > { %v1620_v48 = vsel %vm1429_vm9, %v3841_v47, 0.0 }
 0x4ce   : > { %1621 = vadd.xlane.f32.xlu0 %v1620_v48  ;;  %v3571_v48 = vld [vmem:[#allocation19 + $0x54] sm:$0xf0] }
 0x4dc   : > { %1508 = vrot.lane.b32.xlu2 %v4910_v53, %s4478_s5 }
 0x4e2   : > { %1627 = vrot.lane.b32.xlu0 %v4910_v53, %s4479_s29 }
 0x531   : > { %v1502_v21 = vpop.xlane.xlu0 %1501 }
 0x532   : > { %3842 = vrcp.f32 %v1502_v21  ;;  %v3559_v21 = vld [vmem:[#allocation17 + $0x38] sm:$0xff] }
 0x537   : > { %v1708_v49 = vpop.xlane.xlu2 %1707 }
 0x538   : > { %v1709_v50 = vsub.f32 %v1705_v42, %v1708_v49  ;;  %v3843_v52 = vpop.eup %3842  ;;  %v3333_v42 = vld [vmem:[#allocation19 + $0x70] sm:$0xf] }
 0x539   : > { %v1504_v54 = vmul.f32 %v3843_v52, %v3839_v39  ;;  %v3334_v44 = vor.u32 %v3575_v17, %v3333_v42  ;;  %v3301_v52 = vld [vmem:[#allocation19 + $0x30] sm:$0xf]  ;;  %v3823_v17 = vld [vmem:[%s5271_s3] ss:$0 sm:$0xff]  ;;  %s2754_s3 = sshll.u32 %s2750_s14, 4  ;;  %s2755_s3 = int_to_ptr.hbm [resolvable:$true] %s2754_s3 }
 0x53a   : > { %v1710_v51 = vmul.f32 1.442695, %v1709_v50  ;;  %v3309_v50 = vld [vmem:[#allocation19 + $0x40] sm:$0xf]  ;;  %s4304_s18 = sshra.s32 %s2755_s3, 4  ;;  %s4305_s18 = int_to_ptr.hbm [resolvable:$true] %s4304_s18 }
 0x53b   : > { %v1506_v59 = vpack.c.bf16 %v1504_v54, %v1504_v54  ;;  %v1505_v62 = vadd.f32 %v1504_v54, %v4923_v11  ;;  %1995 = vmatpush.bf16.msrb.mxu2 %v3334_v44  ;;  %v3567_v54 = vld [vmem:[#allocation19 + $0x34] sm:$0xf0]  ;;  %p4311_p6 = scmp.lt.s32.totalorder %s4305_s18, %s5278_s2 }
 0x53c   : > { %3844 = vpow2.f32 %v1710_v51  ;;  %v3569_v51 = vld [vmem:[#allocation19 + $0x44] sm:$0xf0] }
 0x53f   : > { %v1509_v55 = vpop.permute.xlu2 %1508  ;;  %1996 = vmatpush.bf16.msrb.mxu2 %v3326_v46 }
 0x540   : > { %v1514_v56 = vsel %vm1446_vm8, %v1509_v55, 0  ;;  %v3302_v55 = vor.u32 %v3567_v54, %v3301_v52  ;;  %v3327_v52 = vld [vmem:[#allocation19 + $0x68] sm:$0xf0] }
 0x541   : > { %1523 = vmatpush.bf16.msrb.mxu0 %v1514_v56  ;;  %v1622_v57 = vpop.xlane.xlu0 %1621  ;;  %v3293_v56 = vld [vmem:[#allocation19 + $0x20] sm:$0xf] }
 0x542   : > { %v3845_v58 = vpop.eup %3844  ;;  %3846 = vrcp.f32 %v1622_v57  ;;  %v3565_v57 = vld [vmem:[#allocation19 + $0x24] sm:$0xf0] }
 0x543   : > { %v1712_v60 = vsel %vm1429_vm9, %v3845_v58, 0.0 }
 0x544   : > { %1713 = vadd.xlane.f32.xlu1 %v1712_v60  ;;  %3202 = vmatmul.msk.bf16.vlgmr.msrb.gmra.mxu0 %vm1429_vm9, %v1506_v59  ;;  %v3285_v59 = vld [vmem:[#allocation19 + $0x10] sm:$0xf]  ;;  %v3563_v60 = vld [vmem:[#allocation19 + $0x14] sm:$0xf0] }
 0x548   : > { %v3847_v61 = vpop.eup %3846 }
 0x549   : > { %v1624_v63 = vmul.f32 %v3847_v61, %v3841_v47  ;;  %v3317_v47 = vld [vmem:[#allocation19 + $0x50] sm:$0xf]  ;;  %v3286_v61 = vor.u32 %v3563_v60, %v3285_v59  ;;  %v3568_v59 = vld [vmem:[#allocation19 + $0x44] sm:$0xf]  ;;  %v3311_v60 = vld [vmem:[#allocation19 + $0x48] sm:$0xf0] }
 0x54a   : > { %v3318_v49 = vor.u32 %v3571_v48, %v3317_v47 }
 0x54b   : > { %v1625_v0 = vadd.f32 %v1624_v63, %v1505_v62  ;;  %v1626_v4 = vpack.c.bf16 %v1624_v63, %v1624_v63  ;;  %v3277_v62 = vld [vmem:[#allocation19] sm:$0xf]  ;;  %v3561_v63 = vld [vmem:[#allocation19 + $0x4] sm:$0xf0] }
 0x54c   : > { %1997 = vmatpush.bf16.msrb.mxu2 %v3318_v49  ;;  %v3574_v49 = vld [vmem:[#allocation19 + $0x74] sm:$0xf] }
 0x554   : > { %v1628_v2 = vpop.permute.xlu0 %1627 }
 0x555   : > { %v1633_v3 = vsel %vm1446_vm8, %v1628_v2, 0 }
 0x556   : > { %1642 = vmatpush.bf16.msra.mxu0 %v1633_v3  ;;  %v3278_v3 = vor.u32 %v3561_v63, %v3277_v62  ;;  %v3566_v62 = vld [vmem:[#allocation19 + $0x34] sm:$0xf]  ;;  %v3303_v63 = vld [vmem:[#allocation19 + $0x38] sm:$0xf0] }
 0x559   : > { %3222 = vmatmul.msk.bf16.vlgmr.msra.gmra.mxu0 %vm1429_vm9, %v1626_v4 }
 0x55a   : > { %1766 = vmatpush.bf16.msrb.mxu0 %v3551_v25 }
 0x55d   : > { %1719 = vrot.lane.b32.xlu1 %v4910_v53, %s4480_s13 }
 0x55e   : > { %1767 = vmatpush.bf16.msrb.mxu0 %v3550_v26 }
 0x5b7   : > { %v1714_v9 = vpop.xlane.xlu1 %1713 }
 0x5b8   : > { %3848 = vrcp.f32 %v1714_v9  ;;  %v3558_v9 = vld [vmem:[#allocation17 + $0x30] sm:$0xff] }
 0x5be   : > { %v3849_v10 = vpop.eup %3848 }
 0x5bf   : > { %v1716_v11 = vmul.f32 %v3849_v10, %v3845_v58  ;;  %v3294_v58 = vor.u32 %v3565_v57, %v3293_v56  ;;  %v3557_v10 = vld [vmem:[#allocation17 + $0x28] sm:$0xff]  ;;  %v3570_v56 = vld [vmem:[#allocation19 + $0x54] sm:$0xf]  ;;  %v3319_v57 = vld [vmem:[#allocation19 + $0x58] sm:$0xf0] }
 0x5c1   : > { %v1717_v12 = vadd.f32 %v1716_v11, %v1625_v0  ;;  %v1525_v13 = vpop.f32.mrf.mxu0  ;;  %v1718_v20 = vpack.c.bf16 %v1716_v11, %v1716_v11  ;;  %v3556_v11 = vld [vmem:[#allocation17 + $0x20] sm:$0xff] }
 0x5c2   : > { %v1529_v15 = vpack.c.bf16 %v1525_v13, %v1525_v13  ;;  %v3554_v13 = vld [vmem:[#allocation17 + $0x10] sm:$0xff] }
 0x5c3   : > { %v1778_v16 = vmul.f32 0.25, %v1717_v12  ;;  %v3555_v12 = vld [vmem:[#allocation17 + $0x18] sm:$0xff] }
 0x5c4   : > { %3211 = vmatmul.msk.bf16.vlgmr.msrb.gmra.mxu1 %vm1408_vm7, %v1529_v15  ;;  %v3553_v15 = vld [vmem:[#allocation17 + $0x8] sm:$0xff] }
 0x5c5   : > { %2711 = vst.msk [vmem:[%s1121_s27] sm:$0xff] %vm1429_vm9, %v1778_v16  ;;  %1879 = vmatpush.bf16.msrb.mxu1 %v3559_v21  ;;  %v3552_v16 = vld [vmem:[#allocation17] sm:$0xff] }
 0x5c9   : > { %v1527_v53 = vpop.f32.mrf.mxu0  ;;  %1880 = vmatpush.bf16.msrb.mxu1 %v3558_v9  ;;  %v3560_v9 = vld [vmem:[#allocation19 + $0x4] sm:$0xf] }
 0x5cd   : > { %1881 = vmatpush.bf16.msrb.mxu1 %v3557_v10  ;;  %v3279_v10 = vld [vmem:[#allocation19 + $0x8] sm:$0xf0] }
 0x5cf   : > { %v1720_v18 = vpop.permute.xlu1 %1719 }
 0x5d0   : > { %v1725_v19 = vsel %vm1446_vm8, %v1720_v18, 0 }
 0x5d1   : > { %1734 = vmatpush.bf16.msra.mxu3 %v1725_v19  ;;  %1882 = vmatpush.bf16.msrb.mxu1 %v3556_v11  ;;  %v3282_v11 = vor.u32 %v3560_v9, %v3279_v10 }
 0x5d4   : > { %3233 = vmatmul.msk.bf16.vlgmr.msra.gmra.mxu3 %vm1429_vm9, %v1718_v20 }
 0x5d5   : > { %1883 = vmatpush.bf16.msrb.mxu1 %v3555_v12 }
 0x5d6   : > { %v1644_v22 = vpop.f32.mrf.mxu0 }
 0x5d7   : > { %v1648_v23 = vpack.c.bf16 %v1644_v22, %v1644_v22 }
 0x5d9   : > { %3231 = vmatmul.msk.bf16.vlgmr.msra.gmra.mxu1 %vm1408_vm7, %v1648_v23 }
 0x5da   : > { %1884 = vmatpush.bf16.msrb.mxu1 %v3554_v13 }
 0x5de   : > { %v1646_v24 = vpop.f32.mrf.mxu0  ;;  %1885 = vmatpush.bf16.msrb.mxu1 %v3553_v15 }
 0x5e2   : > { %1886 = vmatpush.bf16.msrb.mxu1 %v3552_v16 }
 0x641   : > { %v1558_v27 = vpop.f32.mrf.mxu1 }
 0x642   : > { %v1587_v29 = vadd.f32 %v4936_v34, %v1558_v27  ;;  %v3821_v27 = vld [vmem:[%s5270_s0] ss:$0 sm:$0xff] }
 0x649   : > { %v1560_v28 = vpop.f32.mrf.mxu1 }
 0x656   : > { %v1677_v30 = vpop.f32.mrf.mxu1 }
 0x657   : > { %v1681_v31 = vadd.f32 %v1677_v30, %v1587_v29  ;;  %v1736_v32 = vpop.f32.mrf.mxu3  ;;  %v3822_v30 = vld [vmem:[%s5168_s12] ss:$0 sm:$0xff] }
 0x658   : > { %v1740_v33 = vpack.c.bf16 %v1736_v32, %v1736_v32 }
 0x65a   : > { %3242 = vmatmul.msk.bf16.vlgmr.msrb.gmra.mxu0 %vm1408_vm7, %v1740_v33 }
 0x65e   : > { %v1679_v35 = vpop.f32.mrf.mxu1 }
 0x65f   : > { %v1738_v36 = vpop.f32.mrf.mxu3  ;;  %v4987_v35 = vld [vmem:[%s5172_s16] sm:$0x3] }
 0x6d7   : > { %v1769_v38 = vpop.f32.mrf.mxu0 }
 0x6d8   : > { %v1773_v39 = vadd.f32 %v1769_v38, %v1681_v31 }
 0x6da   : > { %v1777_v40 = vadd.f32 %v3820_v37, %v1773_v39  ;;  %v1911_v37 = vperm.slane %v4987_v35, 0 }
 0x6dc   : > { %v4967_v41 = vadd.f32 %v1777_v40, %v4885_v1  ;;  %v3310_v1 = vor.u32 %v3569_v51, %v3309_v50  ;;  %v3335_v50 = vld [vmem:[#allocation19 + $0x78] sm:$0xf0]  ;;  %v3572_v51 = vld [vmem:[#allocation19 + $0x64] sm:$0xf] }
 0x6de   : > { %1782 = vadd.xlane.f32.xlu2 %v4967_v41  ;;  %1998 = vmatpush.bf16.msrb.mxu2 %v3310_v1  ;;  %v3338_v1 = vor.u32 %v3574_v49, %v3335_v50 }
 0x6df   : > { %v1771_v34 = vpop.f32.mrf.mxu0 }
 0x6e0   : > { %2009 = vmatpush.bf16.msrb.mxu3 %v3338_v1 }
 0x6e2   : > { %1999 = vmatpush.bf16.msrb.mxu2 %v3302_v55  ;;  %v3330_v55 = vor.u32 %v3572_v51, %v3327_v52 }
 0x6e4   : > { %2010 = vmatpush.bf16.msrb.mxu3 %v3330_v55 }
 0x6e6   : > { %2000 = vmatpush.bf16.msrb.mxu2 %v3294_v58  ;;  %v3322_v58 = vor.u32 %v3570_v56, %v3319_v57 }
 0x6e8   : > { %2011 = vmatpush.bf16.msrb.mxu3 %v3322_v58 }
 0x6ea   : > { %2001 = vmatpush.bf16.msrb.mxu2 %v3286_v61  ;;  %v3314_v61 = vor.u32 %v3568_v59, %v3311_v60 }
 0x6ec   : > { %2012 = vmatpush.bf16.msrb.mxu3 %v3314_v61 }
 0x6ee   : > { %2002 = vmatpush.bf16.msrb.mxu2 %v3278_v3  ;;  %v3295_v3 = vld [vmem:[#allocation19 + $0x28] sm:$0xf0] }
 0x6f1   : > { %2003 = vmatmul.bf16.vlgmr.msrb.gmra.mxu2 %v4974_v8 }
 0x751   : > { %v1783_v0 = vpop.xlane.xlu2 %1782 }
 0x752   : > { %v1784_v2 = vmul.f32 %v1783_v0, %v4888_v14  ;;  %v3306_v0 = vor.u32 %v3566_v62, %v3303_v63 }
 0x754   : > { %v1785_v4 = vsub.f32 %v4967_v41, %v1784_v2  ;;  %v3564_v2 = vld [vmem:[#allocation19 + $0x24] sm:$0xf]  ;;  %2013 = vmatpush.bf16.msrb.mxu3 %v3306_v0 }
 0x756   : > { %v1786_v5 = vmul.f32 %v1785_v4, %v1785_v4 }
 0x758   : > { %1787 = vadd.xlane.f32.xlu0 %v1786_v5  ;;  %v3562_v5 = vld [vmem:[#allocation19 + $0x14] sm:$0xf] }
 0x759   : > { %v3290_v7 = vor.u32 %v3562_v5, %v3287_v6 }
 0x774   : > { %v2004_v36 = vpop.f32.mrf.mxu2 }
 0x775   : > { %v2005_v38 = vadd.f32 %v2004_v36, %v1911_v37 }
 0x77c   : > { %v2006_v39 = vpop.f32.mrf.mxu2 }
 0x77d   : > { %v2007_v40 = vadd.f32 %v2006_v39, %v1911_v37 }
 0x77f   : > { %v2025_v34 = vpack.c.bf16 %v2007_v40, %v2005_v38 }
 0x781   : > { %v2031_v42 = vsel %vm1408_vm7, %v2025_v34, 0 }
 0x782   : > { %2040 = vmatpush.bf16.xpose.msra.mxu0 %v2031_v42 }
 0x7cb   : > { %v1788_v53 = vpop.xlane.xlu0 %1787 }
 0x7cc   : > { %v1789_v18 = vmul.f32 %v1788_v53, %v4888_v14 }
 0x7ce   : > { %v1790_v19 = vadd.f32 1e-05, %v1789_v18 }
 0x7d0   : > { %3850 = vrsqrt.f32 %v1790_v19  ;;  %vm1797_vm11 = vweird.f32 %v1790_v19 }
 0x7d6   : > { %v3851_v20 = vpop.eup %3850 }
 0x7d7   : > { %v1792_v22 = vmul.f32 %v3851_v20, %v1790_v19  ;;  %vm1798_vm10 = vweird.f32 %v3851_v20  ;;  %v1912_v19 = vperm.slane %v4987_v35, 1 }
 0x7d8   : > { %vm1799_vm12 = vmor %vm1797_vm11, %vm1798_vm10 }
 0x7d9   : > { %v1793_v23 = vmul.f32 %v3851_v20, %v1792_v22 }
 0x7db   : > { %v1794_v24 = vmul.f32 0.5, %v1793_v23 }
 0x7dd   : > { %v1795_v25 = vsub.f32 1.5, %v1794_v24 }
 0x7df   : > { %v1796_v26 = vmul.f32 %v3851_v20, %v1795_v25  ;;  %v3576_v25 = vld [vmem:[#allocation20] sm:$0xff] }
 0x7e1   : > { %v1800_v28 = vsel %vm1799_vm12, %v3851_v20, %v1796_v26 }
 0x7e2   : > { %v1801_v29 = vmul.f32 %v1800_v28, %v1785_v4  ;;  %v3298_v4 = vor.u32 %v3564_v2, %v3295_v3 }
 0x7e4   : > { %v1805_v31 = vmul.f32 %v3821_v27, %v1801_v29  ;;  %2014 = vmatpush.bf16.msrb.mxu3 %v3298_v4 }
 0x7e6   : > { %v1809_v32 = vadd.f32 %v3822_v30, %v1805_v31 }
 0x7e8   : > { %v1810_v33 = vpack.c.bf16 %v1809_v32, %v1809_v32  ;;  %2015 = vmatpush.bf16.msrb.mxu3 %v3290_v7 }
 0x7ea   : > { %1887 = vmatmul.bf16.vlgmr.msrb.gmra.mxu1 %v1810_v33 }
 0x7ec   : > { %2016 = vmatpush.bf16.msrb.mxu3 %v3282_v11  ;;  %v3579_v11 = vld [vmem:[#allocation20 + $0x18] sm:$0xff] }
 0x7ef   : > { %2017 = vmatmul.bf16.vlgmr.msrb.gmra.mxu3 %v4974_v8  ;;  %v3577_v8 = vld [vmem:[#allocation20 + $0x8] sm:$0xff] }
 0x7f0   : > { %2167 = vmatpush.bf16.msra.mxu3 %v3579_v11  ;;  %v3427_v11 = vld [vmem:[#allocation22 + $0x58] sm:$0xf0] }
 0x867   : > { %v1888_v43 = vpop.f32.mrf.mxu1 }
 0x868   : > { %v1889_v44 = vadd.f32 %v3823_v17, %v1888_v43 }
 0x86a   : > { %v2024_v45 = vpack.c.bf16 %v1889_v44, %v1889_v44 }
 0x86c   : > { %2083 = vrot.lane.b32.xlu0 %v2024_v45, %s4478_s5  ;;  %3339 = vmatmul.msk.bf16.vlgmr.msra.gmra.mxu0 %vm1408_vm7, %v2024_v45 }
 0x86f   : > { %v1890_v46 = vpop.f32.mrf.mxu1 }
 0x872   : > { %v2018_v18 = vpop.f32.mrf.mxu3 }
 0x873   : > { %v2019_v20 = vadd.f32 %v2018_v18, %v1912_v19 }
 0x874   : > { %2202 = vrot.lane.b32.xlu0 %v2024_v45, %s4479_s29 }
 0x87a   : > { %v2020_v22 = vpop.f32.mrf.mxu3 }
 0x87b   : > { %v2021_v23 = vadd.f32 %v2020_v22, %v1912_v19 }
 0x87d   : > { %v5005_v24 = vpack.c.bf16 %v2021_v23, %v2019_v20  ;;  %v3578_v23 = vld [vmem:[#allocation20 + $0x10] sm:$0xff] }
 0x87e   : > { %2168 = vmatpush.bf16.msra.mxu3 %v3578_v23  ;;  %v3590_v23 = vld [vmem:[#allocation22 + $0x34] sm:$0xf] }
 0x87f   : > { %2071 = vmatpush.bf16.msrb.mxu0 %v5005_v24 }
 0x883   : > { %2195 = vmatpush.bf16.msra.mxu0 %v3577_v8  ;;  %v3581_v8 = vld [vmem:[#allocation20 + $0x28] sm:$0xff] }
 0x884   : > { %2284 = vmatpush.bf16.msrb.mxu3 %v3581_v8 }
 0x887   : > { %2196 = vmatpush.bf16.msra.mxu0 %v3576_v25 }
 0x8de   : > { %v2084_v35 = vpop.permute.xlu0 %2083 }
 0x8e6   : > { %v2203_v38 = vpop.permute.xlu0 %2202 }
 0x8e9   : > { %v2042_v47 = vpop.f32.mrf.mxu0 }
 0x8ea   : > { %v2046_v48 = vmul.f32 0.17677669, %v2042_v47 }
 0x8ec   : > { %v2048_v21 = vsel %vm2047_vm13, %v2046_v48, -inf }
 0x8ed   : > { %2049 = vmax.xlane.f32.xlu1 %v2048_v21 }
 0x8f1   : > { %v2044_v54 = vpop.f32.mrf.mxu0 }
 0x906   : > { %2204 = vrot.lane.b32.xlu1 %v2025_v34, %s4479_s29 }
 0x90e   : > { %2292 = vrot.lane.b32.xlu1 %v2024_v45, %s4480_s13 }
 0x960   : > { %v2050_v12 = vpop.xlane.xlu1 %2049 }
 0x961   : > { %v2051_v13 = vsub.f32 %v2046_v48, %v2050_v12 }
 0x963   : > { %v2052_v15 = vmul.f32 1.442695, %v2051_v13 }
 0x965   : > { %3852 = vpow2.f32 %v2052_v15 }
 0x96b   : > { %v3853_v16 = vpop.eup %3852 }
 0x96c   : > { %v2054_v53 = vsel %vm2047_vm13, %v3853_v16, 0.0 }
 0x96d   : > { %2055 = vadd.xlane.f32.xlu2 %v2054_v53 }
 0x978   : > { %v2205_v28 = vpop.permute.xlu1 %2204 }
 0x979   : > { %v2210_v32 = vsel %vm1408_vm7, %v2205_v28, 0  ;;  %v3580_v28 = vld [vmem:[#allocation20 + $0x20] sm:$0xff] }
 0x97a   : > { %2285 = vmatpush.bf16.msrb.mxu3 %v3580_v28  ;;  %v3589_v28 = vld [vmem:[#allocation22 + $0x24] sm:$0xf0] }
 0x980   : > { %v2293_v45 = vpop.permute.xlu1 %2292 }
 0x985   : > { %2086 = vrot.lane.b32.xlu2 %v2025_v34, %s4478_s5 }
 0x98d   : > { %2294 = vrot.lane.b32.xlu2 %v2025_v34, %s4480_s13 }
 0x9e0   : > { %v2056_v26 = vpop.xlane.xlu2 %2055 }
 0x9e1   : > { %3854 = vrcp.f32 %v2056_v26 }
 0x9e7   : > { %v3855_v27 = vpop.eup %3854 }
 0x9e8   : > { %v5008_v29 = vmul.f32 %v3855_v27, %v3853_v16  ;;  %v2087_v30 = vpop.permute.xlu2 %2086 }
 0x9e9   : > { %v2092_v31 = vsel %vm1408_vm7, %v2087_v30, 0 }
 0x9ea   : > { %v2060_v33 = vpack.c.bf16 %v5008_v29, %v5008_v29  ;;  %2101 = vmatpush.bf16.xpose.msra.mxu1 %v2092_v31 }
 0x9ec   : > { %3340 = vmatmul.msk.bf16.vlgmr.msrb.gmra.mxu0 %vm2047_vm13, %v2060_v33 }
 0x9f0   : > { %v2295_v36 = vpop.permute.xlu2 %2294 }
 0x9f1   : > { %v2300_v37 = vsel %vm1408_vm7, %v2295_v36, 0  ;;  %3341 = vmatmul.msk.bf16.vlgmr.msra.gmra.mxu1 %vm1408_vm7, %v2084_v35 }
 0x9f2   : > { %2219 = vmatpush.bf16.xpose.msrb.mxu1 %v2210_v32  ;;  %2309 = vmatpush.bf16.xpose.msrb.mxu0 %v2300_v37 }
 0xa01   : > { %3361 = vmatmul.msk.bf16.vlgmr.msrb.gmra.mxu1 %vm1408_vm7, %v2203_v38 }
 0xa69   : > { %v2073_v39 = vpop.f32.mrf.mxu0 }
 0xa6a   : > { %v2077_v40 = vpack.c.bf16 %v2073_v39, %v2073_v39  ;;  %v3583_v39 = vld [vmem:[#allocation20 + $0x38] sm:$0xff] }
 0xa6c   : > { %3360 = vmatmul.msk.bf16.vlgmr.msra.gmra.mxu0 %vm1408_vm7, %v2077_v40  ;;  %v3582_v40 = vld [vmem:[#allocation20 + $0x30] sm:$0xff] }
 0xa6e   : > { %v2103_v34 = vpop.f32.mrf.mxu1 }
 0xa6f   : > { %v2107_v42 = vmul.f32 0.17677669, %v2103_v34 }
 0xa71   : > { %v2075_v17 = vpop.f32.mrf.mxu0  ;;  %v2108_v43 = vsel %vm2047_vm13, %v2107_v42, -inf }
 0xa72   : > { %2109 = vmax.xlane.f32.xlu0 %v2108_v43 }
 0xa76   : > { %v2105_v44 = vpop.f32.mrf.mxu1 }
 0xa7c   : > { %3372 = vmatmul.msk.bf16.vlgmr.msrb.gmra.mxu0 %vm1408_vm7, %v2293_v45 }
 0xa7e   : > { %v2221_v46 = vpop.f32.mrf.mxu1 }
 0xa7f   : > { %v2225_v47 = vmul.f32 0.17677669, %v2221_v46 }
 0xa81   : > { %v2226_v48 = vsel %vm2047_vm13, %v2225_v47, -inf }
 0xa82   : > { %2227 = vmax.xlane.f32.xlu2 %v2226_v48 }
 0xa86   : > { %v2223_v21 = vpop.f32.mrf.mxu1 }
 0xa87   : > { %v3824_v21 = vld [vmem:[%s5272_s22] ss:$0 sm:$0xff]  ;;  %s4306_s22 = scalar_lea.hbm %s4305_s18, 8 }
 0xa88   : > { %p4307_p1 = scmp.ne.s32.totalorder %s4305_s18, %s4306_s22 }
 0xa8a   : > { %p4308_p3 = pnand %p4307_p1, %p4732_p5 }
 0xa8c   : > { %p4309_p4 = pneg %p4308_p3 }
 0xa9a   : > { %2122 = vrot.lane.b32.xlu2 %v5005_v24, %s4478_s5  ;;  %s5273_s5 = sld [smem:[#allocation64_spill]] }
 0xae5   : > { %v2110_v49 = vpop.xlane.xlu0 %2109 }
 0xae6   : > { %v2111_v50 = vsub.f32 %v2107_v42, %v2110_v49 }
 0xae8   : > { %v2112_v51 = vmul.f32 1.442695, %v2111_v50 }
 0xae9   : > { %v5024_v1 = vpop.f32.mrf.mxu0 }
 0xaea   : > { %3856 = vpow2.f32 %v2112_v51 }
 0xaf0   : > { %v3857_v52 = vpop.eup %3856 }
 0xaf1   : > { %v2200_v54 = vpop.f32.mrf.mxu0  ;;  %v2114_v55 = vsel %vm2047_vm13, %v3857_v52, 0.0 }
 0xaf2   : > { %2115 = vadd.xlane.f32.xlu0 %v2114_v55  ;;  %v3441_v55 = vld [vmem:[#allocation22 + $0x70] sm:$0xf] }
 0xaf5   : > { %v2228_v56 = vpop.xlane.xlu2 %2227 }
 0xaf6   : > { %v2229_v57 = vsub.f32 %v2225_v47, %v2228_v56  ;;  %v3599_v56 = vld [vmem:[#allocation22 + $0x74] sm:$0xf0] }
 0xaf8   : > { %v2230_v58 = vmul.f32 1.442695, %v2229_v57  ;;  %v3598_v57 = vld [vmem:[#allocation22 + $0x74] sm:$0xf] }
 0xaf9   : > { %v2311_v59 = vpop.f32.mrf.mxu0 }
 0xafa   : > { %v2315_v60 = vmul.f32 0.17677669, %v2311_v59  ;;  %3858 = vpow2.f32 %v2230_v58  ;;  %v3443_v58 = vld [vmem:[#allocation22 + $0x78] sm:$0xf0] }
 0xafb   : > { %v3446_v59 = vor.u32 %v3598_v57, %v3443_v58 }
 0xafc   : > { %v2316_v61 = vsel %vm2047_vm13, %v2315_v60, -inf }
 0xafd   : > { %v2123_v62 = vpop.permute.xlu2 %2122  ;;  %2317 = vmax.xlane.f32.xlu1 %v2316_v61  ;;  %2534 = vmatpush.bf16.msra.mxu0 %v3446_v59 }
 0xafe   : > { %2135 = vmatpush.bf16.msra.mxu2 %v2123_v62 }
 0xb00   : > { %v3859_v63 = vpop.eup %3858 }
 0xb01   : > { %v2313_v0 = vpop.f32.mrf.mxu0  ;;  %v2232_v2 = vsel %vm2047_vm13, %v3859_v63, 0.0 }
 0xb02   : > { %v3597_v0 = vld [vmem:[#allocation22 + $0x64] sm:$0xf0] }
 0xb05   : > { %2233 = vadd.xlane.f32.xlu1 %v2232_v2  ;;  %v3596_v2 = vld [vmem:[#allocation22 + $0x64] sm:$0xf] }
 0xb1e   : > { %2239 = vrot.lane.b32.xlu1 %v5005_v24, %s4479_s29 }
 0xb65   : > { %v2116_v3 = vpop.xlane.xlu0 %2115 }
 0xb66   : > { %3860 = vrcp.f32 %v2116_v3 }
 0xb6c   : > { %v3861_v4 = vpop.eup %3860 }
 0xb6d   : > { %v2118_v5 = vmul.f32 %v3861_v4, %v3857_v52  ;;  %v3435_v4 = vld [vmem:[#allocation22 + $0x68] sm:$0xf0] }
 0xb6f   : > { %v2120_v6 = vpack.c.bf16 %v2118_v5, %v2118_v5  ;;  %v2119_v53 = vadd.f32 %v2118_v5, %v5008_v29  ;;  %v3438_v5 = vor.u32 %v3596_v2, %v3435_v4 }
 0xb70   : > { %v2318_v7 = vpop.xlane.xlu1 %2317 }
 0xb71   : > { %v2319_v9 = vsub.f32 %v2315_v60, %v2318_v7  ;;  %3342 = vmatmul.msk.bf16.vlgmr.msra.gmra.mxu2 %vm2047_vm13, %v2120_v6  ;;  %2535 = vmatpush.bf16.msra.mxu0 %v3438_v5  ;;  %v3425_v6 = vld [vmem:[#allocation22 + $0x50] sm:$0xf]  ;;  %v3595_v7 = vld [vmem:[#allocation22 + $0x54] sm:$0xf0] }
 0xb73   : > { %v2320_v10 = vmul.f32 1.442695, %v2319_v9  ;;  %v3594_v9 = vld [vmem:[#allocation22 + $0x54] sm:$0xf] }
 0xb75   : > { %3862 = vpow2.f32 %v2320_v10  ;;  %v3426_v10 = vor.u32 %v3595_v7, %v3425_v6  ;;  %v3609_v7 = vld [vmem:[#allocation23 + $0x48] sm:$0xff] }
 0xb78   : > { %v2234_v12 = vpop.xlane.xlu1 %2233 }
 0xb79   : > { %3864 = vrcp.f32 %v2234_v12  ;;  %v3430_v12 = vor.u32 %v3594_v9, %v3427_v11  ;;  %v3602_v9 = vld [vmem:[#allocation23 + $0x10] sm:$0xff]  ;;  %v3601_v11 = vld [vmem:[#allocation23 + $0x8] sm:$0xff] }
 0xb7b   : > { %v3863_v13 = vpop.eup %3862  ;;  %2536 = vmatpush.bf16.msra.mxu0 %v3430_v12  ;;  %v3600_v12 = vld [vmem:[#allocation23] sm:$0xff] }
 0xb7c   : > { %v2322_v15 = vsel %vm2047_vm13, %v3863_v13, 0.0 }
 0xb7d   : > { %2323 = vadd.xlane.f32.xlu0 %v2322_v15  ;;  %v3593_v15 = vld [vmem:[#allocation22 + $0x44] sm:$0xf0] }
 0xb7f   : > { %v3865_v16 = vpop.eup %3864 }
 0xb80   : > { %v2236_v18 = vmul.f32 %v3865_v16, %v3859_v63  ;;  %v3433_v63 = vld [vmem:[#allocation22 + $0x60] sm:$0xf]  ;;  %v3592_v16 = vld [vmem:[#allocation22 + $0x44] sm:$0xf] }
 0xb81   : > { %v3434_v3 = vor.u32 %v3597_v0, %v3433_v63  ;;  %v3825_v63 = vld [vmem:[%s5273_s5] ss:$0 sm:$0xff]  ;;  %s4310_s5 = scalar_lea.hbm %s5278_s2, 16 }
 0xb82   : > { %v2237_v19 = vadd.f32 %v2236_v18, %v2119_v53  ;;  %v2238_v22 = vpack.c.bf16 %v2236_v18, %v2236_v18  ;;  %v3419_v18 = vld [vmem:[#allocation22 + $0x48] sm:$0xf0]  ;;  %p4312_p8 = scmp.lt.s32.totalorder %s4310_s5, %s4306_s22 }
 0xb84   : > { %p4313_p10 = por %p4312_p8, %p4311_p6 }
 0xb86   : > { %p4314_p11 = pnand %p4313_p10, %p4309_p4 }
 0xb90   : > { %v2240_v20 = vpop.permute.xlu1 %2239 }
 0xb91   : > { %2329 = vrot.lane.b32.xlu0 %v5005_v24, %s4480_s13  ;;  %2252 = vmatpush.bf16.msrb.mxu2 %v2240_v20  ;;  %v3409_v20 = vld [vmem:[#allocation22 + $0x30] sm:$0xf] }
 0xb94   : > { %3362 = vmatmul.msk.bf16.vlgmr.msrb.gmra.mxu2 %vm2047_vm13, %v2238_v22  ;;  %v3591_v22 = vld [vmem:[#allocation22 + $0x34] sm:$0xf0] }
 0xb95   : > { %2374 = vmatpush.bf16.msra.mxu2 %v3583_v39  ;;  %v3410_v8 = vor.u32 %v3591_v22, %v3409_v20  ;;  %v3585_v39 = vld [vmem:[#allocation22 + $0x4] sm:$0xf0] }
 0xb99   : > { %2375 = vmatpush.bf16.msra.mxu2 %v3582_v40 }
 0xbf0   : > { %v2324_v25 = vpop.xlane.xlu0 %2323 }
 0xbf1   : > { %3866 = vrcp.f32 %v2324_v25  ;;  %v3411_v25 = vld [vmem:[#allocation22 + $0x38] sm:$0xf0] }
 0xbf4   : > { %v2137_v26 = vpop.f32.mrf.mxu2 }
 0xbf5   : > { %v2141_v27 = vpack.c.bf16 %v2137_v26, %v2137_v26  ;;  %v3414_v26 = vor.u32 %v3590_v23, %v3411_v25 }
 0xbf7   : > { %v3867_v29 = vpop.eup %3866  ;;  %3351 = vmatmul.msk.bf16.vlgmr.msra.gmra.mxu3 %vm1408_vm7, %v2141_v27  ;;  %v3401_v27 = vld [vmem:[#allocation22 + $0x20] sm:$0xf] }
 0xbf8   : > { %v2326_v30 = vmul.f32 %v3867_v29, %v3863_v13  ;;  %v3417_v13 = vld [vmem:[#allocation22 + $0x40] sm:$0xf]  ;;  %v3588_v29 = vld [vmem:[#allocation22 + $0x24] sm:$0xf] }
 0xbf9   : > { %v3418_v53 = vor.u32 %v3593_v15, %v3417_v13 }
 0xbfa   : > { %v2327_v24 = vadd.f32 %v2326_v30, %v2237_v19  ;;  %v2328_v35 = vpack.c.bf16 %v2326_v30, %v2326_v30  ;;  %v3422_v19 = vor.u32 %v3592_v16, %v3419_v18  ;;  %v3402_v30 = vor.u32 %v3589_v28, %v3401_v27 }
 0xbfc   : > { %v2386_v31 = vmul.f32 0.25, %v2327_v24  ;;  %v2139_v32 = vpop.f32.mrf.mxu2  ;;  %2537 = vmatpush.bf16.msra.mxu0 %v3422_v19  ;;  %v3403_v24 = vld [vmem:[#allocation22 + $0x28] sm:$0xf0] }
 0xbfd   : > { %v3393_v32 = vld [vmem:[#allocation22 + $0x10] sm:$0xf] }
 0xbfe   : > { %2712 = vst.msk [vmem:[%s1128_s24] sm:$0xff] %vm2047_vm13, %v2386_v31  ;;  %v3406_v31 = vor.u32 %v3588_v29, %v3403_v24 }
 0xc00   : > { %2538 = vmatpush.bf16.msra.mxu0 %v3414_v26 }
 0xc03   : > { %v2330_v33 = vpop.permute.xlu0 %2329 }
 0xc04   : > { %2342 = vmatpush.bf16.msra.mxu1 %v2330_v33  ;;  %2539 = vmatpush.bf16.msra.mxu0 %v3406_v31  ;;  %v3587_v33 = vld [vmem:[#allocation22 + $0x14] sm:$0xf0] }
 0xc07   : > { %3373 = vmatmul.msk.bf16.vlgmr.msra.gmra.mxu1 %vm2047_vm13, %v2328_v35  ;;  %v3586_v35 = vld [vmem:[#allocation22 + $0x14] sm:$0xf] }
 0xc17   : > { %v2254_v36 = vpop.f32.mrf.mxu2 }
 0xc18   : > { %v2258_v37 = vpack.c.bf16 %v2254_v36, %v2254_v36  ;;  %v3394_v36 = vor.u32 %v3587_v33, %v3393_v32 }
 0xc1a   : > { %3371 = vmatmul.msk.bf16.vlgmr.msrb.gmra.mxu3 %vm1408_vm7, %v2258_v37  ;;  %v3395_v37 = vld [vmem:[#allocation22 + $0x18] sm:$0xf0] }
 0xc1b   : > { %v3398_v40 = vor.u32 %v3586_v35, %v3395_v37 }
 0xc1d   : > { %2540 = vmatpush.bf16.msra.mxu0 %v3398_v40 }
 0xc1f   : > { %v2256_v38 = vpop.f32.mrf.mxu2 }
 0xc20   : > { %v3385_v38 = vld [vmem:[#allocation22] sm:$0xf] }
 0xc7a   : > { %v2170_v34 = vpop.f32.mrf.mxu3 }
 0xc7b   : > { %v2199_v45 = vadd.f32 %v5024_v1, %v2170_v34  ;;  %v3442_v1 = vor.u32 %v3599_v56, %v3441_v55  ;;  %v3584_v34 = vld [vmem:[#allocation22 + $0x4] sm:$0xf] }
 0xc7c   : > { %v3604_v55 = vld [vmem:[#allocation23 + $0x20] sm:$0xff] }
 0xc7d   : > { %2521 = vmatpush.bf16.msra.mxu3 %v3442_v1  ;;  %v3611_v1 = vld [vmem:[#allocation23 + $0x58] sm:$0xff] }
 0xc81   : > { %2522 = vmatpush.bf16.msra.mxu3 %v3434_v3  ;;  %v3826_v3 = vld [vmem:[%s5274_s25] ss:$0 sm:$0xff] }
 0xc82   : > { %v2172_v42 = vpop.f32.mrf.mxu3 }
 0xc83   : > { %v3387_v42 = vld [vmem:[#allocation22 + $0x8] sm:$0xf0] }
 0xc84   : > { %v2344_v17 = vpop.f32.mrf.mxu1 }
 0xc85   : > { %v2348_v43 = vpack.c.bf16 %v2344_v17, %v2344_v17  ;;  %2523 = vmatpush.bf16.msra.mxu3 %v3426_v10  ;;  %v3386_v17 = vor.u32 %v3585_v39, %v3385_v38  ;;  %v3608_v10 = vld [vmem:[#allocation23 + $0x40] sm:$0xff] }
 0xc87   : > { %3382 = vmatmul.msk.bf16.vlgmr.msra.gmra.mxu2 %vm1408_vm7, %v2348_v43  ;;  %v3390_v43 = vor.u32 %v3584_v34, %v3387_v42 }
 0xc89   : > { %2524 = vmatpush.bf16.msra.mxu3 %v3418_v53  ;;  %2541 = vmatpush.bf16.msra.mxu0 %v3390_v43 }
 0xc8c   : > { %v2346_v44 = vpop.f32.mrf.mxu1 }
 0xc8d   : > { %2525 = vmatpush.bf16.msra.mxu3 %v3410_v8  ;;  %v3615_v44 = vld [vmem:[#allocation23 + $0x78] sm:$0xff] }
 0xc8e   : > { %2696 = vmatpush.bf16.msrb.mxu2 %v3615_v44 }
 0xc91   : > { %2526 = vmatpush.bf16.msra.mxu3 %v3402_v30 }
 0xc95   : > { %2527 = vmatpush.bf16.msra.mxu3 %v3394_v36 }
 0xc99   : > { %2528 = vmatpush.bf16.msra.mxu3 %v3386_v17 }
 0xc9d   : > { %v2287_v46 = vpop.f32.mrf.mxu3 }
 0xc9e   : > { %v2291_v47 = vadd.f32 %v2287_v46, %v2199_v45  ;;  %v3607_v45 = vld [vmem:[#allocation23 + $0x38] sm:$0xff] }
 0xc9f   : > { %2683 = vmatpush.bf16.msrb.mxu1 %v3607_v45 }
 0xca5   : > { %v2289_v48 = vpop.f32.mrf.mxu3 }
 0xca6   : > { %v3614_v48 = vld [vmem:[#allocation23 + $0x70] sm:$0xff] }
 0xca7   : > { %2697 = vmatpush.bf16.msrb.mxu2 %v3614_v48 }
 0xd0a   : > { %v2377_v49 = vpop.f32.mrf.mxu2 }
 0xd0b   : > { %v2381_v50 = vadd.f32 %v2377_v49, %v2291_v47 }
 0xd0d   : > { %v2385_v51 = vadd.f32 %v3824_v21, %v2381_v50  ;;  %v3606_v21 = vld [vmem:[#allocation23 + $0x30] sm:$0xff]  ;;  %v3613_v50 = vld [vmem:[#allocation23 + $0x68] sm:$0xff] }
 0xd0e   : > { %2684 = vmatpush.bf16.msrb.mxu1 %v3606_v21  ;;  %2698 = vmatpush.bf16.msrb.mxu2 %v3613_v50 }
 0xd0f   : > { %v5050_v52 = vadd.f32 %v2385_v51, %v4967_v41  ;;  %v3605_v51 = vld [vmem:[#allocation23 + $0x28] sm:$0xff] }
 0xd11   : > { %2390 = vadd.xlane.f32.xlu2 %v5050_v52 }
 0xd12   : > { %v2379_v54 = vpop.f32.mrf.mxu2  ;;  %2685 = vmatpush.bf16.msrb.mxu1 %v3605_v51 }
 0xd13   : > { %v3612_v54 = vld [vmem:[#allocation23 + $0x60] sm:$0xff] }
 0xd14   : > { %2699 = vmatpush.bf16.msrb.mxu2 %v3612_v54 }
 0xd16   : > { %2686 = vmatpush.bf16.msrb.mxu1 %v3604_v55 }
 0xd18   : > { %2700 = vmatpush.bf16.msrb.mxu2 %v3611_v1 }
 0xd84   : > { %v2391_v60 = vpop.xlane.xlu2 %2390 }
 0xd85   : > { %v2392_v61 = vmul.f32 %v2391_v60, %v4888_v14  ;;  %v3610_v60 = vld [vmem:[#allocation23 + $0x50] sm:$0xff] }
 0xd86   : > { %2701 = vmatpush.bf16.msrb.mxu2 %v3610_v60 }
 0xd87   : > { %v5055_v62 = vsub.f32 %v5050_v52, %v2392_v61 }
 0xd89   : > { %v2394_v41 = vmul.f32 %v5055_v62, %v5055_v62 }
 0xd8a   : > { %2702 = vmatpush.bf16.msrb.mxu2 %v3609_v7 }
 0xd8b   : > { %2395 = vadd.xlane.f32.xlu0 %v2394_v41 }
 0xd8e   : > { %2703 = vmatpush.bf16.msrb.mxu2 %v3608_v10 }
 0xdfe   : > { %v2396_v46 = vpop.xlane.xlu0 %2395 }
 0xdff   : > { %v2397_v47 = vmul.f32 %v2396_v46, %v4888_v14  ;;  %v3603_v14 = vld [vmem:[#allocation23 + $0x18] sm:$0xff] }
 0xe00   : > { %2687 = vmatpush.bf16.msrb.mxu1 %v3603_v14 }
 0xe01   : > { %v2398_v49 = vadd.f32 1e-05, %v2397_v47 }
 0xe03   : > { %3868 = vrsqrt.f32 %v2398_v49  ;;  %vm2405_vm15 = vweird.f32 %v2398_v49 }
 0xe04   : > { %2688 = vmatpush.bf16.msrb.mxu1 %v3602_v9 }
 0xe08   : > { %2689 = vmatpush.bf16.msrb.mxu1 %v3601_v11 }
 0xe09   : > { %v3869_v56 = vpop.eup %3868 }
 0xe0a   : > { %v2400_v57 = vmul.f32 %v3869_v56, %v2398_v49  ;;  %vm2406_vm14 = vweird.f32 %v3869_v56 }
 0xe0b   : > { %vm2407_vm0 = vmor %vm2405_vm15, %vm2406_vm14 }
 0xe0c   : > { %v2401_v58 = vmul.f32 %v3869_v56, %v2400_v57  ;;  %2690 = vmatpush.bf16.msrb.mxu1 %v3600_v12 }
 0xe0e   : > { %v2402_v59 = vmul.f32 0.5, %v2401_v58 }
 0xe10   : > { %v2403_v61 = vsub.f32 1.5, %v2402_v59 }
 0xe12   : > { %v2404_v41 = vmul.f32 %v3869_v56, %v2403_v61 }
 0xe14   : > { %v2408_v0 = vsel %vm2407_vm0, %v3869_v56, %v2404_v41 }
 0xe15   : > { %v2409_v2 = vmul.f32 %v2408_v0, %v5055_v62  ;;  %v2435_v62 = vld [vmem:[%s5275_s26] sm:$0x3] }
 0xe16   : > { %v2438_v13 = vperm.slane %v2435_v62, 1  ;;  %v2437_v18 = vperm.slane %v2435_v62, 0 }
 0xe17   : > { %v2413_v4 = vmul.f32 %v3825_v63, %v2409_v2 }
 0xe19   : > { %v2417_v5 = vadd.f32 %v3826_v3, %v2413_v4 }
 0xe1b   : > { %v2418_v6 = vpack.c.bf16 %v2417_v5, %v2417_v5 }
 0xe1d   : > { %2529 = vmatmul.bf16.vlgmr.msra.gmra.mxu3 %v2418_v6  ;;  %2542 = vmatmul.bf16.vlgmr.msra.gmra.mxu0 %v2418_v6 }
 0xe9a   : > { %v2543_v15 = vpop.f32.mrf.mxu0 }
 0xe9b   : > { %v2544_v16 = vadd.f32 %v2543_v15, %v2438_v13 }
 0xe9d   : > { %v2548_v53 = vmax.f32 %v2544_v16, 0.0 }
 0xe9f   : > { %v2550_v19 = vpack.c.bf16 %v2548_v53, %v2548_v53 }
 0xea0   : > { %v2530_v20 = vpop.f32.mrf.mxu3 }
 0xea1   : > { %v2531_v22 = vadd.f32 %v2530_v20, %v2437_v18  ;;  %2704 = vmatmul.bf16.vlgmr.msrb.gmra.mxu2 %v2550_v19 }
 0xea2   : > { %v2545_v23 = vpop.f32.mrf.mxu0 }
 0xea3   : > { %v2547_v8 = vmax.f32 %v2531_v22, 0.0 }
 0xea5   : > { %v2549_v25 = vpack.c.bf16 %v2547_v8, %v2547_v8 }
 0xea7   : > { %2691 = vmatmul.bf16.vlgmr.msrb.gmra.mxu1 %v2549_v25 }
 0xea8   : > { %v2532_v26 = vpop.f32.mrf.mxu3 }
 0xea9   : > { %4317 = shalt.err (!%p4314_p11)
}
 0xeaa   : > { %3667 = dma.vmem_to_hbm [thread:$0]  (%p4732_p5), %s2753_s23, 128, %s2755_s3, %s5081_s20  }
 0xeab   : > { %s5279_s27 = sld [smem:[#allocation72_spill]]  ;;  %s2767_s11 = sshll.u32 %s1128_s24, 4  ;;  %s2768_s11 = int_to_ptr.vmem [resolvable:$true] %s2767_s11 }
 0xeb1   : > { %s2765_s25 = scalar_lea.hbm %s5279_s27, %s5071_s1  ;;  %s4338_s14 = scalar_lea.hbm %s5279_s27, 16 }
 0xeb2   : > { %s2769_s19 = sshll.u32 %s2765_s25, 4  ;;  %s2770_s19 = int_to_ptr.hbm [resolvable:$true] %s2769_s19 }
 0xeb3   : > { %s4332_s26 = sshra.s32 %s2770_s19, 4  ;;  %s4333_s26 = int_to_ptr.hbm [resolvable:$true] %s4332_s26 }
 0xeb4   : > { %s4334_s30 = scalar_lea.hbm %s4333_s26, 8  ;;  %p4339_p2 = scmp.lt.s32.totalorder %s4333_s26, %s5279_s27 }
 0xeb5   : > { %p4335_p12 = scmp.ne.s32.totalorder %s4333_s26, %s4334_s30  ;;  %p4340_p7 = scmp.lt.s32.totalorder %s4338_s14, %s4334_s30 }
 0xeb7   : > { %p4336_p13 = pnand %p4335_p12, %p4732_p5  ;;  %p4341_p1 = por %p4340_p7, %p4339_p2 }
 0xeb9   : > { %p4337_p0 = pneg %p4336_p13 }
 0xebb   : > { %p4342_p3 = pnand %p4341_p1, %p4337_p0 }
 0xebd   : > { %4345 = shalt.err (!%p4342_p3)
}
 0xebe   : > { %3668 = dma.vmem_to_hbm [thread:$0]  (%p4732_p5), %s2768_s11, 128, %s2770_s19, %s5081_s20  }
 0xebf   : > { %s5280_s22 = sld [smem:[#allocation69_spill]]  ;;  %s1114_s28 = scalar_lea.vmem [#allocation25], %s4842_s21 }
 0xec0   : > { %s5281_s5 = sld [smem:[#allocation70_spill]]  ;;  %s2737_s6 = sshll.u32 %s1114_s28, 4  ;;  %s2738_s6 = int_to_ptr.vmem [resolvable:$true] %s2737_s6 }
 0xec1   : > { %s2714_s20 = scalar_lea.sflag [#allocation4], %s4839_s15 }
 0xec5   : > { %v3827_v27 = vld [vmem:[%s5280_s22] ss:$0 sm:$0xff] }
 0xec6   : > { %s5282_s29 = smov %s5281_s5  ;;  %s2735_s13 = scalar_lea.hbm %s5281_s5, %s5071_s1 }
 0xec7   : > { %s2739_s25 = sshll.u32 %s2735_s13, 4  ;;  %s4366_s26 = scalar_lea.hbm %s5282_s29, 16  ;;  %s2740_s25 = int_to_ptr.hbm [resolvable:$true] %s2739_s25 }
 0xec8   : > { %s4360_s11 = sshra.s32 %s2740_s25, 4  ;;  %s4361_s11 = int_to_ptr.hbm [resolvable:$true] %s4360_s11 }
 0xec9   : > { %s4362_s19 = scalar_lea.hbm %s4361_s11, 8  ;;  %p4367_p10 = scmp.lt.s32.totalorder %s4361_s11, %s5282_s29 }
 0xeca   : > { %p4363_p4 = scmp.ne.s32.totalorder %s4361_s11, %s4362_s19  ;;  %p4368_p11 = scmp.lt.s32.totalorder %s4366_s26, %s4362_s19 }
 0xecc   : > { %p4364_p6 = pnand %p4363_p4, %p4732_p5  ;;  %p4369_p12 = por %p4368_p11, %p4367_p10 }
 0xece   : > { %p4365_p8 = pneg %p4364_p6 }
 0xed0   : > { %p4370_p13 = pnand %p4369_p12, %p4365_p8 }
 0xf24   : > { %v2692_v28 = vpop.f32.mrf.mxu1  ;;  %v2705_v29 = vpop.f32.mrf.mxu2 }
 0xf25   : > { %v2693_v30 = vadd.f32 %v3827_v27, %v2692_v28 }
 0xf27   : > { %v2706_v24 = vadd.f32 %v2705_v29, %v2693_v30 }
 0xf29   : > { %v2709_v31 = vadd.f32 %v2706_v24, %v5050_v52 }
 0xf2b   : > { %2710 = vst [vmem:[%s1114_s28] sm:$0xff] %v2709_v31 }
 0xf2c   : > { %v2694_v32 = vpop.f32.mrf.mxu1  ;;  %v2707_v33 = vpop.f32.mrf.mxu2 }
 0xf2d   : > { %4373 = shalt.err (!%p4370_p13)
}
 0xf2e   : > { %3666 = dma.vmem_to_hbm [thread:$0]  (%p4732_p5), %s2738_s6, 128, %s2740_s25, %s2714_s20  }
 0xf2f PF: > { %s5283_s15 = sld [smem:[#allocation39_spill]] }
 0xf30   : > { %s5285_s14 = sld [smem:[#allocation42_spill]] }
 0xf35   : > { %s2781_s23 = sand.u32 1, %s5283_s15  }
 0xf36   : > { %p5286_p0 = scmp.ge.s32.totalorder %s5285_s14, 2  ;;  %s2782_s3 = scalar_lea.sflag [#allocation4], %s2781_s23 }
 0xf38   : > { %p3717_p2 = pnand %p5286_p0, %p4740_p9 }
 0xf3a   : > { %p3718_p7 = pneg %p3717_p2 }
 0xf3c   : > { %4431 = dma.done.wait (%p3718_p7), %s2782_s3, 128  }
 0xf3d   : > { %4433 = vsyncadd (%p3718_p7), %s2782_s3, 4294967168  ;;  %s5287_s24 = sadd.s32 4294967294, %s5285_s14  }
 0xf3e   : > { %s2791_s18 = sand.u32 1, %s5287_s24  }
 0xf3f   : > { %s2792_s22 = scalar_lea.sflag [#allocation27], %s2791_s18 }
 0xf40   : > { %4435 = dma.done.wait (%p3718_p7), %s2792_s22, 256  }
 0xf41   : > { %4437 = vsyncadd (%p3718_p7), %s2792_s22, 4294967040  ;;  %s56_s5 = sadd.s32 1, %s5285_s14   ;;  %s5288_s0 = sld [smem:[#allocation40_spill]] }
 0xf42   : > { %p53_p5 = scmp.ge.s32.totalorder %s56_s5, 4   ;;  %s5289_s8 = sld [smem:[#allocation45_spill]] }
 0xf43   : > { %s5290_s10 = sld [smem:[#allocation43_spill]]  ;;  %s5291_s7 = smov %s4444_s4 }
 0xf44   : > { %s5293_s30 = smov %s4456_s9 }
 0xf45   :  { %55 = sbr.rel (!%p53_p5) target bundleno = 43 (0x2b), region = 265 }
 0xf47   : > { %s5292_s4 = smov %s5288_s0 }
 0xf49   : > { %s5294_s9 = smov %s5290_s10 }
 0xf4a   :  { %2808 = vsyncpa [#allocation3], 1 }
 0xf4b   :  { %2810 = vsyncpa [#allocation3 + $0x1], 1 }
 0xf4c   :  { %2811 = vsyncpa [#allocation6], 1 }
 0xf4d   :  { %2813 = vsyncpa [#allocation6 + $0x1], 1 }
 0xf4e   :  { %2814 = vsyncpa [#allocation9], 1 }
 0xf4f   :  { %2815 = vsyncpa [#allocation12], 1 }
 0xf50   :  { %2816 = vsyncpa [#allocation15], 1 }
 0xf51   :  { %2817 = vsyncpa [#allocation18], 1 }
 0xf52   :  { %2818 = vsyncpa [#allocation21], 1 }
 0xf53   :  { %2819 = vsyncpa [#allocation24], 1 }
 0xf54   :  { %2820 = vsyncpa [#allocation4], 1 }
 0xf55   :  { %2822 = vsyncpa [#allocation4 + $0x1], 1 }
 0xf56   :  { %2823 = vsyncpa [#allocation27], 1 }
 0xf57   :  { %2825 = vsyncpa [#allocation27 + $0x1], 1 }

// kernel: tpu_custom_call.1
= control target key start
LH: loop header
LB: loop body
LE: loop exit
PB: predicated region body
PF: predicated region fallthrough
CT: control target
= control target key end

     0   :  { %s5156_s0 = inlined_call_operand.hbm [shape: f32[2,8,128], index: 0, kind: input, shape index: {}]   ;;  %s5157_s1 = inlined_call_operand.hbm [shape: f32[2,8,128], index: 1, kind: input, shape index: {}]   ;;  %s5158_s2 = inlined_call_operand.hbm [shape: f32[2,16,128], index: 2, kind: input, shape index: {}]   ;;  %s5159_s3 = inlined_call_operand.hbm [shape: f32[1,128], index: 3, kind: input, shape index: {}]   ;;  %s5160_s4 = inlined_call_operand.hbm [shape: f32[1,128], index: 4, kind: input, shape index: {}]   ;;  %s5161_s5 = inlined_call_operand.hbm [shape: bf16[128,128], index: 5, kind: input, shape index: {}]   ;;  %s5162_s6 = inlined_call_operand.hbm [shape: f32[1,128], index: 6, kind: input, shape index: {}]   ;;  %s5163_s7 = inlined_call_operand.hbm [shape: bf16[128,256], index: 7, kind: input, shape index: {}]   ;;  %s5164_s8 = inlined_call_operand.vmem [shape: f32[1,256], index: 8, kind: input, shape index: {}]   ;;  %s5165_s9 = inlined_call_operand.hbm [shape: bf16[128,128], index: 9, kind: input, shape index: {}]   ;;  %s5166_s10 = inlined_call_operand.vmem [shape: f32[1,128], index: 10, kind: input, shape index: {}]   ;;  %s5167_s11 = inlined_call_operand.vmem [shape: f32[1,128], index: 11, kind: input, shape index: {}]   ;;  %s5168_s12 = inlined_call_operand.vmem [shape: f32[1,128], index: 12, kind: input, shape index: {}]   ;;  %s5169_s13 = inlined_call_operand.hbm [shape: bf16[128,128], index: 13, kind: input, shape index: {}]   ;;  %s5170_s14 = inlined_call_operand.vmem [shape: f32[1,128], index: 14, kind: input, shape index: {}]   ;;  %s5171_s15 = inlined_call_operand.hbm [shape: bf16[128,256], index: 15, kind: input, shape index: {}]   ;;  %s5172_s16 = inlined_call_operand.vmem [shape: f32[1,256], index: 16, kind: input, shape index: {}]   ;;  %s5173_s17 = inlined_call_operand.hbm [shape: bf16[128,128], index: 17, kind: input, shape index: {}]   ;;  %s5174_s18 = inlined_call_operand.vmem [shape: f32[1,128], index: 18, kind: input, shape index: {}]   ;;  %s5175_s19 = inlined_call_operand.vmem [shape: f32[1,128], index: 19, kind: input, shape index: {}]   ;;  %s5176_s20 = inlined_call_operand.vmem [shape: f32[1,128], index: 20, kind: input, shape index: {}]   ;;  %s5177_s21 = inlined_call_operand.hbm [shape: bf16[128,256], index: 21, kind: input, shape index: {}]   ;;  %s5178_s22 = inlined_call_operand.vmem [shape: f32[1,256], index: 22, kind: input, shape index: {}]   ;;  %s5179_s23 = inlined_call_operand.hbm [shape: bf16[256,128], index: 23, kind: input, shape index: {}]   ;;  %s5180_s24 = inlined_call_operand.vmem [shape: f32[1,128], index: 24, kind: input, shape index: {}]   ;;  %s5181_s25 = inlined_call_operand.hbm [shape: f32[2,8,128], index: 25, kind: output, shape index: {0}]   ;;  %s5182_s26 = inlined_call_operand.hbm [shape: f32[2,8,8], index: 26, kind: output, shape index: {1}]   ;;  %s5183_s27 = inlined_call_operand.hbm [shape: f32[2,8,16], index: 27, kind: output, shape index: {2}]  }
   0x1   :  { %5206 = sst [smem:[#allocation47_spill]] %s5156_s0 }
   0x2   :  { %5207 = sst [smem:[#allocation48_spill]] %s5157_s1 }
   0x3   :  { %5208 = sst [smem:[#allocation49_spill]] %s5158_s2 }
   0x4   :  { %5209 = sst [smem:[#allocation50_spill]] %s5159_s3 }
   0x5   :  { %5210 = sst [smem:[#allocation51_spill]] %s5160_s4 }
   0x6   :  { %5211 = sst [smem:[#allocation52_spill]] %s5161_s5 }
   0x7   :  { %5212 = sst [smem:[#allocation53_spill]] %s5162_s6 }
   0x8   :  { %5213 = sst [smem:[#allocation54_spill]] %s5163_s7 }
   0x9   :  { %5214 = sst [smem:[#allocation55_spill]] %s5164_s8 }
   0xa   :  { %5215 = sst [smem:[#allocation56_spill]] %s5165_s9 }
   0xb   :  { %5216 = sst [smem:[#allocation57_spill]] %s5166_s10 }
   0xc   :  { %5217 = sst [smem:[#allocation58_spill]] %s5167_s11 }
   0xd   :  { %5218 = sst [smem:[#allocation59_spill]] %s5169_s13 }
   0xe   :  { %5219 = sst [smem:[#allocation60_spill]] %s5170_s14 }
   0xf   :  { %5220 = sst [smem:[#allocation61_spill]] %s5171_s15 }
  0x10   :  { %5221 = sst [smem:[#allocation62_spill]] %s5173_s17 }
  0x11   :  { %5222 = sst [smem:[#allocation63_spill]] %s5174_s18 }
  0x12   :  { %5223 = sst [smem:[#allocation64_spill]] %s5175_s19 }
  0x13   :  { %5224 = sst [smem:[#allocation65_spill]] %s5176_s20 }
  0x14   :  { %5225 = sst [smem:[#allocation66_spill]] %s5177_s21 }
  0x15   :  { %5226 = sst [smem:[#allocation67_spill]] %s5178_s22 }
  0x16   :  { %5227 = sst [smem:[#allocation68_spill]] %s5179_s23 }
  0x17   :  { %5228 = sst [smem:[#allocation69_spill]] %s5180_s24 }
  0x18   :  { %5229 = sst [smem:[#allocation70_spill]] %s5181_s25 }
  0x19   :  { %5230 = sst [smem:[#allocation71_spill]] %s5182_s26 }
  0x1a   :  { %5231 = sst [smem:[#allocation72_spill]] %s5183_s27 }
  0x1b   :  { %33 = vsyncpa [#allocation3], 0 }
  0x1c   :  { %35 = vsyncpa [#allocation3 + $0x1], 0 }
  0x1d   :  { %36 = vsyncpa [#allocation6], 0 }
  0x1e   :  { %38 = vsyncpa [#allocation6 + $0x1], 0 }
  0x1f   :  { %39 = vsyncpa [#allocation9], 0 }
  0x20   :  { %40 = vsyncpa [#allocation12], 0 }
  0x21   :  { %41 = vsyncpa [#allocation15], 0 }
  0x22   :  { %42 = vsyncpa [#allocation18], 0 }
  0x23   :  { %43 = vsyncpa [#allocation21], 0 }
  0x24   :  { %44 = vsyncpa [#allocation24], 0 }
  0x25   :  { %45 = vsyncpa [#allocation4], 0 }
  0x26   :  { %47 = vsyncpa [#allocation4 + $0x1], 0 }
  0x27   :  { %48 = vsyncpa [#allocation27], 0 }
  0x28   :  { %50 = vsyncpa [#allocation27 + $0x1], 0  ;;  %s4621_s7 = smov 0   ;;  %s4623_s4 = smov 0  }
  0x29   :  { %s4625_s8 = smov 0   ;;  %s4627_s30 = smov 0  }
  0x2a   :  { %s4629_s9 = smov 0   ;;  %s4631_s5 = smov 0  }
  0x2b LB: > { %5232 = sst [smem:[#allocation39_spill]] %s4440_s7  ;;  %s4652_s28 = sadd.s32 4294967295, %s4460_s5   ;;  %s4460_s5 = sphi %s4631_s5, %s56_s5   ;;  %s4456_s9 = sphi %s4629_s9, %s5294_s9   ;;  %s4452_s30 = sphi %s4627_s30, %s5293_s30   ;;  %s4448_s8 = sphi %s4625_s8, %s5289_s8   ;;  %s4444_s4 = sphi %s4623_s4, %s5292_s4   ;;  %s4440_s7 = sphi %s4621_s7, %s5291_s7  }
  0x2c   : > { %5233 = sst [smem:[#allocation40_spill]] %s4448_s8  ;;  %p3065_p0 = scmp.ge.s32.totalorder %s4460_s5, 1 }
  0x2d   : > { %5234 = sst [smem:[#allocation41_spill]] %s4452_s30  ;;  %p91_p1 = scmp.eq.s32.totalorder %s4652_s28, 0 }
  0x2e   : > { %5235 = sst [smem:[#allocation42_spill]] %s4460_s5  ;;  %p699_p2 = scmp.lt.s32.totalorder %s4460_s5, 3 }
  0x2f   : > { %s5236_s29 = sld [smem:[#allocation50_spill]]  ;;  %s4462_s11 = smov [#allocation8]  }
  0x30   : > { %p4660_p3 = pnand %p3065_p0, %p699_p2  ;;  %s713_s2 = sshll.u32 %s4462_s11, 4  ;;  %s714_s2 = int_to_ptr.vmem [resolvable:$true] %s713_s2 }
  0x31   : > { %s5238_s24 = sld [smem:[#allocation52_spill]]  ;;  %s4463_s10 = smov [#allocation11]  }
  0x32   : > { %p3672_p5 = pneg %p4660_p3  ;;  %s5192_s11 = smov 64  }
  0x33   : > { %s5194_s26 = smov 4   ;;  %s5240_s3 = sld [smem:[#allocation54_spill]] }
  0x34   : > { %p4672_p6 = pnand %p3672_p5, %p91_p1  ;;  %s4466_s22 = smov [#allocation14]  }
  0x35   : > { %s711_s1 = sshll.u32 %s5236_s29, 4  ;;  %s736_s29 = sshll.u32 %s4463_s10, 4  ;;  %s712_s1 = int_to_ptr.hbm [resolvable:$true] %s711_s1  ;;  %s737_s29 = int_to_ptr.vmem [resolvable:$true] %s736_s29 }
  0x36   : > { %3675 = dma.hbm_to_vmem [thread:$0]  (!%p4672_p6), %s712_s1, 16, %s714_s2, [#allocation9]  }
  0x37   : > { %s734_s27 = sshll.u32 %s5238_s24, 4  ;;  %s762_s20 = sshll.u32 %s4466_s22, 4  ;;  %s735_s27 = int_to_ptr.hbm [resolvable:$true] %s734_s27  ;;  %s763_s20 = int_to_ptr.vmem [resolvable:$true] %s762_s20 }
  0x38   : > { %3681 = dma.hbm_to_vmem [thread:$0]  (!%p4672_p6), %s735_s27, 1024, %s737_s29, [#allocation12], %s5192_s11, %s5192_s11, %s5194_s26  }
  0x39   : > { %s760_s30 = sshll.u32 %s5240_s3, 4  ;;  %s5241_s13 = sld [smem:[#allocation59_spill]]  ;;  %s761_s30 = int_to_ptr.hbm [resolvable:$true] %s760_s30 }
  0x3a   : > { %s5188_s19 = smov 128   ;;  %s5190_s18 = smov 8  }
  0x3b   : > { %3687 = dma.hbm_to_vmem [thread:$0]  (!%p4672_p6), %s761_s30, 2048, %s763_s20, [#allocation15], %s5188_s19, %s5188_s19, %s5190_s18  }
  0x3c   : > { %s4469_s22 = smov [#allocation17]   ;;  %s5242_s17 = sld [smem:[#allocation62_spill]] }
  0x3d   : > { %s802_s27 = sshll.u32 %s4469_s22, 4  ;;  %s4470_s20 = smov [#allocation20]   ;;  %s803_s27 = int_to_ptr.vmem [resolvable:$true] %s802_s27 }
  0x3e   : > { %s836_s30 = sshll.u32 %s4470_s20, 4  ;;  %s5187_s3 = sadd.s32 4294967294, %s4460_s5   ;;  %s837_s30 = int_to_ptr.vmem [resolvable:$true] %s836_s30 }
  0x3f   : > { %s800_s2 = sshll.u32 %s5241_s13, 4  ;;  %s68_s10 = sadd.s32 1, %s4456_s9  ;;  %s801_s2 = int_to_ptr.hbm [resolvable:$true] %s800_s2 }
  0x40   : > { %3693 = dma.hbm_to_vmem [thread:$0]  (!%p4672_p6), %s801_s2, 1024, %s803_s27, [#allocation18], %s5192_s11, %s5192_s11, %s5194_s26  }
  0x41   : > { %s77_s1 = sadd.s32 1, %s4448_s8  ;;  %p70_p7 = scmp.ge.s32.totalorder %s68_s10, 2 }
  0x42   : > { %s834_s25 = sshll.u32 %s5242_s17, 4  ;;  %p84_p8 = scmp.ne.s32.totalorder %s4448_s8, %s4444_s4  ;;  %s835_s25 = int_to_ptr.hbm [resolvable:$true] %s834_s25 }
  0x43   : > { %3699 = dma.hbm_to_vmem [thread:$0]  (!%p4672_p6), %s835_s25, 1024, %s837_s30, [#allocation21], %s5192_s11, %s5192_s11, %s5194_s26  }
  0x44   : > { %p85_p9 = scmp.eq.s32.totalorder %s4460_s5, 0  ;;  %p90_p10 = scmp.ne.s32.totalorder %s4444_s4, %s4440_s7 }
  0x45   : > { %s5296_s10 = smov (%p70_p7, %s68_s10), 0  ;;  %p630_p13 = scmp.eq.s32.totalorder %s4652_s28, 1 }
  0x46   : > { %5243 = sst [smem:[#allocation43_spill]] %s5296_s10  ;;  %p4717_p11 = por %p85_p9, %p84_p8 }
  0x47   : > { %p4723_p12 = por %p91_p1, %p90_p10  ;;  %s72_s27 = ssub.s32 %s4456_s9, %s5296_s10 }
  0x48   : > { %p75_p0 = scmp.eq.s32.totalorder %s72_s27, 0  ;;  %p636_p2 = scmp.eq.s32.totalorder %s5187_s3, 1 }
  0x49   : > { %p4732_p5 = por %p630_p13, %p84_p8  ;;  %p3737_p7 = scmp.lt.s32.totalorder %s4460_s5, 2 }
  0x4a   : > { %s4738_s24 = scalar_select %p75_p0, %s4448_s8, %s77_s1  }
  0x4b   : > { %s5246_s29 = scalar_select %p4732_p5, 1, 0 }
  0x4c   : > { %5248 = sst [smem:[#allocation45_spill]] %s4738_s24  ;;  %p4740_p9 = por %p636_p2, %p90_p10 }
  0x4d   : > { %5247 = sst [smem:[#allocation44_spill]] %s5246_s29  ;;  %s4745_s20 = sand.u32 1, %s4448_s8  }
  0x4e   : > { %s5249_s25 = scalar_select %p4740_p9, 1, 0 }
  0x4f   : > { %s5202_s30 = sshll.u32 %s4745_s20, 3  ;;  %s5203_s27 = sshll.u32 %s4456_s9, 3 }
  0x50   : > { %5250 = sst [smem:[#allocation46_spill]] %s5249_s25  ;;  %p4751_p4 = pnand %p3737_p7, %p4717_p11 }
  0x51   : > { %s913_s19 = sand.u32 1, %s4460_s5   ;;  %s5252_s11 = sld [smem:[#allocation48_spill]] }
  0x52   : > { %s917_s17 = scalar_lea.vmem [#allocation5], %s5202_s30  ;;  %s4763_s24 = scalar_lea.sflag [#allocation6], %s913_s19 }
  0x53   : > { %s925_s10 = sshll.u32 %s917_s17, 4  ;;  %s3082_s2 = sshll.u32 %s4745_s20, 4  ;;  %s926_s10 = int_to_ptr.vmem [resolvable:$true] %s925_s10 }
  0x54   : > { %s5253_s25 = sld [smem:[#allocation51_spill]]  ;;  %s4772_s18 = scalar_lea.vmem [#allocation7], %s3082_s2 }
  0x55   : > { %s5254_s30 = sld [smem:[#allocation53_spill]]  ;;  %s4473_s19 = smov [#allocation16]  }
  0x56   : > { %s5256_s15 = sld [smem:[#allocation61_spill]]  ;;  %s4474_s1 = smov [#allocation19]  }
  0x57   : > { %s921_s26 = scalar_lea.hbm %s5252_s11, %s5203_s27  ;;  %s4471_s11 = smov [#allocation10]  }
  0x58   : > { %s923_s13 = sshll.u32 %s921_s26, 4  ;;  %s725_s17 = sshll.u32 %s4471_s11, 4  ;;  %s924_s13 = int_to_ptr.hbm [resolvable:$true] %s923_s13  ;;  %s726_s17 = int_to_ptr.vmem [resolvable:$true] %s725_s17 }
  0x59   : > { %3712 = dma.hbm_to_vmem [thread:$0]  (!%p4751_p4), %s924_s13, 128, %s926_s10, %s4763_s24  }
  0x5a   : > { %s723_s7 = sshll.u32 %s5253_s25, 4  ;;  %s4472_s13 = smov [#allocation13]   ;;  %s724_s7 = int_to_ptr.hbm [resolvable:$true] %s723_s7 }
  0x5b   : > { %s749_s27 = sshll.u32 %s5254_s30, 4  ;;  %s751_s8 = sshll.u32 %s4472_s13, 4  ;;  %s750_s27 = int_to_ptr.hbm [resolvable:$true] %s749_s27  ;;  %s752_s8 = int_to_ptr.vmem [resolvable:$true] %s751_s8 }
  0x5c   : > { %3678 = dma.hbm_to_vmem [thread:$0]  (!%p4672_p6), %s724_s7, 16, %s726_s17, [#allocation9]  }
  0x5d   : > { %s5255_s25 = sld [smem:[#allocation56_spill]]  ;;  %s817_s29 = sshll.u32 %s5256_s15, 4  ;;  %s818_s29 = int_to_ptr.hbm [resolvable:$true] %s817_s29 }
  0x5e   : > { %3684 = dma.hbm_to_vmem [thread:$0]  (!%p4672_p6), %s750_s27, 16, %s752_s8, [#allocation12]  }
  0x5f   : > { %s779_s30 = sshll.u32 %s4473_s19, 4  ;;  %s5257_s7 = smov 4   ;;  %s780_s30 = int_to_ptr.vmem [resolvable:$true] %s779_s30 }
  0x60   : > { %s5258_s17 = smov 64   ;;  %s819_s13 = sshll.u32 %s4474_s1, 4  ;;  %s820_s13 = int_to_ptr.vmem [resolvable:$true] %s819_s13 }
  0x61   : > { %s5259_s21 = sld [smem:[#allocation66_spill]]  ;;  %s5260_s8 = smov 8  }
  0x62   : > { %s5261_s10 = smov 128   ;;  %s5262_s23 = sld [smem:[#allocation68_spill]] }
  0x63   : > { %s777_s2 = sshll.u32 %s5255_s25, 4  ;;  %s4475_s19 = smov [#allocation22]   ;;  %s778_s2 = int_to_ptr.hbm [resolvable:$true] %s777_s2 }
  0x64   : > { %3690 = dma.hbm_to_vmem [thread:$0]  (!%p4672_p6), %s778_s2, 1024, %s780_s30, [#allocation15], %s5258_s17, %s5258_s17, %s5257_s7  }
  0x65   : > { %3696 = dma.hbm_to_vmem [thread:$0]  (!%p4672_p6), %s818_s29, 2048, %s820_s13, [#allocation18], %s5261_s10, %s5261_s10, %s5260_s8  }
  0x66   : > { %s859_s30 = sshll.u32 %s4475_s19, 4  ;;  %s4476_s1 = smov [#allocation23]   ;;  %s860_s30 = int_to_ptr.vmem [resolvable:$true] %s859_s30 }
  0x67   : > { %s857_s26 = sshll.u32 %s5259_s21, 4  ;;  %s876_s5 = sshll.u32 %s4476_s1, 4  ;;  %s858_s26 = int_to_ptr.hbm [resolvable:$true] %s857_s26  ;;  %s877_s5 = int_to_ptr.vmem [resolvable:$true] %s876_s5 }
  0x68   : > { %s874_s2 = sshll.u32 %s5262_s23, 4  ;;  %s5263_s29 = sshll.u32 %s4456_s9, 3  ;;  %s875_s2 = int_to_ptr.hbm [resolvable:$true] %s874_s2 }
  0x69   : > { %3702 = dma.hbm_to_vmem [thread:$0]  (!%p4672_p6), %s858_s26, 2048, %s860_s30, [#allocation21], %s5261_s10, %s5261_s10, %s5260_s8  }
  0x6a   : > { %3705 = dma.hbm_to_vmem [thread:$0]  (!%p4672_p6), %s875_s2, 2048, %s877_s5, [#allocation24], %s5258_s17, %s5258_s17, %s5257_s7  }
  0x6b   : > { %s5264_s25 = sld [smem:[#allocation47_spill]]  ;;  %s5265_s19 = sshll.u32 %s4745_s20, 3 }
  0x6c   : > { %s897_s15 = scalar_lea.vmem [#allocation2], %s5265_s19  ;;  %s3519_s26 = sshll.u32 %s4456_s9, 4 }
  0x6d   : > { %s906_s21 = sshll.u32 %s897_s15, 4  ;;  %s894_s30 = scalar_lea.sflag [#allocation3], %s4745_s20  ;;  %s907_s21 = int_to_ptr.vmem [resolvable:$true] %s906_s21 }
  0x6e   : > { %s5266_s0 = sshll.u32 %s4772_s18, 4  ;;  %s5267_s7 = sld [smem:[#allocation49_spill]]  ;;  %s945_s0 = int_to_ptr.vmem [resolvable:$true] %s5266_s0 }
  0x6f   : > { %s4839_s15 = sand.u32 (!%p4660_p3), 1, %s4444_s4  }
  0x70   : > { %s959_s14 = scalar_lea.sflag (!%p4660_p3), [#allocation3], %s4839_s15 }
  0x71   : > { %s902_s11 = scalar_lea.hbm %s5264_s25, %s5263_s29 }
  0x72   : > { %s904_s23 = sshll.u32 %s902_s11, 4  ;;  %956 = sbr.rel (%p4660_p3) target bundleno = 3887 (0xf2f), region = 120  ;;  %s905_s23 = int_to_ptr.hbm [resolvable:$true] %s904_s23 }
  0x73   : > { %3709 = dma.hbm_to_vmem [thread:$0]  (!%p4751_p4), %s905_s23, 128, %s907_s21, %s894_s30  }
  0x74   : > { %s941_s17 = scalar_lea.hbm %s5267_s7, %s3519_s26  ;;  %s4842_s21 = sshll.u32 (!%p4660_p3), %s4839_s15, 3 }
  0x75   : > { %s942_s2 = sshll.u32 %s941_s17, 4  ;;  %s962_s23 = scalar_lea.vmem (!%p4660_p3), [#allocation2], %s4842_s21  ;;  %s943_s2 = int_to_ptr.hbm [resolvable:$true] %s942_s2 }
  0x76   : > { %3715 = dma.hbm_to_vmem [thread:$0]  (!%p4751_p4), %s943_s2, 256, %s945_s0, %s4763_s24, %s5261_s10, %s5261_s10, %s5260_s8  }
  0x77   : > { %4399 = dma.done.wait (%p4723_p12), %s959_s14, 128  }
  0x78   : > { %4401 = vsyncadd (%p4723_p12), %s959_s14, 4294967168  ;;  %s968_s6 = sand.u32 1, %s4652_s28   ;;  %s972_s24 = scalar_lea.vmem [#allocation5], %s4842_s21 }
  0x79   : > { %s969_s3 = scalar_lea.sflag [#allocation6], %s968_s6 }
  0x7a   : > { %4403 = dma.done.wait (%p4723_p12), %s969_s3, 384  }
  0x7b   : > { %4405 = vsyncadd (%p4723_p12), %s969_s3, 4294966912  ;;  %s3088_s20 = sshll.u32 %s4839_s15, 4 }
  0x7c   : > { %s4859_s18 = scalar_lea.vmem [#allocation7], %s3088_s20 }
  0x7d   : > { %4407 = dma.done.wait (%p91_p1), [#allocation9], 32  }
  0x7e   : > { %4409 = vsyncadd (%p91_p1), [#allocation9], 4294967264 }
  0x7f   : > { %4411 = dma.done.wait (%p91_p1), [#allocation12], 1040  }
  0x80   : > { %4413 = vsyncadd (%p91_p1), [#allocation12], 4294966256 }
  0x81   : > { %4415 = dma.done.wait (%p91_p1), [#allocation15], 3072  }
  0x82   : > { %4417 = vsyncadd (%p91_p1), [#allocation15], 4294964224 }
  0x83   : > { %4419 = dma.done.wait (%p91_p1), [#allocation18], 3072  }
  0x84   : > { %4421 = vsyncadd (%p91_p1), [#allocation18], 4294964224 }
  0x85   : > { %4423 = dma.done.wait (%p91_p1), [#allocation21], 3072  }
  0x86   : > { %4425 = vsyncadd (%p91_p1), [#allocation21], 4294964224 }
  0x87   : > { %4427 = dma.done.wait (%p91_p1), [#allocation24], 2048  }
  0x88   : > { %4429 = vsyncadd (%p91_p1), [#allocation24], 4294965248  ;;  %v1131_v0 = vld [vmem:[%s972_s24] sm:$0xff]  ;;  %v4885_v1 = vld [vmem:[%s962_s23] sm:$0xff]  ;;  %v4477_v2 = vmov 128.0   ;;  %s5268_s10 = sld [smem:[#allocation55_spill]] }
  0x89   : > { %1171 = vadd.xlane.f32.xlu0 %v1131_v0  ;;  %3828 = vrcp.f32 %v4477_v2  ;;  %v3193_v5 = vld [vmem:[#allocation14 + $0x70] sm:$0xf]  ;;  %v3543_v6 = vld [vmem:[#allocation14 + $0x74] sm:$0xf0]  ;;  %v3542_v7 = vld [vmem:[#allocation14 + $0x74] sm:$0xf] }
  0x8a   : > { %v3194_v8 = vor.u32 %v3543_v6, %v3193_v5  ;;  %v3195_v9 = vld [vmem:[#allocation14 + $0x78] sm:$0xf0]  ;;  %v3185_v23 = vld [vmem:[#allocation14 + $0x60] sm:$0xf]  ;;  %v3541_v24 = vld [vmem:[#allocation14 + $0x64] sm:$0xf0] }
  0x8b   : > { %v3198_v10 = vor.u32 %v3542_v7, %v3195_v9  ;;  %v3540_v25 = vld [vmem:[#allocation14 + $0x64] sm:$0xf]  ;;  %v3186_v26 = vor.u32 %v3541_v24, %v3185_v23  ;;  %v3187_v27 = vld [vmem:[#allocation14 + $0x68] sm:$0xf0]  ;;  %v3177_v29 = vld [vmem:[#allocation14 + $0x50] sm:$0xf] }
  0x8c   : > { %1378 = vmatpush.bf16.msra.mxu1 %v3194_v8  ;;  %v3190_v28 = vor.u32 %v3540_v25, %v3187_v27  ;;  %v3539_v30 = vld [vmem:[#allocation14 + $0x54] sm:$0xf0]  ;;  %v3538_v31 = vld [vmem:[#allocation14 + $0x54] sm:$0xf]  ;;  %v3179_v34 = vld [vmem:[#allocation14 + $0x58] sm:$0xf0] }
  0x8d   : > { %1391 = vmatpush.bf16.msra.mxu2 %v3198_v10  ;;  %v3527_v32 = vld [vmem:[#allocation11 + $0x38] sm:$0xff]  ;;  %v3178_v33 = vor.u32 %v3539_v30, %v3177_v29  ;;  %v3182_v35 = vor.u32 %v3538_v31, %v3179_v34  ;;  %v3169_v36 = vld [vmem:[#allocation14 + $0x40] sm:$0xf]  ;;  %v3537_v37 = vld [vmem:[#allocation14 + $0x44] sm:$0xf0]  ;;  %vm1408_vm7 = vcmask 261120  }
  0x8e   : > { %1262 = vmatpush.bf16.msra.mxu0 %v3527_v32  ;;  %v3536_v38 = vld [vmem:[#allocation14 + $0x44] sm:$0xf]  ;;  %v3526_v39 = vld [vmem:[#allocation11 + $0x30] sm:$0xff]  ;;  %v3170_v40 = vor.u32 %v3537_v37, %v3169_v36  ;;  %v3535_v44 = vld [vmem:[#allocation14 + $0x34] sm:$0xf0]  ;;  %s4478_s5 = smov 96  }
  0x8f   : > { %v3829_v3 = vpop.eup %3828  ;;  %v3171_v41 = vld [vmem:[#allocation14 + $0x48] sm:$0xf0]  ;;  %v3161_v43 = vld [vmem:[#allocation14 + $0x30] sm:$0xf]  ;;  %v3534_v45 = vld [vmem:[#allocation14 + $0x34] sm:$0xf] }
  0x90   : > { %v1139_v4 = vmul.f32 128.0, %v3829_v3  ;;  %vm1143_vm0 = vweird.f32 %v3829_v3  ;;  %1379 = vmatpush.bf16.msra.mxu1 %v3186_v26  ;;  %v3174_v42 = vor.u32 %v3536_v38, %v3171_v41  ;;  %v3525_v46 = vld [vmem:[#allocation11 + $0x28] sm:$0xff]  ;;  %v3162_v47 = vor.u32 %v3535_v44, %v3161_v43  ;;  %v3163_v48 = vld [vmem:[#allocation14 + $0x38] sm:$0xf0]  ;;  %v3153_v50 = vld [vmem:[#allocation14 + $0x20] sm:$0xf] }
  0x91   : > { %1136 = vadd.xlane.f32.xlu0 %v4885_v1  ;;  %1392 = vmatpush.bf16.msra.mxu2 %v3190_v28  ;;  %v3166_v49 = vor.u32 %v3534_v45, %v3163_v48  ;;  %v3533_v51 = vld [vmem:[#allocation14 + $0x24] sm:$0xf0]  ;;  %v3532_v52 = vld [vmem:[#allocation14 + $0x24] sm:$0xf]  ;;  %v3155_v55 = vld [vmem:[#allocation14 + $0x28] sm:$0xf0] }
  0x92   : > { %v1140_v11 = vsub.f32 1.0, %v1139_v4  ;;  %1263 = vmatpush.bf16.msra.mxu0 %v3526_v39  ;;  %v3524_v53 = vld [vmem:[#allocation11 + $0x20] sm:$0xff]  ;;  %v3154_v54 = vor.u32 %v3533_v51, %v3153_v50  ;;  %v3158_v56 = vor.u32 %v3532_v52, %v3155_v55  ;;  %v3145_v57 = vld [vmem:[#allocation14 + $0x10] sm:$0xf]  ;;  %v3531_v58 = vld [vmem:[#allocation14 + $0x14] sm:$0xf0] }
  0x93   : > { %v3530_v59 = vld [vmem:[#allocation14 + $0x14] sm:$0xf]  ;;  %v3146_v61 = vor.u32 %v3531_v58, %v3145_v57  ;;  %v3147_v62 = vld [vmem:[#allocation14 + $0x18] sm:$0xf0]  ;;  %v3529_v2 = vld [vmem:[#allocation14 + $0x4] sm:$0xf0] }
  0x94   : > { %v1141_v12 = vmul.f32 %v3829_v3, %v1140_v11  ;;  %1380 = vmatpush.bf16.msra.mxu1 %v3178_v33  ;;  %v3523_v60 = vld [vmem:[#allocation11 + $0x18] sm:$0xff]  ;;  %v3150_v63 = vor.u32 %v3530_v59, %v3147_v62  ;;  %v3522_v4 = vld [vmem:[#allocation11 + $0x10] sm:$0xff]  ;;  %v3521_v8 = vld [vmem:[#allocation11 + $0x8] sm:$0xff]  ;;  %vm1446_vm8 = vcmask 1043456   ;;  %s4479_s29 = smov 64   ;;  %vm1429_vm9 = vcmask 64512  }
  0x95   : > { %1393 = vmatpush.bf16.msra.mxu2 %v3182_v35  ;;  %v3139_v6 = vld [vmem:[#allocation14 + $0x8] sm:$0xf0]  ;;  %v3520_v10 = vld [vmem:[#allocation11] sm:$0xff]  ;;  %v3817_v27 = vld [vmem:[#allocation8] ss:$0 sm:$0xff]  ;;  %s4480_s13 = smov 32  }
  0x96   : > { %v1142_v13 = vadd.f32 %v3829_v3, %v1141_v12  ;;  %1264 = vmatpush.bf16.msra.mxu0 %v3525_v46  ;;  %v3818_v30 = vld [vmem:[#allocation10] ss:$0 sm:$0xff]  ;;  %s1121_s27 = scalar_lea.vmem [#allocation26], %s4842_s21  ;;  %s5269_s19 = sld [smem:[#allocation57_spill]]  ;;  %vm2047_vm13 = vcmask 130048  }
  0x97   : > { %s5270_s0 = sld [smem:[#allocation58_spill]]  ;;  %s1128_s24 = scalar_lea.vmem [#allocation28], %s4842_s21 }
  0x98   : > { %v4888_v14 = vsel %vm1143_vm0, %v3829_v3, %v1142_v13  ;;  %1381 = vmatpush.bf16.msra.mxu1 %v3170_v40  ;;  %v3528_v3 = vld [vmem:[#allocation14 + $0x4] sm:$0xf]  ;;  %s5271_s3 = sld [smem:[#allocation60_spill]]  ;;  %s2752_s23 = sshll.u32 %s1121_s27, 4  ;;  %s2753_s23 = int_to_ptr.vmem [resolvable:$true] %s2752_s23 }
  0x99   : > { %1394 = vmatpush.bf16.msra.mxu2 %v3174_v42  ;;  %v3142_v7 = vor.u32 %v3528_v3, %v3139_v6  ;;  %s5272_s22 = sld [smem:[#allocation63_spill]]  ;;  %s5081_s20 = scalar_lea.sflag [#allocation27], %s968_s6 }
  0x9a   : > { %1265 = vmatpush.bf16.msra.mxu0 %v3524_v53  ;;  %s5274_s25 = sld [smem:[#allocation65_spill]] }
  0x9b   : > { %s5275_s26 = sld [smem:[#allocation67_spill]] }
  0x9c   : > { %1382 = vmatpush.bf16.msra.mxu1 %v3162_v47  ;;  %s5276_s30 = sld [smem:[#allocation41_spill]] }
  0x9d   : > { %1395 = vmatpush.bf16.msra.mxu2 %v3166_v49  ;;  %s5278_s2 = sld [smem:[#allocation71_spill]] }
  0x9e   : > { %1266 = vmatpush.bf16.msra.mxu0 %v3523_v60 }
  0xa0   : > { %1383 = vmatpush.bf16.msra.mxu1 %v3154_v54 }
  0xa1   : > { %1396 = vmatpush.bf16.msra.mxu2 %v3158_v56 }
  0xa2   : > { %1267 = vmatpush.bf16.msra.mxu0 %v3522_v4  ;;  %s5071_s1 = sshll.u32 %s5276_s30, 3 }
  0xa3   : > { %s2750_s14 = scalar_lea.hbm %s5278_s2, %s5071_s1 }
  0xa4   : > { %1384 = vmatpush.bf16.msra.mxu1 %v3146_v61 }
  0xa5   : > { %1397 = vmatpush.bf16.msra.mxu2 %v3150_v63 }
  0xa6   : > { %1268 = vmatpush.bf16.msra.mxu0 %v3521_v8  ;;  %v3544_v8 = vld [vmem:[#allocation16] sm:$0xff] }
  0xa9   : > { %1398 = vmatpush.bf16.msra.mxu2 %v3142_v7  ;;  %v3545_v7 = vld [vmem:[#allocation16 + $0x8] sm:$0xff] }
  0xaa   : > { %1269 = vmatpush.bf16.msra.mxu0 %v3520_v10 }
  0xad   : > { %1583 = vmatpush.bf16.msrb.mxu2 %v3545_v7  ;;  %v3549_v7 = vld [vmem:[#allocation16 + $0x28] sm:$0xff] }
  0xb1   : > { %1584 = vmatpush.bf16.msrb.mxu2 %v3544_v8  ;;  %v3548_v8 = vld [vmem:[#allocation16 + $0x20] sm:$0xff] }
  0xfc   : > { %v1172_v15 = vpop.xlane.xlu0 %1171 }
  0xfd   : > { %v1173_v16 = vmul.f32 %v1172_v15, %v4888_v14 }
  0xff   : > { %v4891_v17 = vsub.f32 %v1131_v0, %v1173_v16  ;;  %v3137_v0 = vld [vmem:[#allocation14] sm:$0xf] }
 0x100   : > { %v3138_v5 = vor.u32 %v3529_v2, %v3137_v0 }
 0x101   : > { %v1175_v18 = vmul.f32 %v4891_v17, %v4891_v17 }
 0x102   : > { %1385 = vmatpush.bf16.msra.mxu1 %v3138_v5 }
 0x103   : > { %1176 = vadd.xlane.f32.xlu1 %v1175_v18 }
 0x104   : > { %v1137_v19 = vpop.xlane.xlu0 %1136 }
 0x105   : > { %v1145_v20 = vmul.f32 %v4888_v14, %v1137_v19 }
 0x107   : > { %v4897_v21 = vsub.f32 %v4885_v1, %v1145_v20 }
 0x109   : > { %v1147_v22 = vmul.f32 %v4897_v21, %v4897_v21 }
 0x10b   : > { %1148 = vadd.xlane.f32.xlu1 %v1147_v22 }
 0x176   : > { %v1177_v9 = vpop.xlane.xlu1 %1176 }
 0x177   : > { %v1178_v11 = vmul.f32 %v1177_v9, %v4888_v14 }
 0x179   : > { %v1179_v12 = vadd.f32 1e-05, %v1178_v11 }
 0x17b   : > { %3830 = vrsqrt.f32 %v1179_v12  ;;  %vm1186_vm2 = vweird.f32 %v1179_v12 }
 0x17e   : > { %v1149_v13 = vpop.xlane.xlu1 %1148 }
 0x17f   : > { %v1150_v15 = vmul.f32 %v1149_v13, %v4888_v14 }
 0x181   : > { %v3831_v16 = vpop.eup %3830  ;;  %v1151_v18 = vadd.f32 1e-05, %v1150_v15 }
 0x182   : > { %v1181_v19 = vmul.f32 %v3831_v16, %v1179_v12  ;;  %vm1187_vm1 = vweird.f32 %v3831_v16 }
 0x183   : > { %3832 = vrsqrt.f32 %v1151_v18  ;;  %vm1188_vm3 = vmor %vm1186_vm2, %vm1187_vm1  ;;  %vm1158_vm5 = vweird.f32 %v1151_v18 }
 0x184   : > { %v1182_v20 = vmul.f32 %v3831_v16, %v1181_v19 }
 0x186   : > { %v1183_v22 = vmul.f32 0.5, %v1182_v20 }
 0x188   : > { %v1184_v23 = vsub.f32 1.5, %v1183_v22 }
 0x189   : > { %v3833_v24 = vpop.eup %3832 }
 0x18a   : > { %v1185_v25 = vmul.f32 %v3831_v16, %v1184_v23  ;;  %v1153_v26 = vmul.f32 %v3833_v24, %v1151_v18  ;;  %vm1159_vm4 = vweird.f32 %v3833_v24 }
 0x18b   : > { %vm1160_vm6 = vmor %vm1158_vm5, %vm1159_vm4 }
 0x18c   : > { %v1154_v28 = vmul.f32 %v3833_v24, %v1153_v26  ;;  %v1189_v29 = vsel %vm1188_vm3, %v3831_v16, %v1185_v25 }
 0x18d   : > { %v1190_v31 = vmul.f32 %v1189_v29, %v4891_v17  ;;  %v1292_v17 = vld [vmem:[%s5268_s10] sm:$0x3] }
 0x18e   : > { %v1155_v32 = vmul.f32 0.5, %v1154_v28  ;;  %v1294_v43 = vperm.slane %v1292_v17, 0  ;;  %v1295_v47 = vperm.slane %v1292_v17, 1 }
 0x18f   : > { %v1191_v33 = vmul.f32 %v3817_v27, %v1190_v31 }
 0x190   : > { %v1156_v34 = vsub.f32 1.5, %v1155_v32 }
 0x191   : > { %v1192_v35 = vadd.f32 %v3818_v30, %v1191_v33 }
 0x192   : > { %v1157_v36 = vmul.f32 %v3833_v24, %v1156_v34 }
 0x193   : > { %v1275_v37 = vpack.c.bf16 %v1192_v35, %v1192_v35 }
 0x194   : > { %v1161_v38 = vsel %vm1160_vm6, %v3833_v24, %v1157_v36 }
 0x195   : > { %1386 = vmatmul.bf16.vlgmr.msra.gmra.mxu1 %v1275_v37  ;;  %1399 = vmatmul.bf16.vlgmr.msra.gmra.mxu2 %v1275_v37  ;;  %v1162_v39 = vmul.f32 %v1161_v38, %v4897_v21  ;;  %v3819_v21 = vld [vmem:[#allocation13] ss:$0 sm:$0xff] }
 0x197   : > { %v1166_v40 = vmul.f32 %v3817_v27, %v1162_v39 }
 0x199   : > { %v1170_v41 = vadd.f32 %v3818_v30, %v1166_v40 }
 0x19b   : > { %v1193_v42 = vpack.c.bf16 %v1170_v41, %v1170_v41 }
 0x19d   : > { %1270 = vmatmul.bf16.vlgmr.msra.gmra.mxu0 %v1193_v42 }
 0x212   : > { %v1387_v44 = vpop.f32.mrf.mxu1 }
 0x213   : > { %v1388_v45 = vadd.f32 %v1387_v44, %v1294_v43 }
 0x215   : > { %v1406_v46 = vpack.c.bf16 %v1388_v45, %v1388_v45 }
 0x217   : > { %1472 = vrot.lane.b32.xlu0 %v1406_v46, %s4478_s5  ;;  %v1413_v48 = vsel %vm1408_vm7, %v1406_v46, 0 }
 0x218   : > { %v1400_v49 = vpop.f32.mrf.mxu2  ;;  %1422 = vmatpush.bf16.xpose.msra.mxu3 %v1413_v48 }
 0x219   : > { %v1401_v50 = vadd.f32 %v1400_v49, %v1295_v47 }
 0x21a   : > { %v1271_v51 = vpop.f32.mrf.mxu0  ;;  %v1389_v52 = vpop.f32.mrf.mxu1 }
 0x21b   : > { %v4910_v53 = vpack.c.bf16 %v1401_v50, %v1401_v50  ;;  %v1272_v54 = vadd.f32 %v3819_v21, %v1271_v51 }
 0x21d   : > { %v1405_v55 = vpack.c.bf16 %v1272_v54, %v1272_v54  ;;  %v1448_v56 = vsel %vm1446_vm8, %v4910_v53, 0 }
 0x21f   : > { %1592 = vrot.lane.b32.xlu0 %v1406_v46, %s4479_s29  ;;  %1469 = vrot.lane.b32.xlu1 %v1405_v55, %s4478_s5 }
 0x220   : > { %1457 = vmatpush.bf16.msrb.mxu3 %v1448_v56  ;;  %v1402_v57 = vpop.f32.mrf.mxu2 }
 0x221   : > { %3199 = vmatmul.msk.bf16.vlgmr.msra.gmra.mxu3 %vm1408_vm7, %v1405_v55 }
 0x222   : > { %v1273_v58 = vpop.f32.mrf.mxu0 }
 0x227   : > { %1590 = vrot.lane.b32.xlu1 %v1405_v55, %s4479_s29 }
 0x289   : > { %v1473_v59 = vpop.permute.xlu0 %1472 }
 0x28a   : > { %v1478_v60 = vsel %vm1408_vm7, %v1473_v59, 0 }
 0x28b   : > { %1487 = vmatpush.bf16.xpose.msra.mxu3 %v1478_v60 }
 0x291   : > { %v1593_v13 = vpop.permute.xlu0 %1592  ;;  %v1470_v19 = vpop.permute.xlu1 %1469 }
 0x292   : > { %v1598_v18 = vsel %vm1408_vm7, %v1593_v13, 0 }
 0x299   : > { %v1591_v20 = vpop.permute.xlu1 %1590 }
 0x2a4   : > { %v1424_v61 = vpop.f32.mrf.mxu3 }
 0x2a5   : > { %v1428_v62 = vmul.f32 0.17677669, %v1424_v61 }
 0x2a7   : > { %v1430_v63 = vsel %vm1429_vm9, %v1428_v62, -inf }
 0x2a8   : > { %1431 = vmax.xlane.f32.xlu2 %v1430_v63 }
 0x2ac   : > { %v1426_v0 = vpop.f32.mrf.mxu3 }
 0x31b   : > { %v1432_v2 = vpop.xlane.xlu2 %1431 }
 0x31c   : > { %v1433_v3 = vsub.f32 %v1428_v62, %v1432_v2 }
 0x31e   : > { %v1434_v4 = vmul.f32 1.442695, %v1433_v3 }
 0x320   : > { %3834 = vpow2.f32 %v1434_v4 }
 0x326   : > { %v3835_v5 = vpop.eup %3834 }
 0x327   : > { %v1436_v6 = vsel %vm1429_vm9, %v3835_v5, 0.0 }
 0x328   : > { %1437 = vadd.xlane.f32.xlu2 %v1436_v6  ;;  %v3546_v6 = vld [vmem:[#allocation16 + $0x10] sm:$0xff] }
 0x340   : > { %1684 = vrot.lane.b32.xlu2 %v1406_v46, %s4480_s13 }
 0x348   : > { %1682 = vrot.lane.b32.xlu2 %v1405_v55, %s4480_s13 }
 0x39b   : > { %v1438_v9 = vpop.xlane.xlu2 %1437 }
 0x39c   : > { %3836 = vrcp.f32 %v1438_v9 }
 0x3a2   : > { %v3837_v10 = vpop.eup %3836 }
 0x3a3   : > { %v4923_v11 = vmul.f32 %v3837_v10, %v3835_v5  ;;  %v1685_v12 = vpop.permute.xlu2 %1684  ;;  %v3547_v5 = vld [vmem:[#allocation16 + $0x18] sm:$0xff] }
 0x3a4   : > { %v1690_v15 = vsel %vm1408_vm7, %v1685_v12, 0  ;;  %1555 = vmatpush.bf16.msrb.mxu1 %v3547_v5 }
 0x3a5   : > { %1699 = vmatpush.bf16.xpose.msra.mxu2 %v1690_v15  ;;  %v1442_v16 = vpack.c.bf16 %v4923_v11, %v4923_v11 }
 0x3a7   : > { %3200 = vmatmul.msk.bf16.vlgmr.msrb.gmra.mxu3 %vm1429_vm9, %v1442_v16 }
 0x3a8   : > { %1607 = vmatpush.bf16.xpose.msrb.mxu3 %v1598_v18  ;;  %1556 = vmatpush.bf16.msrb.mxu1 %v3546_v6  ;;  %v1132_v6 = vld [vmem:[%s4859_s18] sm:$0xff] }
 0x3ab   : > { %v1683_v27 = vpop.permute.xlu2 %1682 }
 0x3ac   : > { %1674 = vmatpush.bf16.msra.mxu1 %v3549_v7  ;;  %v1133_v7 = vld [vmem:[%s4859_s18 + $0x8] sm:$0xff] }
 0x3b0   : > { %1675 = vmatpush.bf16.msra.mxu1 %v3548_v8  ;;  %v4974_v8 = vpack.c.bf16 %v1133_v7, %v1132_v6  ;;  %v3287_v6 = vld [vmem:[#allocation19 + $0x18] sm:$0xf0] }
 0x3b7   : > { %3201 = vmatmul.msk.bf16.vlgmr.msra.gmra.mxu3 %vm1408_vm7, %v1470_v19 }
 0x3c7   : > { %3221 = vmatmul.msk.bf16.vlgmr.msrb.gmra.mxu3 %vm1408_vm7, %v1591_v20 }
 0x42a   : > { %v1459_v22 = vpop.f32.mrf.mxu3 }
 0x42b   : > { %v1463_v23 = vpack.c.bf16 %v1459_v22, %v1459_v22 }
 0x42d   : > { %3220 = vmatmul.msk.bf16.vlgmr.msrb.gmra.mxu2 %vm1408_vm7, %v1463_v23 }
 0x432   : > { %v1461_v24 = vpop.f32.mrf.mxu3 }
 0x43a   : > { %v1489_v25 = vpop.f32.mrf.mxu3 }
 0x43b   : > { %v1493_v26 = vmul.f32 0.17677669, %v1489_v25  ;;  %v3551_v25 = vld [vmem:[#allocation16 + $0x38] sm:$0xff] }
 0x43d   : > { %3232 = vmatmul.msk.bf16.vlgmr.msra.gmra.mxu2 %vm1408_vm7, %v1683_v27  ;;  %v1494_v28 = vsel %vm1429_vm9, %v1493_v26, -inf }
 0x43e   : > { %1495 = vmax.xlane.f32.xlu0 %v1494_v28 }
 0x442   : > { %v1491_v29 = vpop.f32.mrf.mxu3 }
 0x44a   : > { %v1609_v30 = vpop.f32.mrf.mxu3 }
 0x44b   : > { %v1613_v31 = vmul.f32 0.17677669, %v1609_v30 }
 0x44d   : > { %v1614_v32 = vsel %vm1429_vm9, %v1613_v31, -inf }
 0x44e   : > { %1615 = vmax.xlane.f32.xlu1 %v1614_v32 }
 0x452   : > { %v1611_v33 = vpop.f32.mrf.mxu3 }
 0x4b0   : > { %v4936_v34 = vpop.f32.mrf.mxu2 }
 0x4b1   : > { %v1496_v35 = vpop.xlane.xlu0 %1495 }
 0x4b2   : > { %v1497_v36 = vsub.f32 %v1493_v26, %v1496_v35  ;;  %v3550_v26 = vld [vmem:[#allocation16 + $0x30] sm:$0xff] }
 0x4b4   : > { %v1498_v37 = vmul.f32 1.442695, %v1497_v36 }
 0x4b6   : > { %3838 = vpow2.f32 %v1498_v37  ;;  %v3820_v37 = vld [vmem:[%s5269_s19] ss:$0 sm:$0xff] }
 0x4b8   : > { %v1588_v38 = vpop.f32.mrf.mxu2 }
 0x4bc   : > { %v3839_v39 = vpop.eup %3838 }
 0x4bd   : > { %v1500_v40 = vsel %vm1429_vm9, %v3839_v39, 0.0 }
 0x4be   : > { %1501 = vadd.xlane.f32.xlu0 %v1500_v40 }
 0x4c0   : > { %v1701_v41 = vpop.f32.mrf.mxu2 }
 0x4c1   : > { %v1705_v42 = vmul.f32 0.17677669, %v1701_v41  ;;  %v1616_v17 = vpop.xlane.xlu1 %1615 }
 0x4c2   : > { %v1617_v43 = vsub.f32 %v1613_v31, %v1616_v17  ;;  %v3575_v17 = vld [vmem:[#allocation19 + $0x74] sm:$0xf0] }
 0x4c3   : > { %v1706_v44 = vsel %vm1429_vm9, %v1705_v42, -inf }
 0x4c4   : > { %v1618_v45 = vmul.f32 1.442695, %v1617_v43  ;;  %1707 = vmax.xlane.f32.xlu2 %v1706_v44  ;;  %v3325_v43 = vld [vmem:[#allocation19 + $0x60] sm:$0xf] }
 0x4c6   : > { %3840 = vpow2.f32 %v1618_v45  ;;  %v3573_v45 = vld [vmem:[#allocation19 + $0x64] sm:$0xf0] }
 0x4c8   : > { %v1703_v46 = vpop.f32.mrf.mxu2 }
 0x4c9   : > { %v3326_v46 = vor.u32 %v3573_v45, %v3325_v43 }
 0x4cc   : > { %v3841_v47 = vpop.eup %3840 }
 0x4cd   : > { %v1620_v48 = vsel %vm1429_vm9, %v3841_v47, 0.0 }
 0x4ce   : > { %1621 = vadd.xlane.f32.xlu0 %v1620_v48  ;;  %v3571_v48 = vld [vmem:[#allocation19 + $0x54] sm:$0xf0] }
 0x4dc   : > { %1508 = vrot.lane.b32.xlu2 %v4910_v53, %s4478_s5 }
 0x4e2   : > { %1627 = vrot.lane.b32.xlu0 %v4910_v53, %s4479_s29 }
 0x531   : > { %v1502_v21 = vpop.xlane.xlu0 %1501 }
 0x532   : > { %3842 = vrcp.f32 %v1502_v21  ;;  %v3559_v21 = vld [vmem:[#allocation17 + $0x38] sm:$0xff] }
 0x537   : > { %v1708_v49 = vpop.xlane.xlu2 %1707 }
 0x538   : > { %v1709_v50 = vsub.f32 %v1705_v42, %v1708_v49  ;;  %v3843_v52 = vpop.eup %3842  ;;  %v3333_v42 = vld [vmem:[#allocation19 + $0x70] sm:$0xf] }
 0x539   : > { %v1504_v54 = vmul.f32 %v3843_v52, %v3839_v39  ;;  %v3334_v44 = vor.u32 %v3575_v17, %v3333_v42  ;;  %v3301_v52 = vld [vmem:[#allocation19 + $0x30] sm:$0xf]  ;;  %v3823_v17 = vld [vmem:[%s5271_s3] ss:$0 sm:$0xff]  ;;  %s2754_s3 = sshll.u32 %s2750_s14, 4  ;;  %s2755_s3 = int_to_ptr.hbm [resolvable:$true] %s2754_s3 }
 0x53a   : > { %v1710_v51 = vmul.f32 1.442695, %v1709_v50  ;;  %v3309_v50 = vld [vmem:[#allocation19 + $0x40] sm:$0xf]  ;;  %s4304_s18 = sshra.s32 %s2755_s3, 4  ;;  %s4305_s18 = int_to_ptr.hbm [resolvable:$true] %s4304_s18 }
 0x53b   : > { %v1506_v59 = vpack.c.bf16 %v1504_v54, %v1504_v54  ;;  %v1505_v62 = vadd.f32 %v1504_v54, %v4923_v11  ;;  %1995 = vmatpush.bf16.msrb.mxu2 %v3334_v44  ;;  %v3567_v54 = vld [vmem:[#allocation19 + $0x34] sm:$0xf0]  ;;  %p4311_p6 = scmp.lt.s32.totalorder %s4305_s18, %s5278_s2 }
 0x53c   : > { %3844 = vpow2.f32 %v1710_v51  ;;  %v3569_v51 = vld [vmem:[#allocation19 + $0x44] sm:$0xf0] }
 0x53f   : > { %v1509_v55 = vpop.permute.xlu2 %1508  ;;  %1996 = vmatpush.bf16.msrb.mxu2 %v3326_v46 }
 0x540   : > { %v1514_v56 = vsel %vm1446_vm8, %v1509_v55, 0  ;;  %v3302_v55 = vor.u32 %v3567_v54, %v3301_v52  ;;  %v3327_v52 = vld [vmem:[#allocation19 + $0x68] sm:$0xf0] }
 0x541   : > { %1523 = vmatpush.bf16.msrb.mxu0 %v1514_v56  ;;  %v1622_v57 = vpop.xlane.xlu0 %1621  ;;  %v3293_v56 = vld [vmem:[#allocation19 + $0x20] sm:$0xf] }
 0x542   : > { %v3845_v58 = vpop.eup %3844  ;;  %3846 = vrcp.f32 %v1622_v57  ;;  %v3565_v57 = vld [vmem:[#allocation19 + $0x24] sm:$0xf0] }
 0x543   : > { %v1712_v60 = vsel %vm1429_vm9, %v3845_v58, 0.0 }
 0x544   : > { %1713 = vadd.xlane.f32.xlu1 %v1712_v60  ;;  %3202 = vmatmul.msk.bf16.vlgmr.msrb.gmra.mxu0 %vm1429_vm9, %v1506_v59  ;;  %v3285_v59 = vld [vmem:[#allocation19 + $0x10] sm:$0xf]  ;;  %v3563_v60 = vld [vmem:[#allocation19 + $0x14] sm:$0xf0] }
 0x548   : > { %v3847_v61 = vpop.eup %3846 }
 0x549   : > { %v1624_v63 = vmul.f32 %v3847_v61, %v3841_v47  ;;  %v3317_v47 = vld [vmem:[#allocation19 + $0x50] sm:$0xf]  ;;  %v3286_v61 = vor.u32 %v3563_v60, %v3285_v59  ;;  %v3568_v59 = vld [vmem:[#allocation19 + $0x44] sm:$0xf]  ;;  %v3311_v60 = vld [vmem:[#allocation19 + $0x48] sm:$0xf0] }
 0x54a   : > { %v3318_v49 = vor.u32 %v3571_v48, %v3317_v47 }
 0x54b   : > { %v1625_v0 = vadd.f32 %v1624_v63, %v1505_v62  ;;  %v1626_v4 = vpack.c.bf16 %v1624_v63, %v1624_v63  ;;  %v3277_v62 = vld [vmem:[#allocation19] sm:$0xf]  ;;  %v3561_v63 = vld [vmem:[#allocation19 + $0x4] sm:$0xf0] }
 0x54c   : > { %1997 = vmatpush.bf16.msrb.mxu2 %v3318_v49  ;;  %v3574_v49 = vld [vmem:[#allocation19 + $0x74] sm:$0xf] }
 0x554   : > { %v1628_v2 = vpop.permute.xlu0 %1627 }
 0x555   : > { %v1633_v3 = vsel %vm1446_vm8, %v1628_v2, 0 }
 0x556   : > { %1642 = vmatpush.bf16.msra.mxu0 %v1633_v3  ;;  %v3278_v3 = vor.u32 %v3561_v63, %v3277_v62  ;;  %v3566_v62 = vld [vmem:[#allocation19 + $0x34] sm:$0xf]  ;;  %v3303_v63 = vld [vmem:[#allocation19 + $0x38] sm:$0xf0] }
 0x559   : > { %3222 = vmatmul.msk.bf16.vlgmr.msra.gmra.mxu0 %vm1429_vm9, %v1626_v4 }
 0x55a   : > { %1766 = vmatpush.bf16.msrb.mxu0 %v3551_v25 }
 0x55d   : > { %1719 = vrot.lane.b32.xlu1 %v4910_v53, %s4480_s13 }
 0x55e   : > { %1767 = vmatpush.bf16.msrb.mxu0 %v3550_v26 }
 0x5b7   : > { %v1714_v9 = vpop.xlane.xlu1 %1713 }
 0x5b8   : > { %3848 = vrcp.f32 %v1714_v9  ;;  %v3558_v9 = vld [vmem:[#allocation17 + $0x30] sm:$0xff] }
 0x5be   : > { %v3849_v10 = vpop.eup %3848 }
 0x5bf   : > { %v1716_v11 = vmul.f32 %v3849_v10, %v3845_v58  ;;  %v3294_v58 = vor.u32 %v3565_v57, %v3293_v56  ;;  %v3557_v10 = vld [vmem:[#allocation17 + $0x28] sm:$0xff]  ;;  %v3570_v56 = vld [vmem:[#allocation19 + $0x54] sm:$0xf]  ;;  %v3319_v57 = vld [vmem:[#allocation19 + $0x58] sm:$0xf0] }
 0x5c1   : > { %v1717_v12 = vadd.f32 %v1716_v11, %v1625_v0  ;;  %v1525_v13 = vpop.f32.mrf.mxu0  ;;  %v1718_v20 = vpack.c.bf16 %v1716_v11, %v1716_v11  ;;  %v3556_v11 = vld [vmem:[#allocation17 + $0x20] sm:$0xff] }
 0x5c2   : > { %v1529_v15 = vpack.c.bf16 %v1525_v13, %v1525_v13  ;;  %v3554_v13 = vld [vmem:[#allocation17 + $0x10] sm:$0xff] }
 0x5c3   : > { %v1778_v16 = vmul.f32 0.25, %v1717_v12  ;;  %v3555_v12 = vld [vmem:[#allocation17 + $0x18] sm:$0xff] }
 0x5c4   : > { %3211 = vmatmul.msk.bf16.vlgmr.msrb.gmra.mxu1 %vm1408_vm7, %v1529_v15  ;;  %v3553_v15 = vld [vmem:[#allocation17 + $0x8] sm:$0xff] }
 0x5c5   : > { %2711 = vst.msk [vmem:[%s1121_s27] sm:$0xff] %vm1429_vm9, %v1778_v16  ;;  %1879 = vmatpush.bf16.msrb.mxu1 %v3559_v21  ;;  %v3552_v16 = vld [vmem:[#allocation17] sm:$0xff] }
 0x5c9   : > { %v1527_v53 = vpop.f32.mrf.mxu0  ;;  %1880 = vmatpush.bf16.msrb.mxu1 %v3558_v9  ;;  %v3560_v9 = vld [vmem:[#allocation19 + $0x4] sm:$0xf] }
 0x5cd   : > { %1881 = vmatpush.bf16.msrb.mxu1 %v3557_v10  ;;  %v3279_v10 = vld [vmem:[#allocation19 + $0x8] sm:$0xf0] }
 0x5cf   : > { %v1720_v18 = vpop.permute.xlu1 %1719 }
 0x5d0   : > { %v1725_v19 = vsel %vm1446_vm8, %v1720_v18, 0 }
 0x5d1   : > { %1734 = vmatpush.bf16.msra.mxu3 %v1725_v19  ;;  %1882 = vmatpush.bf16.msrb.mxu1 %v3556_v11  ;;  %v3282_v11 = vor.u32 %v3560_v9, %v3279_v10 }
 0x5d4   : > { %3233 = vmatmul.msk.bf16.vlgmr.msra.gmra.mxu3 %vm1429_vm9, %v1718_v20 }
 0x5d5   : > { %1883 = vmatpush.bf16.msrb.mxu1 %v3555_v12 }
 0x5d6   : > { %v1644_v22 = vpop.f32.mrf.mxu0 }
 0x5d7   : > { %v1648_v23 = vpack.c.bf16 %v1644_v22, %v1644_v22 }
 0x5d9   : > { %3231 = vmatmul.msk.bf16.vlgmr.msra.gmra.mxu1 %vm1408_vm7, %v1648_v23 }
 0x5da   : > { %1884 = vmatpush.bf16.msrb.mxu1 %v3554_v13 }
 0x5de   : > { %v1646_v24 = vpop.f32.mrf.mxu0  ;;  %1885 = vmatpush.bf16.msrb.mxu1 %v3553_v15 }
 0x5e2   : > { %1886 = vmatpush.bf16.msrb.mxu1 %v3552_v16 }
 0x641   : > { %v1558_v27 = vpop.f32.mrf.mxu1 }
 0x642   : > { %v1587_v29 = vadd.f32 %v4936_v34, %v1558_v27  ;;  %v3821_v27 = vld [vmem:[%s5270_s0] ss:$0 sm:$0xff] }
 0x649   : > { %v1560_v28 = vpop.f32.mrf.mxu1 }
 0x656   : > { %v1677_v30 = vpop.f32.mrf.mxu1 }
 0x657   : > { %v1681_v31 = vadd.f32 %v1677_v30, %v1587_v29  ;;  %v1736_v32 = vpop.f32.mrf.mxu3  ;;  %v3822_v30 = vld [vmem:[%s5168_s12] ss:$0 sm:$0xff] }
 0x658   : > { %v1740_v33 = vpack.c.bf16 %v1736_v32, %v1736_v32 }
 0x65a   : > { %3242 = vmatmul.msk.bf16.vlgmr.msrb.gmra.mxu0 %vm1408_vm7, %v1740_v33 }
 0x65e   : > { %v1679_v35 = vpop.f32.mrf.mxu1 }
 0x65f   : > { %v1738_v36 = vpop.f32.mrf.mxu3  ;;  %v4987_v35 = vld [vmem:[%s5172_s16] sm:$0x3] }
 0x6d7   : > { %v1769_v38 = vpop.f32.mrf.mxu0 }
 0x6d8   : > { %v1773_v39 = vadd.f32 %v1769_v38, %v1681_v31 }
 0x6da   : > { %v1777_v40 = vadd.f32 %v3820_v37, %v1773_v39  ;;  %v1911_v37 = vperm.slane %v4987_v35, 0 }
 0x6dc   : > { %v4967_v41 = vadd.f32 %v1777_v40, %v4885_v1  ;;  %v3310_v1 = vor.u32 %v3569_v51, %v3309_v50  ;;  %v3335_v50 = vld [vmem:[#allocation19 + $0x78] sm:$0xf0]  ;;  %v3572_v51 = vld [vmem:[#allocation19 + $0x64] sm:$0xf] }
 0x6de   : > { %1782 = vadd.xlane.f32.xlu2 %v4967_v41  ;;  %1998 = vmatpush.bf16.msrb.mxu2 %v3310_v1  ;;  %v3338_v1 = vor.u32 %v3574_v49, %v3335_v50 }
 0x6df   : > { %v1771_v34 = vpop.f32.mrf.mxu0 }
 0x6e0   : > { %2009 = vmatpush.bf16.msrb.mxu3 %v3338_v1 }
 0x6e2   : > { %1999 = vmatpush.bf16.msrb.mxu2 %v3302_v55  ;;  %v3330_v55 = vor.u32 %v3572_v51, %v3327_v52 }
 0x6e4   : > { %2010 = vmatpush.bf16.msrb.mxu3 %v3330_v55 }
 0x6e6   : > { %2000 = vmatpush.bf16.msrb.mxu2 %v3294_v58  ;;  %v3322_v58 = vor.u32 %v3570_v56, %v3319_v57 }
 0x6e8   : > { %2011 = vmatpush.bf16.msrb.mxu3 %v3322_v58 }
 0x6ea   : > { %2001 = vmatpush.bf16.msrb.mxu2 %v3286_v61  ;;  %v3314_v61 = vor.u32 %v3568_v59, %v3311_v60 }
 0x6ec   : > { %2012 = vmatpush.bf16.msrb.mxu3 %v3314_v61 }
 0x6ee   : > { %2002 = vmatpush.bf16.msrb.mxu2 %v3278_v3  ;;  %v3295_v3 = vld [vmem:[#allocation19 + $0x28] sm:$0xf0] }
 0x6f1   : > { %2003 = vmatmul.bf16.vlgmr.msrb.gmra.mxu2 %v4974_v8 }
 0x751   : > { %v1783_v0 = vpop.xlane.xlu2 %1782 }
 0x752   : > { %v1784_v2 = vmul.f32 %v1783_v0, %v4888_v14  ;;  %v3306_v0 = vor.u32 %v3566_v62, %v3303_v63 }
 0x754   : > { %v1785_v4 = vsub.f32 %v4967_v41, %v1784_v2  ;;  %v3564_v2 = vld [vmem:[#allocation19 + $0x24] sm:$0xf]  ;;  %2013 = vmatpush.bf16.msrb.mxu3 %v3306_v0 }
 0x756   : > { %v1786_v5 = vmul.f32 %v1785_v4, %v1785_v4 }
 0x758   : > { %1787 = vadd.xlane.f32.xlu0 %v1786_v5  ;;  %v3562_v5 = vld [vmem:[#allocation19 + $0x14] sm:$0xf] }
 0x759   : > { %v3290_v7 = vor.u32 %v3562_v5, %v3287_v6 }
 0x774   : > { %v2004_v36 = vpop.f32.mrf.mxu2 }
 0x775   : > { %v2005_v38 = vadd.f32 %v2004_v36, %v1911_v37 }
 0x77c   : > { %v2006_v39 = vpop.f32.mrf.mxu2 }
 0x77d   : > { %v2007_v40 = vadd.f32 %v2006_v39, %v1911_v37 }
 0x77f   : > { %v2025_v34 = vpack.c.bf16 %v2007_v40, %v2005_v38 }
 0x781   : > { %v2031_v42 = vsel %vm1408_vm7, %v2025_v34, 0 }
 0x782   : > { %2040 = vmatpush.bf16.xpose.msra.mxu0 %v2031_v42 }
 0x7cb   : > { %v1788_v53 = vpop.xlane.xlu0 %1787 }
 0x7cc   : > { %v1789_v18 = vmul.f32 %v1788_v53, %v4888_v14 }
 0x7ce   : > { %v1790_v19 = vadd.f32 1e-05, %v1789_v18 }
 0x7d0   : > { %3850 = vrsqrt.f32 %v1790_v19  ;;  %vm1797_vm11 = vweird.f32 %v1790_v19 }
 0x7d6   : > { %v3851_v20 = vpop.eup %3850 }
 0x7d7   : > { %v1792_v22 = vmul.f32 %v3851_v20, %v1790_v19  ;;  %vm1798_vm10 = vweird.f32 %v3851_v20  ;;  %v1912_v19 = vperm.slane %v4987_v35, 1 }
 0x7d8   : > { %vm1799_vm12 = vmor %vm1797_vm11, %vm1798_vm10 }
 0x7d9   : > { %v1793_v23 = vmul.f32 %v3851_v20, %v1792_v22 }
 0x7db   : > { %v1794_v24 = vmul.f32 0.5, %v1793_v23 }
 0x7dd   : > { %v1795_v25 = vsub.f32 1.5, %v1794_v24 }
 0x7df   : > { %v1796_v26 = vmul.f32 %v3851_v20, %v1795_v25  ;;  %v3576_v25 = vld [vmem:[#allocation20] sm:$0xff] }
 0x7e1   : > { %v1800_v28 = vsel %vm1799_vm12, %v3851_v20, %v1796_v26 }
 0x7e2   : > { %v1801_v29 = vmul.f32 %v1800_v28, %v1785_v4  ;;  %v3298_v4 = vor.u32 %v3564_v2, %v3295_v3 }
 0x7e4   : > { %v1805_v31 = vmul.f32 %v3821_v27, %v1801_v29  ;;  %2014 = vmatpush.bf16.msrb.mxu3 %v3298_v4 }
 0x7e6   : > { %v1809_v32 = vadd.f32 %v3822_v30, %v1805_v31 }
 0x7e8   : > { %v1810_v33 = vpack.c.bf16 %v1809_v32, %v1809_v32  ;;  %2015 = vmatpush.bf16.msrb.mxu3 %v3290_v7 }
 0x7ea   : > { %1887 = vmatmul.bf16.vlgmr.msrb.gmra.mxu1 %v1810_v33 }
 0x7ec   : > { %2016 = vmatpush.bf16.msrb.mxu3 %v3282_v11  ;;  %v3579_v11 = vld [vmem:[#allocation20 + $0x18] sm:$0xff] }
 0x7ef   : > { %2017 = vmatmul.bf16.vlgmr.msrb.gmra.mxu3 %v4974_v8  ;;  %v3577_v8 = vld [vmem:[#allocation20 + $0x8] sm:$0xff] }
 0x7f0   : > { %2167 = vmatpush.bf16.msra.mxu3 %v3579_v11  ;;  %v3427_v11 = vld [vmem:[#allocation22 + $0x58] sm:$0xf0] }
 0x867   : > { %v1888_v43 = vpop.f32.mrf.mxu1 }
 0x868   : > { %v1889_v44 = vadd.f32 %v3823_v17, %v1888_v43 }
 0x86a   : > { %v2024_v45 = vpack.c.bf16 %v1889_v44, %v1889_v44 }
 0x86c   : > { %2083 = vrot.lane.b32.xlu0 %v2024_v45, %s4478_s5  ;;  %3339 = vmatmul.msk.bf16.vlgmr.msra.gmra.mxu0 %vm1408_vm7, %v2024_v45 }
 0x86f   : > { %v1890_v46 = vpop.f32.mrf.mxu1 }
 0x872   : > { %v2018_v18 = vpop.f32.mrf.mxu3 }
 0x873   : > { %v2019_v20 = vadd.f32 %v2018_v18, %v1912_v19 }
 0x874   : > { %2202 = vrot.lane.b32.xlu0 %v2024_v45, %s4479_s29 }
 0x87a   : > { %v2020_v22 = vpop.f32.mrf.mxu3 }
 0x87b   : > { %v2021_v23 = vadd.f32 %v2020_v22, %v1912_v19 }
 0x87d   : > { %v5005_v24 = vpack.c.bf16 %v2021_v23, %v2019_v20  ;;  %v3578_v23 = vld [vmem:[#allocation20 + $0x10] sm:$0xff] }
 0x87e   : > { %2168 = vmatpush.bf16.msra.mxu3 %v3578_v23  ;;  %v3590_v23 = vld [vmem:[#allocation22 + $0x34] sm:$0xf] }
 0x87f   : > { %2071 = vmatpush.bf16.msrb.mxu0 %v5005_v24 }
 0x883   : > { %2195 = vmatpush.bf16.msra.mxu0 %v3577_v8  ;;  %v3581_v8 = vld [vmem:[#allocation20 + $0x28] sm:$0xff] }
 0x884   : > { %2284 = vmatpush.bf16.msrb.mxu3 %v3581_v8 }
 0x887   : > { %2196 = vmatpush.bf16.msra.mxu0 %v3576_v25 }
 0x8de   : > { %v2084_v35 = vpop.permute.xlu0 %2083 }
 0x8e6   : > { %v2203_v38 = vpop.permute.xlu0 %2202 }
 0x8e9   : > { %v2042_v47 = vpop.f32.mrf.mxu0 }
 0x8ea   : > { %v2046_v48 = vmul.f32 0.17677669, %v2042_v47 }
 0x8ec   : > { %v2048_v21 = vsel %vm2047_vm13, %v2046_v48, -inf }
 0x8ed   : > { %2049 = vmax.xlane.f32.xlu1 %v2048_v21 }
 0x8f1   : > { %v2044_v54 = vpop.f32.mrf.mxu0 }
 0x906   : > { %2204 = vrot.lane.b32.xlu1 %v2025_v34, %s4479_s29 }
 0x90e   : > { %2292 = vrot.lane.b32.xlu1 %v2024_v45, %s4480_s13 }
 0x960   : > { %v2050_v12 = vpop.xlane.xlu1 %2049 }
 0x961   : > { %v2051_v13 = vsub.f32 %v2046_v48, %v2050_v12 }
 0x963   : > { %v2052_v15 = vmul.f32 1.442695, %v2051_v13 }
 0x965   : > { %3852 = vpow2.f32 %v2052_v15 }
 0x96b   : > { %v3853_v16 = vpop.eup %3852 }
 0x96c   : > { %v2054_v53 = vsel %vm2047_vm13, %v3853_v16, 0.0 }
 0x96d   : > { %2055 = vadd.xlane.f32.xlu2 %v2054_v53 }
 0x978   : > { %v2205_v28 = vpop.permute.xlu1 %2204 }
 0x979   : > { %v2210_v32 = vsel %vm1408_vm7, %v2205_v28, 0  ;;  %v3580_v28 = vld [vmem:[#allocation20 + $0x20] sm:$0xff] }
 0x97a   : > { %2285 = vmatpush.bf16.msrb.mxu3 %v3580_v28  ;;  %v3589_v28 = vld [vmem:[#allocation22 + $0x24] sm:$0xf0] }
 0x980   : > { %v2293_v45 = vpop.permute.xlu1 %2292 }
 0x985   : > { %2086 = vrot.lane.b32.xlu2 %v2025_v34, %s4478_s5 }
 0x98d   : > { %2294 = vrot.lane.b32.xlu2 %v2025_v34, %s4480_s13 }
 0x9e0   : > { %v2056_v26 = vpop.xlane.xlu2 %2055 }
 0x9e1   : > { %3854 = vrcp.f32 %v2056_v26 }
 0x9e7   : > { %v3855_v27 = vpop.eup %3854 }
 0x9e8   : > { %v5008_v29 = vmul.f32 %v3855_v27, %v3853_v16  ;;  %v2087_v30 = vpop.permute.xlu2 %2086 }
 0x9e9   : > { %v2092_v31 = vsel %vm1408_vm7, %v2087_v30, 0 }
 0x9ea   : > { %v2060_v33 = vpack.c.bf16 %v5008_v29, %v5008_v29  ;;  %2101 = vmatpush.bf16.xpose.msra.mxu1 %v2092_v31 }
 0x9ec   : > { %3340 = vmatmul.msk.bf16.vlgmr.msrb.gmra.mxu0 %vm2047_vm13, %v2060_v33 }
 0x9f0   : > { %v2295_v36 = vpop.permute.xlu2 %2294 }
 0x9f1   : > { %v2300_v37 = vsel %vm1408_vm7, %v2295_v36, 0  ;;  %3341 = vmatmul.msk.bf16.vlgmr.msra.gmra.mxu1 %vm1408_vm7, %v2084_v35 }
 0x9f2   : > { %2219 = vmatpush.bf16.xpose.msrb.mxu1 %v2210_v32  ;;  %2309 = vmatpush.bf16.xpose.msrb.mxu0 %v2300_v37 }
 0xa01   : > { %3361 = vmatmul.msk.bf16.vlgmr.msrb.gmra.mxu1 %vm1408_vm7, %v2203_v38 }
 0xa69   : > { %v2073_v39 = vpop.f32.mrf.mxu0 }
 0xa6a   : > { %v2077_v40 = vpack.c.bf16 %v2073_v39, %v2073_v39  ;;  %v3583_v39 = vld [vmem:[#allocation20 + $0x38] sm:$0xff] }
 0xa6c   : > { %3360 = vmatmul.msk.bf16.vlgmr.msra.gmra.mxu0 %vm1408_vm7, %v2077_v40  ;;  %v3582_v40 = vld [vmem:[#allocation20 + $0x30] sm:$0xff] }
 0xa6e   : > { %v2103_v34 = vpop.f32.mrf.mxu1 }
 0xa6f   : > { %v2107_v42 = vmul.f32 0.17677669, %v2103_v34 }
 0xa71   : > { %v2075_v17 = vpop.f32.mrf.mxu0  ;;  %v2108_v43 = vsel %vm2047_vm13, %v2107_v42, -inf }
 0xa72   : > { %2109 = vmax.xlane.f32.xlu0 %v2108_v43 }
 0xa76   : > { %v2105_v44 = vpop.f32.mrf.mxu1 }
 0xa7c   : > { %3372 = vmatmul.msk.bf16.vlgmr.msrb.gmra.mxu0 %vm1408_vm7, %v2293_v45 }
 0xa7e   : > { %v2221_v46 = vpop.f32.mrf.mxu1 }
 0xa7f   : > { %v2225_v47 = vmul.f32 0.17677669, %v2221_v46 }
 0xa81   : > { %v2226_v48 = vsel %vm2047_vm13, %v2225_v47, -inf }
 0xa82   : > { %2227 = vmax.xlane.f32.xlu2 %v2226_v48 }
 0xa86   : > { %v2223_v21 = vpop.f32.mrf.mxu1 }
 0xa87   : > { %v3824_v21 = vld [vmem:[%s5272_s22] ss:$0 sm:$0xff]  ;;  %s4306_s22 = scalar_lea.hbm %s4305_s18, 8 }
 0xa88   : > { %p4307_p1 = scmp.ne.s32.totalorder %s4305_s18, %s4306_s22 }
 0xa8a   : > { %p4308_p3 = pnand %p4307_p1, %p4732_p5 }
 0xa8c   : > { %p4309_p4 = pneg %p4308_p3 }
 0xa9a   : > { %2122 = vrot.lane.b32.xlu2 %v5005_v24, %s4478_s5  ;;  %s5273_s5 = sld [smem:[#allocation64_spill]] }
 0xae5   : > { %v2110_v49 = vpop.xlane.xlu0 %2109 }
 0xae6   : > { %v2111_v50 = vsub.f32 %v2107_v42, %v2110_v49 }
 0xae8   : > { %v2112_v51 = vmul.f32 1.442695, %v2111_v50 }
 0xae9   : > { %v5024_v1 = vpop.f32.mrf.mxu0 }
 0xaea   : > { %3856 = vpow2.f32 %v2112_v51 }
 0xaf0   : > { %v3857_v52 = vpop.eup %3856 }
 0xaf1   : > { %v2200_v54 = vpop.f32.mrf.mxu0  ;;  %v2114_v55 = vsel %vm2047_vm13, %v3857_v52, 0.0 }
 0xaf2   : > { %2115 = vadd.xlane.f32.xlu0 %v2114_v55  ;;  %v3441_v55 = vld [vmem:[#allocation22 + $0x70] sm:$0xf] }
 0xaf5   : > { %v2228_v56 = vpop.xlane.xlu2 %2227 }
 0xaf6   : > { %v2229_v57 = vsub.f32 %v2225_v47, %v2228_v56  ;;  %v3599_v56 = vld [vmem:[#allocation22 + $0x74] sm:$0xf0] }
 0xaf8   : > { %v2230_v58 = vmul.f32 1.442695, %v2229_v57  ;;  %v3598_v57 = vld [vmem:[#allocation22 + $0x74] sm:$0xf] }
 0xaf9   : > { %v2311_v59 = vpop.f32.mrf.mxu0 }
 0xafa   : > { %v2315_v60 = vmul.f32 0.17677669, %v2311_v59  ;;  %3858 = vpow2.f32 %v2230_v58  ;;  %v3443_v58 = vld [vmem:[#allocation22 + $0x78] sm:$0xf0] }
 0xafb   : > { %v3446_v59 = vor.u32 %v3598_v57, %v3443_v58 }
 0xafc   : > { %v2316_v61 = vsel %vm2047_vm13, %v2315_v60, -inf }
 0xafd   : > { %v2123_v62 = vpop.permute.xlu2 %2122  ;;  %2317 = vmax.xlane.f32.xlu1 %v2316_v61  ;;  %2534 = vmatpush.bf16.msra.mxu0 %v3446_v59 }
 0xafe   : > { %2135 = vmatpush.bf16.msra.mxu2 %v2123_v62 }
 0xb00   : > { %v3859_v63 = vpop.eup %3858 }
 0xb01   : > { %v2313_v0 = vpop.f32.mrf.mxu0  ;;  %v2232_v2 = vsel %vm2047_vm13, %v3859_v63, 0.0 }
 0xb02   : > { %v3597_v0 = vld [vmem:[#allocation22 + $0x64] sm:$0xf0] }
 0xb05   : > { %2233 = vadd.xlane.f32.xlu1 %v2232_v2  ;;  %v3596_v2 = vld [vmem:[#allocation22 + $0x64] sm:$0xf] }
 0xb1e   : > { %2239 = vrot.lane.b32.xlu1 %v5005_v24, %s4479_s29 }
 0xb65   : > { %v2116_v3 = vpop.xlane.xlu0 %2115 }
 0xb66   : > { %3860 = vrcp.f32 %v2116_v3 }
 0xb6c   : > { %v3861_v4 = vpop.eup %3860 }
 0xb6d   : > { %v2118_v5 = vmul.f32 %v3861_v4, %v3857_v52  ;;  %v3435_v4 = vld [vmem:[#allocation22 + $0x68] sm:$0xf0] }
 0xb6f   : > { %v2120_v6 = vpack.c.bf16 %v2118_v5, %v2118_v5  ;;  %v2119_v53 = vadd.f32 %v2118_v5, %v5008_v29  ;;  %v3438_v5 = vor.u32 %v3596_v2, %v3435_v4 }
 0xb70   : > { %v2318_v7 = vpop.xlane.xlu1 %2317 }
 0xb71   : > { %v2319_v9 = vsub.f32 %v2315_v60, %v2318_v7  ;;  %3342 = vmatmul.msk.bf16.vlgmr.msra.gmra.mxu2 %vm2047_vm13, %v2120_v6  ;;  %2535 = vmatpush.bf16.msra.mxu0 %v3438_v5  ;;  %v3425_v6 = vld [vmem:[#allocation22 + $0x50] sm:$0xf]  ;;  %v3595_v7 = vld [vmem:[#allocation22 + $0x54] sm:$0xf0] }
 0xb73   : > { %v2320_v10 = vmul.f32 1.442695, %v2319_v9  ;;  %v3594_v9 = vld [vmem:[#allocation22 + $0x54] sm:$0xf] }
 0xb75   : > { %3862 = vpow2.f32 %v2320_v10  ;;  %v3426_v10 = vor.u32 %v3595_v7, %v3425_v6  ;;  %v3609_v7 = vld [vmem:[#allocation23 + $0x48] sm:$0xff] }
 0xb78   : > { %v2234_v12 = vpop.xlane.xlu1 %2233 }
 0xb79   : > { %3864 = vrcp.f32 %v2234_v12  ;;  %v3430_v12 = vor.u32 %v3594_v9, %v3427_v11  ;;  %v3602_v9 = vld [vmem:[#allocation23 + $0x10] sm:$0xff]  ;;  %v3601_v11 = vld [vmem:[#allocation23 + $0x8] sm:$0xff] }
 0xb7b   : > { %v3863_v13 = vpop.eup %3862  ;;  %2536 = vmatpush.bf16.msra.mxu0 %v3430_v12  ;;  %v3600_v12 = vld [vmem:[#allocation23] sm:$0xff] }
 0xb7c   : > { %v2322_v15 = vsel %vm2047_vm13, %v3863_v13, 0.0 }
 0xb7d   : > { %2323 = vadd.xlane.f32.xlu0 %v2322_v15  ;;  %v3593_v15 = vld [vmem:[#allocation22 + $0x44] sm:$0xf0] }
 0xb7f   : > { %v3865_v16 = vpop.eup %3864 }
 0xb80   : > { %v2236_v18 = vmul.f32 %v3865_v16, %v3859_v63  ;;  %v3433_v63 = vld [vmem:[#allocation22 + $0x60] sm:$0xf]  ;;  %v3592_v16 = vld [vmem:[#allocation22 + $0x44] sm:$0xf] }
 0xb81   : > { %v3434_v3 = vor.u32 %v3597_v0, %v3433_v63  ;;  %v3825_v63 = vld [vmem:[%s5273_s5] ss:$0 sm:$0xff]  ;;  %s4310_s5 = scalar_lea.hbm %s5278_s2, 16 }
 0xb82   : > { %v2237_v19 = vadd.f32 %v2236_v18, %v2119_v53  ;;  %v2238_v22 = vpack.c.bf16 %v2236_v18, %v2236_v18  ;;  %v3419_v18 = vld [vmem:[#allocation22 + $0x48] sm:$0xf0]  ;;  %p4312_p8 = scmp.lt.s32.totalorder %s4310_s5, %s4306_s22 }
 0xb84   : > { %p4313_p10 = por %p4312_p8, %p4311_p6 }
 0xb86   : > { %p4314_p11 = pnand %p4313_p10, %p4309_p4 }
 0xb90   : > { %v2240_v20 = vpop.permute.xlu1 %2239 }
 0xb91   : > { %2329 = vrot.lane.b32.xlu0 %v5005_v24, %s4480_s13  ;;  %2252 = vmatpush.bf16.msrb.mxu2 %v2240_v20  ;;  %v3409_v20 = vld [vmem:[#allocation22 + $0x30] sm:$0xf] }
 0xb94   : > { %3362 = vmatmul.msk.bf16.vlgmr.msrb.gmra.mxu2 %vm2047_vm13, %v2238_v22  ;;  %v3591_v22 = vld [vmem:[#allocation22 + $0x34] sm:$0xf0] }
 0xb95   : > { %2374 = vmatpush.bf16.msra.mxu2 %v3583_v39  ;;  %v3410_v8 = vor.u32 %v3591_v22, %v3409_v20  ;;  %v3585_v39 = vld [vmem:[#allocation22 + $0x4] sm:$0xf0] }
 0xb99   : > { %2375 = vmatpush.bf16.msra.mxu2 %v3582_v40 }
 0xbf0   : > { %v2324_v25 = vpop.xlane.xlu0 %2323 }
 0xbf1   : > { %3866 = vrcp.f32 %v2324_v25  ;;  %v3411_v25 = vld [vmem:[#allocation22 + $0x38] sm:$0xf0] }
 0xbf4   : > { %v2137_v26 = vpop.f32.mrf.mxu2 }
 0xbf5   : > { %v2141_v27 = vpack.c.bf16 %v2137_v26, %v2137_v26  ;;  %v3414_v26 = vor.u32 %v3590_v23, %v3411_v25 }
 0xbf7   : > { %v3867_v29 = vpop.eup %3866  ;;  %3351 = vmatmul.msk.bf16.vlgmr.msra.gmra.mxu3 %vm1408_vm7, %v2141_v27  ;;  %v3401_v27 = vld [vmem:[#allocation22 + $0x20] sm:$0xf] }
 0xbf8   : > { %v2326_v30 = vmul.f32 %v3867_v29, %v3863_v13  ;;  %v3417_v13 = vld [vmem:[#allocation22 + $0x40] sm:$0xf]  ;;  %v3588_v29 = vld [vmem:[#allocation22 + $0x24] sm:$0xf] }
 0xbf9   : > { %v3418_v53 = vor.u32 %v3593_v15, %v3417_v13 }
 0xbfa   : > { %v2327_v24 = vadd.f32 %v2326_v30, %v2237_v19  ;;  %v2328_v35 = vpack.c.bf16 %v2326_v30, %v2326_v30  ;;  %v3422_v19 = vor.u32 %v3592_v16, %v3419_v18  ;;  %v3402_v30 = vor.u32 %v3589_v28, %v3401_v27 }
 0xbfc   : > { %v2386_v31 = vmul.f32 0.25, %v2327_v24  ;;  %v2139_v32 = vpop.f32.mrf.mxu2  ;;  %2537 = vmatpush.bf16.msra.mxu0 %v3422_v19  ;;  %v3403_v24 = vld [vmem:[#allocation22 + $0x28] sm:$0xf0] }
 0xbfd   : > { %v3393_v32 = vld [vmem:[#allocation22 + $0x10] sm:$0xf] }
 0xbfe   : > { %2712 = vst.msk [vmem:[%s1128_s24] sm:$0xff] %vm2047_vm13, %v2386_v31  ;;  %v3406_v31 = vor.u32 %v3588_v29, %v3403_v24 }
 0xc00   : > { %2538 = vmatpush.bf16.msra.mxu0 %v3414_v26 }
 0xc03   : > { %v2330_v33 = vpop.permute.xlu0 %2329 }
 0xc04   : > { %2342 = vmatpush.bf16.msra.mxu1 %v2330_v33  ;;  %2539 = vmatpush.bf16.msra.mxu0 %v3406_v31  ;;  %v3587_v33 = vld [vmem:[#allocation22 + $0x14] sm:$0xf0] }
 0xc07   : > { %3373 = vmatmul.msk.bf16.vlgmr.msra.gmra.mxu1 %vm2047_vm13, %v2328_v35  ;;  %v3586_v35 = vld [vmem:[#allocation22 + $0x14] sm:$0xf] }
 0xc17   : > { %v2254_v36 = vpop.f32.mrf.mxu2 }
 0xc18   : > { %v2258_v37 = vpack.c.bf16 %v2254_v36, %v2254_v36  ;;  %v3394_v36 = vor.u32 %v3587_v33, %v3393_v32 }
 0xc1a   : > { %3371 = vmatmul.msk.bf16.vlgmr.msrb.gmra.mxu3 %vm1408_vm7, %v2258_v37  ;;  %v3395_v37 = vld [vmem:[#allocation22 + $0x18] sm:$0xf0] }
 0xc1b   : > { %v3398_v40 = vor.u32 %v3586_v35, %v3395_v37 }
 0xc1d   : > { %2540 = vmatpush.bf16.msra.mxu0 %v3398_v40 }
 0xc1f   : > { %v2256_v38 = vpop.f32.mrf.mxu2 }
 0xc20   : > { %v3385_v38 = vld [vmem:[#allocation22] sm:$0xf] }
 0xc7a   : > { %v2170_v34 = vpop.f32.mrf.mxu3 }
 0xc7b   : > { %v2199_v45 = vadd.f32 %v5024_v1, %v2170_v34  ;;  %v3442_v1 = vor.u32 %v3599_v56, %v3441_v55  ;;  %v3584_v34 = vld [vmem:[#allocation22 + $0x4] sm:$0xf] }
 0xc7c   : > { %v3604_v55 = vld [vmem:[#allocation23 + $0x20] sm:$0xff] }
 0xc7d   : > { %2521 = vmatpush.bf16.msra.mxu3 %v3442_v1  ;;  %v3611_v1 = vld [vmem:[#allocation23 + $0x58] sm:$0xff] }
 0xc81   : > { %2522 = vmatpush.bf16.msra.mxu3 %v3434_v3  ;;  %v3826_v3 = vld [vmem:[%s5274_s25] ss:$0 sm:$0xff] }
 0xc82   : > { %v2172_v42 = vpop.f32.mrf.mxu3 }
 0xc83   : > { %v3387_v42 = vld [vmem:[#allocation22 + $0x8] sm:$0xf0] }
 0xc84   : > { %v2344_v17 = vpop.f32.mrf.mxu1 }
 0xc85   : > { %v2348_v43 = vpack.c.bf16 %v2344_v17, %v2344_v17  ;;  %2523 = vmatpush.bf16.msra.mxu3 %v3426_v10  ;;  %v3386_v17 = vor.u32 %v3585_v39, %v3385_v38  ;;  %v3608_v10 = vld [vmem:[#allocation23 + $0x40] sm:$0xff] }
 0xc87   : > { %3382 = vmatmul.msk.bf16.vlgmr.msra.gmra.mxu2 %vm1408_vm7, %v2348_v43  ;;  %v3390_v43 = vor.u32 %v3584_v34, %v3387_v42 }
 0xc89   : > { %2524 = vmatpush.bf16.msra.mxu3 %v3418_v53  ;;  %2541 = vmatpush.bf16.msra.mxu0 %v3390_v43 }
 0xc8c   : > { %v2346_v44 = vpop.f32.mrf.mxu1 }
 0xc8d   : > { %2525 = vmatpush.bf16.msra.mxu3 %v3410_v8  ;;  %v3615_v44 = vld [vmem:[#allocation23 + $0x78] sm:$0xff] }
 0xc8e   : > { %2696 = vmatpush.bf16.msrb.mxu2 %v3615_v44 }
 0xc91   : > { %2526 = vmatpush.bf16.msra.mxu3 %v3402_v30 }
 0xc95   : > { %2527 = vmatpush.bf16.msra.mxu3 %v3394_v36 }
 0xc99   : > { %2528 = vmatpush.bf16.msra.mxu3 %v3386_v17 }
 0xc9d   : > { %v2287_v46 = vpop.f32.mrf.mxu3 }
 0xc9e   : > { %v2291_v47 = vadd.f32 %v2287_v46, %v2199_v45  ;;  %v3607_v45 = vld [vmem:[#allocation23 + $0x38] sm:$0xff] }
 0xc9f   : > { %2683 = vmatpush.bf16.msrb.mxu1 %v3607_v45 }
 0xca5   : > { %v2289_v48 = vpop.f32.mrf.mxu3 }
 0xca6   : > { %v3614_v48 = vld [vmem:[#allocation23 + $0x70] sm:$0xff] }
 0xca7   : > { %2697 = vmatpush.bf16.msrb.mxu2 %v3614_v48 }
 0xd0a   : > { %v2377_v49 = vpop.f32.mrf.mxu2 }
 0xd0b   : > { %v2381_v50 = vadd.f32 %v2377_v49, %v2291_v47 }
 0xd0d   : > { %v2385_v51 = vadd.f32 %v3824_v21, %v2381_v50  ;;  %v3606_v21 = vld [vmem:[#allocation23 + $0x30] sm:$0xff]  ;;  %v3613_v50 = vld [vmem:[#allocation23 + $0x68] sm:$0xff] }
 0xd0e   : > { %2684 = vmatpush.bf16.msrb.mxu1 %v3606_v21  ;;  %2698 = vmatpush.bf16.msrb.mxu2 %v3613_v50 }
 0xd0f   : > { %v5050_v52 = vadd.f32 %v2385_v51, %v4967_v41  ;;  %v3605_v51 = vld [vmem:[#allocation23 + $0x28] sm:$0xff] }
 0xd11   : > { %2390 = vadd.xlane.f32.xlu2 %v5050_v52 }
 0xd12   : > { %v2379_v54 = vpop.f32.mrf.mxu2  ;;  %2685 = vmatpush.bf16.msrb.mxu1 %v3605_v51 }
 0xd13   : > { %v3612_v54 = vld [vmem:[#allocation23 + $0x60] sm:$0xff] }
 0xd14   : > { %2699 = vmatpush.bf16.msrb.mxu2 %v3612_v54 }
 0xd16   : > { %2686 = vmatpush.bf16.msrb.mxu1 %v3604_v55 }
 0xd18   : > { %2700 = vmatpush.bf16.msrb.mxu2 %v3611_v1 }
 0xd84   : > { %v2391_v60 = vpop.xlane.xlu2 %2390 }
 0xd85   : > { %v2392_v61 = vmul.f32 %v2391_v60, %v4888_v14  ;;  %v3610_v60 = vld [vmem:[#allocation23 + $0x50] sm:$0xff] }
 0xd86   : > { %2701 = vmatpush.bf16.msrb.mxu2 %v3610_v60 }
 0xd87   : > { %v5055_v62 = vsub.f32 %v5050_v52, %v2392_v61 }
 0xd89   : > { %v2394_v41 = vmul.f32 %v5055_v62, %v5055_v62 }
 0xd8a   : > { %2702 = vmatpush.bf16.msrb.mxu2 %v3609_v7 }
 0xd8b   : > { %2395 = vadd.xlane.f32.xlu0 %v2394_v41 }
 0xd8e   : > { %2703 = vmatpush.bf16.msrb.mxu2 %v3608_v10 }
 0xdfe   : > { %v2396_v46 = vpop.xlane.xlu0 %2395 }
 0xdff   : > { %v2397_v47 = vmul.f32 %v2396_v46, %v4888_v14  ;;  %v3603_v14 = vld [vmem:[#allocation23 + $0x18] sm:$0xff] }
 0xe00   : > { %2687 = vmatpush.bf16.msrb.mxu1 %v3603_v14 }
 0xe01   : > { %v2398_v49 = vadd.f32 1e-05, %v2397_v47 }
 0xe03   : > { %3868 = vrsqrt.f32 %v2398_v49  ;;  %vm2405_vm15 = vweird.f32 %v2398_v49 }
 0xe04   : > { %2688 = vmatpush.bf16.msrb.mxu1 %v3602_v9 }
 0xe08   : > { %2689 = vmatpush.bf16.msrb.mxu1 %v3601_v11 }
 0xe09   : > { %v3869_v56 = vpop.eup %3868 }
 0xe0a   : > { %v2400_v57 = vmul.f32 %v3869_v56, %v2398_v49  ;;  %vm2406_vm14 = vweird.f32 %v3869_v56 }
 0xe0b   : > { %vm2407_vm0 = vmor %vm2405_vm15, %vm2406_vm14 }
 0xe0c   : > { %v2401_v58 = vmul.f32 %v3869_v56, %v2400_v57  ;;  %2690 = vmatpush.bf16.msrb.mxu1 %v3600_v12 }
 0xe0e   : > { %v2402_v59 = vmul.f32 0.5, %v2401_v58 }
 0xe10   : > { %v2403_v61 = vsub.f32 1.5, %v2402_v59 }
 0xe12   : > { %v2404_v41 = vmul.f32 %v3869_v56, %v2403_v61 }
 0xe14   : > { %v2408_v0 = vsel %vm2407_vm0, %v3869_v56, %v2404_v41 }
 0xe15   : > { %v2409_v2 = vmul.f32 %v2408_v0, %v5055_v62  ;;  %v2435_v62 = vld [vmem:[%s5275_s26] sm:$0x3] }
 0xe16   : > { %v2438_v13 = vperm.slane %v2435_v62, 1  ;;  %v2437_v18 = vperm.slane %v2435_v62, 0 }
 0xe17   : > { %v2413_v4 = vmul.f32 %v3825_v63, %v2409_v2 }
 0xe19   : > { %v2417_v5 = vadd.f32 %v3826_v3, %v2413_v4 }
 0xe1b   : > { %v2418_v6 = vpack.c.bf16 %v2417_v5, %v2417_v5 }
 0xe1d   : > { %2529 = vmatmul.bf16.vlgmr.msra.gmra.mxu3 %v2418_v6  ;;  %2542 = vmatmul.bf16.vlgmr.msra.gmra.mxu0 %v2418_v6 }
 0xe9a   : > { %v2543_v15 = vpop.f32.mrf.mxu0 }
 0xe9b   : > { %v2544_v16 = vadd.f32 %v2543_v15, %v2438_v13 }
 0xe9d   : > { %v2548_v53 = vmax.f32 %v2544_v16, 0.0 }
 0xe9f   : > { %v2550_v19 = vpack.c.bf16 %v2548_v53, %v2548_v53 }
 0xea0   : > { %v2530_v20 = vpop.f32.mrf.mxu3 }
 0xea1   : > { %v2531_v22 = vadd.f32 %v2530_v20, %v2437_v18  ;;  %2704 = vmatmul.bf16.vlgmr.msrb.gmra.mxu2 %v2550_v19 }
 0xea2   : > { %v2545_v23 = vpop.f32.mrf.mxu0 }
 0xea3   : > { %v2547_v8 = vmax.f32 %v2531_v22, 0.0 }
 0xea5   : > { %v2549_v25 = vpack.c.bf16 %v2547_v8, %v2547_v8 }
 0xea7   : > { %2691 = vmatmul.bf16.vlgmr.msrb.gmra.mxu1 %v2549_v25 }
 0xea8   : > { %v2532_v26 = vpop.f32.mrf.mxu3 }
 0xea9   : > { %4317 = shalt.err (!%p4314_p11)
}
 0xeaa   : > { %3667 = dma.vmem_to_hbm [thread:$0]  (%p4732_p5), %s2753_s23, 128, %s2755_s3, %s5081_s20  }
 0xeab   : > { %s5279_s27 = sld [smem:[#allocation72_spill]]  ;;  %s2767_s11 = sshll.u32 %s1128_s24, 4  ;;  %s2768_s11 = int_to_ptr.vmem [resolvable:$true] %s2767_s11 }
 0xeb1   : > { %s2765_s25 = scalar_lea.hbm %s5279_s27, %s5071_s1  ;;  %s4338_s14 = scalar_lea.hbm %s5279_s27, 16 }
 0xeb2   : > { %s2769_s19 = sshll.u32 %s2765_s25, 4  ;;  %s2770_s19 = int_to_ptr.hbm [resolvable:$true] %s2769_s19 }
 0xeb3   : > { %s4332_s26 = sshra.s32 %s2770_s19, 4  ;;  %s4333_s26 = int_to_ptr.hbm [resolvable:$true] %s4332_s26 }
 0xeb4   : > { %s4334_s30 = scalar_lea.hbm %s4333_s26, 8  ;;  %p4339_p2 = scmp.lt.s32.totalorder %s4333_s26, %s5279_s27 }
 0xeb5   : > { %p4335_p12 = scmp.ne.s32.totalorder %s4333_s26, %s4334_s30  ;;  %p4340_p7 = scmp.lt.s32.totalorder %s4338_s14, %s4334_s30 }
 0xeb7   : > { %p4336_p13 = pnand %p4335_p12, %p4732_p5  ;;  %p4341_p1 = por %p4340_p7, %p4339_p2 }
 0xeb9   : > { %p4337_p0 = pneg %p4336_p13 }
 0xebb   : > { %p4342_p3 = pnand %p4341_p1, %p4337_p0 }
 0xebd   : > { %4345 = shalt.err (!%p4342_p3)
}
 0xebe   : > { %3668 = dma.vmem_to_hbm [thread:$0]  (%p4732_p5), %s2768_s11, 128, %s2770_s19, %s5081_s20  }
 0xebf   : > { %s5280_s22 = sld [smem:[#allocation69_spill]]  ;;  %s1114_s28 = scalar_lea.vmem [#allocation25], %s4842_s21 }
 0xec0   : > { %s5281_s5 = sld [smem:[#allocation70_spill]]  ;;  %s2737_s6 = sshll.u32 %s1114_s28, 4  ;;  %s2738_s6 = int_to_ptr.vmem [resolvable:$true] %s2737_s6 }
 0xec1   : > { %s2714_s20 = scalar_lea.sflag [#allocation4], %s4839_s15 }
 0xec5   : > { %v3827_v27 = vld [vmem:[%s5280_s22] ss:$0 sm:$0xff] }
 0xec6   : > { %s5282_s29 = smov %s5281_s5  ;;  %s2735_s13 = scalar_lea.hbm %s5281_s5, %s5071_s1 }
 0xec7   : > { %s2739_s25 = sshll.u32 %s2735_s13, 4  ;;  %s4366_s26 = scalar_lea.hbm %s5282_s29, 16  ;;  %s2740_s25 = int_to_ptr.hbm [resolvable:$true] %s2739_s25 }
 0xec8   : > { %s4360_s11 = sshra.s32 %s2740_s25, 4  ;;  %s4361_s11 = int_to_ptr.hbm [resolvable:$true] %s4360_s11 }
 0xec9   : > { %s4362_s19 = scalar_lea.hbm %s4361_s11, 8  ;;  %p4367_p10 = scmp.lt.s32.totalorder %s4361_s11, %s5282_s29 }
 0xeca   : > { %p4363_p4 = scmp.ne.s32.totalorder %s4361_s11, %s4362_s19  ;;  %p4368_p11 = scmp.lt.s32.totalorder %s4366_s26, %s4362_s19 }
 0xecc   : > { %p4364_p6 = pnand %p4363_p4, %p4732_p5  ;;  %p4369_p12 = por %p4368_p11, %p4367_p10 }
 0xece   : > { %p4365_p8 = pneg %p4364_p6 }
 0xed0   : > { %p4370_p13 = pnand %p4369_p12, %p4365_p8 }
 0xf24   : > { %v2692_v28 = vpop.f32.mrf.mxu1  ;;  %v2705_v29 = vpop.f32.mrf.mxu2 }
 0xf25   : > { %v2693_v30 = vadd.f32 %v3827_v27, %v2692_v28 }
 0xf27   : > { %v2706_v24 = vadd.f32 %v2705_v29, %v2693_v30 }
 0xf29   : > { %v2709_v31 = vadd.f32 %v2706_v24, %v5050_v52 }
 0xf2b   : > { %2710 = vst [vmem:[%s1114_s28] sm:$0xff] %v2709_v31 }
 0xf2c   : > { %v2694_v32 = vpop.f32.mrf.mxu1  ;;  %v2707_v33 = vpop.f32.mrf.mxu2 }
 0xf2d   : > { %4373 = shalt.err (!%p4370_p13)
}
 0xf2e   : > { %3666 = dma.vmem_to_hbm [thread:$0]  (%p4732_p5), %s2738_s6, 128, %s2740_s25, %s2714_s20  }
 0xf2f PF: > { %s5283_s15 = sld [smem:[#allocation39_spill]] }
 0xf30   : > { %s5285_s14 = sld [smem:[#allocation42_spill]] }
 0xf35   : > { %s2781_s23 = sand.u32 1, %s5283_s15  }
 0xf36   : > { %p5286_p0 = scmp.ge.s32.totalorder %s5285_s14, 2  ;;  %s2782_s3 = scalar_lea.sflag [#allocation4], %s2781_s23 }
 0xf38   : > { %p3717_p2 = pnand %p5286_p0, %p4740_p9 }
 0xf3a   : > { %p3718_p7 = pneg %p3717_p2 }
 0xf3c   : > { %4431 = dma.done.wait (%p3718_p7), %s2782_s3, 128  }
 0xf3d   : > { %4433 = vsyncadd (%p3718_p7), %s2782_s3, 4294967168  ;;  %s5287_s24 = sadd.s32 4294967294, %s5285_s14  }
 0xf3e   : > { %s2791_s18 = sand.u32 1, %s5287_s24  }
 0xf3f   : > { %s2792_s22 = scalar_lea.sflag [#allocation27], %s2791_s18 }
 0xf40   : > { %4435 = dma.done.wait (%p3718_p7), %s2792_s22, 256  }
 0xf41   : > { %4437 = vsyncadd (%p3718_p7), %s2792_s22, 4294967040  ;;  %s56_s5 = sadd.s32 1, %s5285_s14   ;;  %s5288_s0 = sld [smem:[#allocation40_spill]] }
 0xf42   : > { %p53_p5 = scmp.ge.s32.totalorder %s56_s5, 4   ;;  %s5289_s8 = sld [smem:[#allocation45_spill]] }
 0xf43   : > { %s5290_s10 = sld [smem:[#allocation43_spill]]  ;;  %s5291_s7 = smov %s4444_s4 }
 0xf44   : > { %s5293_s30 = smov %s4456_s9 }
 0xf45   :  { %55 = sbr.rel (!%p53_p5) target bundleno = 43 (0x2b), region = 265 }
 0xf47   : > { %s5292_s4 = smov %s5288_s0 }
 0xf49   : > { %s5294_s9 = smov %s5290_s10 }
 0xf4a   :  { %2808 = vsyncpa [#allocation3], 1 }
 0xf4b   :  { %2810 = vsyncpa [#allocation3 + $0x1], 1 }
 0xf4c   :  { %2811 = vsyncpa [#allocation6], 1 }
 0xf4d   :  { %2813 = vsyncpa [#allocation6 + $0x1], 1 }
 0xf4e   :  { %2814 = vsyncpa [#allocation9], 1 }
 0xf4f   :  { %2815 = vsyncpa [#allocation12], 1 }
 0xf50   :  { %2816 = vsyncpa [#allocation15], 1 }
 0xf51   :  { %2817 = vsyncpa [#allocation18], 1 }
 0xf52   :  { %2818 = vsyncpa [#allocation21], 1 }
 0xf53   :  { %2819 = vsyncpa [#allocation24], 1 }
 0xf54   :  { %2820 = vsyncpa [#allocation4], 1 }
 0xf55   :  { %2822 = vsyncpa [#allocation4 + $0x1], 1 }
 0xf56   :  { %2823 = vsyncpa [#allocation27], 1 }
 0xf57   :  { %2825 = vsyncpa [#allocation27 + $0x1], 1 }

</bundles_post_ra>
